<compile_context>
chip_gen: v5e
topology: v5e:2x2
jax: 0.10.0
libtpu: 0.0.40
codegen_flags: <defaults>
</compile_context>

<pallas_src>
import functools
import math

import jax
import jax.numpy as jnp
from jax import lax
from jax.experimental import pallas as pl
from jax.experimental.pallas import tpu as pltpu


# ----------------------------------------------------------------------------
# fused im2col + single-matmul 3x3 stride-1 pad-1 conv kernel
# (one row tile per grid step; bf16 operands -> f32 accum; bias + ReLUs fused)
# ----------------------------------------------------------------------------
def _conv3x3_kernel(x_ref, w_ref, b_ref, o_ref, col_ref, xr_ref=None, *,
                    rows, wp, cin, relu_in, relu_out):
    """x_ref : ((rows+2)*wp + 2, Cin) bf16  flattened zero-padded row tile
               (wp = W + 2; the 2 tail pad rows keep the last full-width tap
                slice in bounds and only ever feed discarded junk columns)
       w_ref : (9*Cin, Cout)          bf16  tap-major (dy, dx, cin) weights
       b_ref : (1, Cout)              f32
       o_ref : (rows*wp, Cout)        f32   full-width rows (2 junk cols/row)
       col_ref: (rows*wp, 9*Cin)      bf16  VMEM im2col scratch
       xr_ref : like x_ref                  VMEM scratch (only when relu_in)
    """
    m = rows * wp
    if relu_in:                                   # hoisted: once per tile, not 9x
        xr_ref[...] = jnp.maximum(x_ref[...], 0)
        src = xr_ref
    else:
        src = x_ref
    # im2col: every tap is a *contiguous* row-slice of the flat padded tile
    # (no 3-D slice / H*W-merging reshapes), written to its K-block.
    for t in range(9):
        dy, dx = divmod(t, 3)
        col_ref[:, t * cin:(t + 1) * cin] = src[pl.ds(dy * wp + dx, m), :]
    # one big-K MXU matmul: (M, 9*Cin) x (9*Cin, Cout) -> f32
    acc = jnp.dot(col_ref[...], w_ref[...], preferred_element_type=jnp.float32)
    acc = acc + b_ref[...]                        # fused bias
    if relu_out:                                  # fused activate_after
        acc = jnp.maximum(acc, 0.0)
    # TODO(synk): optionally store bf16 here to halve HBM writeback (v5e lever).
    o_ref[...] = acc.astype(o_ref.dtype)


def _step_vmem_bytes(lp, m, k, cout, cin, relu_in):
    in_blk = lp * cin * 2
    out_blk = m * cout * 4
    w_blk = k * cout * 2 + cout * 4
    col = m * k * 2
    xr = in_blk if relu_in else 0
    return 2 * (in_blk + out_blk) + w_blk + col + xr   # 2x: double buffering


def _pick_row_tile(h, w, cin, cout, relu_in, budget=24 * 1024 * 1024):
    """Largest divisor of H (<= 64 rows/step) whose VMEM footprint fits."""
    for th in range(min(h, 64), 0, -1):
        if h % th:
            continue
        wp = w + 2
        if _step_vmem_bytes((th + 2) * wp + 2, th * wp, 9 * cin, cout,
                            cin, relu_in) <= budget:
            return th
    return 1


def conv3x3_p1_rowtiled(x, w, b, *, relu_in=False, relu_out=False, row_tile=None):
    """y = [relu]( conv3x3_s1_p1([relu] x, w) + b ),  NHWC.

    x: (B, H, W, Cin);  w: (3, 3, Cin, Cout);  b: (Cout,).
    Returns (B, n_tiles, row_tile, W+2, Cout) f32 — full-width rows; the two
    trailing columns of each row are junk and must be dropped by the caller
    (so the strip fuses with the caller's own output-layout pass).
    """
    B, H, W, Cin = x.shape
    Cout = w.shape[-1]
    th = row_tile if row_tile is not None else _pick_row_tile(H, W, Cin, Cout, relu_in)
    if H % th:
        raise ValueError(f"row_tile {th} must divide H={H}")
    # TODO(synk): non-divisible H would need a masked tail tile.
    nt = H // th
    wp = W + 2
    lp = (th + 2) * wp + 2           # +2 tail rows: keeps the last tap slice in bounds
    m = th * wp

    # pad + bf16 cast + overlapping (1-row halo) tile extraction: one fused
    # producer pass in XLA; every Pallas block is then non-overlapping so the
    # standard auto-pipelined (double-buffered) BlockSpec path applies.
    xp = jnp.pad(x.astype(jnp.bfloat16), ((0, 0), (1, 1), (1, 1), (0, 0)))
    tiles = jnp.stack([xp[:, i * th:i * th + th + 2] for i in range(nt)], axis=1)
    tiles = tiles.reshape(B, nt, (th + 2) * wp, Cin)
    tiles = jnp.pad(tiles, ((0, 0), (0, 0), (0, 2), (0, 0)))

    wr = w.reshape(9 * Cin, Cout).astype(jnp.bfloat16)
    br = b.reshape(1, Cout).astype(jnp.float32)

    est = _step_vmem_bytes(lp, m, 9 * Cin, Cout, Cin, relu_in)
    vmem_limit = int(min(96 * 2**20, max(32 * 2**20, 2 * est + (8 << 20))))

    scratch = [pltpu.VMEM((m, 9 * Cin), jnp.bfloat16)]
    if relu_in:
        scratch.append(pltpu.VMEM((lp, Cin), jnp.bfloat16))

    out = pl.pallas_call(
        functools.partial(_conv3x3_kernel, rows=th, wp=wp, cin=Cin,
                          relu_in=relu_in, relu_out=relu_out),
        out_shape=jax.ShapeDtypeStruct((B, nt, m, Cout), jnp.float32),
        grid=(B, nt),
        in_specs=[
            pl.BlockSpec((None, None, lp, Cin), lambda bb, tt: (bb, tt, 0, 0)),
            pl.BlockSpec((9 * Cin, Cout), lambda bb, tt: (0, 0)),
            pl.BlockSpec((1, Cout), lambda bb, tt: (0, 0)),
        ],
        out_specs=pl.BlockSpec((None, None, m, Cout), lambda bb, tt: (bb, tt, 0, 0)),
        scratch_shapes=scratch,
        compiler_params=pltpu.CompilerParams(
            dimension_semantics=("parallel", "parallel"),
            vmem_limit_bytes=vmem_limit),
    )(tiles, wr, br)
    return out.reshape(B, nt, th, wp, Cout)


# ----------------------------------------------------------------------------
# weight rewrites: both 2x paths become a 3x3 parity conv + 2x2 pixel shuffle
# ----------------------------------------------------------------------------
def _deconv_k4s2p1_as_parity_conv3x3(w_t, b):
    """ConvTranspose2d(k=4,s=2,p=1) == conv3x3_s1_p1 (4*Cout parity outputs)
    + 2x2 pixel shuffle.   w_t: (Cin, Cout, 4, 4) PyTorch layout;  b: (Cout,).
    Per axis:  out[2q+r] = sum_{d in {0,1}} x[q + r - 1 + d] * W[3 - r - 2d].
    Output-channel layout of w_eff: (ry, rx, cout)."""
    cin, cout = w_t.shape[0], w_t.shape[1]
    w_eff = jnp.zeros((3, 3, cin, 2, 2, cout), w_t.dtype)
    for ry in range(2):
        for rx in range(2):
            for dy in range(2):
                for dx in range(2):
                    w_eff = w_eff.at[ry + dy, rx + dx, :, ry, rx, :].set(
                        w_t[:, :, 3 - ry - 2 * dy, 3 - rx - 2 * dx])
    return w_eff.reshape(3, 3, cin, 4 * cout), jnp.tile(b, 4)


def _nearest2x_conv3x3_as_parity_conv3x3(w_c, b):
    """nearest-2x upsample + Conv2d(k=3,s=1,p=1) == conv3x3_s1_p1 on the
    ORIGINAL-resolution input (4*Cout parity outputs) + 2x2 pixel shuffle.
    Exact, including the zero-padded edges.  w_c: (Cout, Cin, 3, 3);  b: (Cout,).
    Per output parity r, conv tap d maps to source-pixel offset:
        r=0: d=0,1,2 -> -1, 0, 0        r=1: d=0,1,2 -> 0, 0, +1
    so each per-parity effective tap is a sum of original taps."""
    cout, cin = w_c.shape[0], w_c.shape[1]
    w = jnp.transpose(w_c, (2, 3, 1, 0))                 # (3, 3, Cin, Cout)
    tap_of = ((0, 1, 1), (1, 1, 2))                      # [parity][d] -> 3x3 tap index
    w_eff = jnp.zeros((3, 3, cin, 2, 2, cout), w.dtype)
    for ry in range(2):
        for rx in range(2):
            for dy in range(3):
                for dx in range(3):
                    w_eff = w_eff.at[tap_of[ry][dy], tap_of[rx][dx], :, ry, rx, :].add(
                        w[dy, dx])
    return w_eff.reshape(3, 3, cin, 4 * cout), jnp.tile(b, 4)


# ----------------------------------------------------------------------------
# 2x bilinear glue (align_corners=False; exact edge clamping), kept in jnp
# ----------------------------------------------------------------------------
def _up2_linear(x, axis):
    n = x.shape[axis]
    lo = jnp.concatenate([lax.slice_in_dim(x, 0, 1, axis=axis),
                          lax.slice_in_dim(x, 0, n - 1, axis=axis)], axis=axis)
    hi = jnp.concatenate([lax.slice_in_dim(x, 1, n, axis=axis),
                          lax.slice_in_dim(x, n - 1, n, axis=axis)], axis=axis)
    interleaved = jnp.stack([0.75 * x + 0.25 * lo, 0.75 * x + 0.25 * hi],
                            axis=axis + 1)
    return interleaved.reshape(x.shape[:axis] + (2 * n,) + x.shape[axis + 1:])


def _bilinear_up2_nhwc(x):
    return _up2_linear(_up2_linear(x, 1), 2)


# ----------------------------------------------------------------------------
# UpSample.forward
# ----------------------------------------------------------------------------
def upsample_forward(params, x_nchw, *, upsample_type='deconv',
                     activate_before='none', activate_after='none',
                     row_tile=None):
    if activate_before not in ('none', 'relu') or activate_after not in ('none', 'relu'):
        raise NotImplementedError
    if upsample_type not in ('deconv', 'nearest', 'bilinear'):
        raise NotImplementedError(f'upsample {upsample_type} not implemented!')
    relu_in = activate_before == 'relu'
    relu_out = activate_after == 'relu'

    x = jnp.transpose(x_nchw, (0, 2, 3, 1))              # NCHW -> NHWC (C on lanes)
    B, H, W, _ = x.shape
    cout = params['b'].shape[0]

    if upsample_type in ('deconv', 'nearest'):
        # Both reduce exactly to: 3x3 parity conv on ORIGINAL-resolution x
        # (4*Cout outputs) + 2x2 pixel shuffle -> no 4x HBM intermediate.
        if upsample_type == 'deconv':
            w_eff, b_eff = _deconv_k4s2p1_as_parity_conv3x3(params['w'], params['b'])
        else:
            w_eff, b_eff = _nearest2x_conv3x3_as_parity_conv3x3(params['w'], params['b'])
        # relu commutes with zero padding / nearest replication -> fused in-kernel
        y = conv3x3_p1_rowtiled(x, w_eff, b_eff, relu_in=relu_in,
                                relu_out=relu_out, row_tile=row_tile)
        nt, th = y.shape[1], y.shape[2]
        # junk-column strip + pixel shuffle + NHWC->NCHW: one layout pass.
        # TODO(synk): keep activations NHWC across layers to drop this transpose.
        y = y[:, :, :, :W, :].reshape(B, nt, th, W, 2, 2, cout)
        return jnp.transpose(y, (0, 6, 1, 2, 4, 3, 5)).reshape(B, cout, 2 * H, 2 * W)

    # bilinear: relu + 2x interpolation + pad + bf16 cast fuse into one jnp
    # producer feeding the same conv kernel at the upsampled resolution.
    # TODO(synk): express bilinear-2x + conv3x3 as a boundary-corrected parity
    # conv on original-resolution x to drop this 4x-sized intermediate too.
    xi = jnp.maximum(x, 0.0) if relu_in else x            # relu before the mix
    xu = _bilinear_up2_nhwc(xi)                           # (B, 2H, 2W, Cin)
    w = jnp.transpose(params['w'], (2, 3, 1, 0))          # OIHW -> (3,3,Cin,Cout)
    y = conv3x3_p1_rowtiled(xu, w, params['b'], relu_in=False,
                            relu_out=relu_out, row_tile=row_tile)
    nt, th = y.shape[1], y.shape[2]
    y = y[:, :, :, :2 * W, :]
    return jnp.transpose(y, (0, 4, 1, 2, 3)).reshape(B, cout, 2 * H, 2 * W)


# ----------------------------------------------------------------------------
# pure-lax reference oracle (operands bf16-rounded to match the kernel)
# ----------------------------------------------------------------------------
def _bf16(a):
    return a.astype(jnp.bfloat16).astype(jnp.float32)


def _reference(params, x_nchw, *, upsample_type, activate_before, activate_after):
    x = jnp.maximum(x_nchw, 0.0) if activate_before == 'relu' else x_nchw
    if upsample_type == 'deconv':
        # ConvTranspose2d(k4,s2,p1) == lhs-dilated conv with flipped kernel
        wc = jnp.transpose(jnp.flip(params['w'], axis=(2, 3)), (1, 0, 2, 3))
        y = lax.conv_general_dilated(
            _bf16(x), _bf16(wc), window_strides=(1, 1),
            padding=((2, 2), (2, 2)), lhs_dilation=(2, 2),
            dimension_numbers=('NCHW', 'OIHW', 'NCHW'),
            preferred_element_type=jnp.float32)
    else:
        if upsample_type == 'nearest':
            xu = jnp.repeat(jnp.repeat(x, 2, axis=2), 2, axis=3)
        else:
            xu = jnp.transpose(
                _bilinear_up2_nhwc(jnp.transpose(x, (0, 2, 3, 1))), (0, 3, 1, 2))
        y = lax.conv_general_dilated(
            _bf16(xu), _bf16(params['w']), window_strides=(1, 1),
            padding=((1, 1), (1, 1)),
            dimension_numbers=('NCHW', 'OIHW', 'NCHW'),
            preferred_element_type=jnp.float32)
    y = y + params['b'][None, :, None, None]
    return jnp.maximum(y, 0.0) if activate_after == 'relu' else y


# ----------------------------------------------------------------------------
if __name__ == '__main__':
    B, Cin, Cout, H, W = 2, 64, 64, 16, 16
    key = jax.random.PRNGKey(0)
    kx, kw1, kb1, kw2, kb2 = jax.random.split(key, 5)

    x = jax.random.normal(kx, (B, Cin, H, W), jnp.float32)
    # ConvTranspose2d(Cin, Cout, 4, 2, 1) params — PyTorch layout (Cin, Cout, 4, 4)
    deconv_p = {
        'w': jax.random.normal(kw1, (Cin, Cout, 4, 4), jnp.float32) / math.sqrt(Cin * 16),
        'b': 0.02 * jax.random.normal(kb1, (Cout,), jnp.float32),
    }
    # Conv2d(Cin, Cout, 3, 1, 1) params — PyTorch layout (Cout, Cin, 3, 3)
    conv_p = {
        'w': jax.random.normal(kw2, (Cout, Cin, 3, 3), jnp.float32) / math.sqrt(Cin * 9),
        'b': 0.02 * jax.random.normal(kb2, (Cout,), jnp.float32),
    }

    # (type, params, activate_before, activate_after, abs tolerance)
    # nearest uses summed effective bf16 weights -> slightly looser tolerance.
    cases = [
        ('deconv',   deconv_p, 'relu', 'none', 5e-3),
        ('nearest',  conv_p,   'none', 'relu', 5e-2),
        ('bilinear', conv_p,   'relu', 'relu', 5e-3),
    ]
    for utype, p, act_b, act_a, tol in cases:
        fwd = jax.jit(functools.partial(
            upsample_forward, upsample_type=utype,
            activate_before=act_b, activate_after=act_a,
            row_tile=8))                 # 8-row tiles -> multi-step grid exercised
        out = fwd(p, x)
        jax.block_until_ready(out)
        assert out.shape == (B, Cout, 2 * H, 2 * W), (utype, out.shape)
        assert bool(jnp.all(jnp.isfinite(out))), utype
        ref = _reference(p, x, upsample_type=utype,
                         activate_before=act_b, activate_after=act_a)
        err = float(jnp.max(jnp.abs(out - ref)))
        assert err < tol, (utype, err)

    print("KERNEL_OK")
</pallas_src>

<mosaic_0001>
module attributes {stable_mosaic.version = 11 : i64} {
  func.func @_conv3x3_kernel(%arg0: i32, %arg1: i32, %arg2: memref<1x1x182x64xbf16, #tpu.memory_space<vmem>>, %arg3: memref<576x256xbf16, #tpu.memory_space<vmem>>, %arg4: memref<1x256xf32, #tpu.memory_space<vmem>>, %arg5: memref<1x1x144x256xf32, #tpu.memory_space<vmem>>, %arg6: memref<144x576xbf16, #tpu.memory_space<vmem>>, %arg7: memref<182x64xbf16, #tpu.memory_space<vmem>>) attributes {dimension_semantics = [#tpu.dimension_semantics<parallel>, #tpu.dimension_semantics<parallel>], iteration_bounds = array<i64: 2, 2>, scalar_prefetch = 0 : i64, scratch_operands = 2 : i64, tpu.core_type = #tpu.core_type<tc>, window_params = [{transform_indices = @transform_0, window_bounds = array<i64: 1, 1, 182, 64>}, {pipeline_mode = #tpu.pipeline_mode<synchronous>, transform_indices = @transform_1, window_bounds = array<i64: 576, 256>}, {pipeline_mode = #tpu.pipeline_mode<synchronous>, transform_indices = @transform_2, window_bounds = array<i64: 1, 256>}, {transform_indices = @transform_3, window_bounds = array<i64: 1, 1, 144, 256>}]} {
    %c0 = arith.constant 0 : index
    %c0_0 = arith.constant 0 : index
    %c0_1 = arith.constant 0 : index
    %c0_2 = arith.constant 0 : index
    %0 = vector.load %arg2[%c0, %c0_0, %c0_1, %c0_2] : memref<1x1x182x64xbf16, #tpu.memory_space<vmem>>, vector<1x1x182x64xbf16>
    %1 = vector.shape_cast %0 : vector<1x1x182x64xbf16> to vector<182x64xbf16>
    %cst = arith.constant 0.000000e+00 : bf16
    %2 = vector.broadcast %cst : bf16 to vector<182x64xbf16>
    %3 = arith.maximumf %1, %2 : vector<182x64xbf16>
    %c0_3 = arith.constant 0 : index
    %c0_4 = arith.constant 0 : index
    %4 = vector.load %arg7[%c0_3, %c0_4] : memref<182x64xbf16, #tpu.memory_space<vmem>>, vector<182x64xbf16>
    tpu.vector_store %arg7[%c0_3, %c0_4], %3 {strides = array<i32>} : memref<182x64xbf16, #tpu.memory_space<vmem>>, vector<182x64xbf16>,
    %c0_5 = arith.constant 0 : index
    %c0_6 = arith.constant 0 : index
    %5 = vector.load %arg7[%c0_5, %c0_6] : memref<182x64xbf16, #tpu.memory_space<vmem>>, vector<144x64xbf16>
    %c0_7 = arith.constant 0 : index
    %c0_8 = arith.constant 0 : index
    %6 = vector.load %arg6[%c0_7, %c0_8] : memref<144x576xbf16, #tpu.memory_space<vmem>>, vector<144x64xbf16>
    tpu.vector_store %arg6[%c0_7, %c0_8], %5 {strides = array<i32>} : memref<144x576xbf16, #tpu.memory_space<vmem>>, vector<144x64xbf16>,
    %c1 = arith.constant 1 : index
    %c0_9 = arith.constant 0 : index
    %7 = vector.load %arg7[%c1, %c0_9] : memref<182x64xbf16, #tpu.memory_space<vmem>>, vector<144x64xbf16>
    %c0_10 = arith.constant 0 : index
    %c64 = arith.constant 64 : index
    %8 = vector.load %arg6[%c0_10, %c64] : memref<144x576xbf16, #tpu.memory_space<vmem>>, vector<144x64xbf16>
    tpu.vector_store %arg6[%c0_10, %c64], %7 {strides = array<i32>} : memref<144x576xbf16, #tpu.memory_space<vmem>>, vector<144x64xbf16>,
    %c2 = arith.constant 2 : index
    %c0_11 = arith.constant 0 : index
    %9 = vector.load %arg7[%c2, %c0_11] : memref<182x64xbf16, #tpu.memory_space<vmem>>, vector<144x64xbf16>
    %c0_12 = arith.constant 0 : index
    %c128 = arith.constant 128 : index
    %10 = vector.load %arg6[%c0_12, %c128] : memref<144x576xbf16, #tpu.memory_space<vmem>>, vector<144x64xbf16>
    tpu.vector_store %arg6[%c0_12, %c128], %9 {strides = array<i32>} : memref<144x576xbf16, #tpu.memory_space<vmem>>, vector<144x64xbf16>,
    %c18 = arith.constant 18 : index
    %c0_13 = arith.constant 0 : index
    %11 = vector.load %arg7[%c18, %c0_13] : memref<182x64xbf16, #tpu.memory_space<vmem>>, vector<144x64xbf16>
    %c0_14 = arith.constant 0 : index
    %c192 = arith.constant 192 : index
    %12 = vector.load %arg6[%c0_14, %c192] : memref<144x576xbf16, #tpu.memory_space<vmem>>, vector<144x64xbf16>
    tpu.vector_store %arg6[%c0_14, %c192], %11 {strides = array<i32>} : memref<144x576xbf16, #tpu.memory_space<vmem>>, vector<144x64xbf16>,
    %c19 = arith.constant 19 : index
    %c0_15 = arith.constant 0 : index
    %13 = vector.load %arg7[%c19, %c0_15] : memref<182x64xbf16, #tpu.memory_space<vmem>>, vector<144x64xbf16>
    %c0_16 = arith.constant 0 : index
    %c256 = arith.constant 256 : index
    %14 = vector.load %arg6[%c0_16, %c256] : memref<144x576xbf16, #tpu.memory_space<vmem>>, vector<144x64xbf16>
    tpu.vector_store %arg6[%c0_16, %c256], %13 {strides = array<i32>} : memref<144x576xbf16, #tpu.memory_space<vmem>>, vector<144x64xbf16>,
    %c20 = arith.constant 20 : index
    %c0_17 = arith.constant 0 : index
    %15 = vector.load %arg7[%c20, %c0_17] : memref<182x64xbf16, #tpu.memory_space<vmem>>, vector<144x64xbf16>
    %c0_18 = arith.constant 0 : index
    %c320 = arith.constant 320 : index
    %16 = vector.load %arg6[%c0_18, %c320] : memref<144x576xbf16, #tpu.memory_space<vmem>>, vector<144x64xbf16>
    tpu.vector_store %arg6[%c0_18, %c320], %15 {strides = array<i32>} : memref<144x576xbf16, #tpu.memory_space<vmem>>, vector<144x64xbf16>,
    %c36 = arith.constant 36 : index
    %c0_19 = arith.constant 0 : index
    %17 = vector.load %arg7[%c36, %c0_19] : memref<182x64xbf16, #tpu.memory_space<vmem>>, vector<144x64xbf16>
    %c0_20 = arith.constant 0 : index
    %c384 = arith.constant 384 : index
    %18 = vector.load %arg6[%c0_20, %c384] : memref<144x576xbf16, #tpu.memory_space<vmem>>, vector<144x64xbf16>
    tpu.vector_store %arg6[%c0_20, %c384], %17 {strides = array<i32>} : memref<144x576xbf16, #tpu.memory_space<vmem>>, vector<144x64xbf16>,
    %c37 = arith.constant 37 : index
    %c0_21 = arith.constant 0 : index
    %19 = vector.load %arg7[%c37, %c0_21] : memref<182x64xbf16, #tpu.memory_space<vmem>>, vector<144x64xbf16>
    %c0_22 = arith.constant 0 : index
    %c448 = arith.constant 448 : index
    %20 = vector.load %arg6[%c0_22, %c448] : memref<144x576xbf16, #tpu.memory_space<vmem>>, vector<144x64xbf16>
    tpu.vector_store %arg6[%c0_22, %c448], %19 {strides = array<i32>} : memref<144x576xbf16, #tpu.memory_space<vmem>>, vector<144x64xbf16>,
    %c38 = arith.constant 38 : index
    %c0_23 = arith.constant 0 : index
    %21 = vector.load %arg7[%c38, %c0_23] : memref<182x64xbf16, #tpu.memory_space<vmem>>, vector<144x64xbf16>
    %c0_24 = arith.constant 0 : index
    %c512 = arith.constant 512 : index
    %22 = vector.load %arg6[%c0_24, %c512] : memref<144x576xbf16, #tpu.memory_space<vmem>>, vector<144x64xbf16>
    tpu.vector_store %arg6[%c0_24, %c512], %21 {strides = array<i32>} : memref<144x576xbf16, #tpu.memory_space<vmem>>, vector<144x64xbf16>,
    %c0_25 = arith.constant 0 : index
    %c0_26 = arith.constant 0 : index
    %23 = vector.load %arg6[%c0_25, %c0_26] : memref<144x576xbf16, #tpu.memory_space<vmem>>, vector<144x576xbf16>
    %c0_27 = arith.constant 0 : index
    %c0_28 = arith.constant 0 : index
    %24 = vector.load %arg3[%c0_27, %c0_28] : memref<576x256xbf16, #tpu.memory_space<vmem>>, vector<576x256xbf16>
    %cst_29 = arith.constant dense<0.000000e+00> : vector<144x256xf32>
    %25 = tpu.matmul %23, %24, %cst_29 {dimension_numbers = #tpu.dot_dimension_numbers<[1], [0], [0], [1], [0, 0, 1, 1], [], []>} : vector<144x576xbf16>, vector<576x256xbf16>, vector<144x256xf32> -> vector<144x256xf32>
    %c0_30 = arith.constant 0 : index
    %c0_31 = arith.constant 0 : index
    %26 = vector.load %arg4[%c0_30, %c0_31] : memref<1x256xf32, #tpu.memory_space<vmem>>, vector<1x256xf32>
    %27 = vector.broadcast %26 : vector<1x256xf32> to vector<144x256xf32>
    %28 = arith.addf %25, %27 : vector<144x256xf32>
    %c0_32 = arith.constant 0 : index
    %c0_33 = arith.constant 0 : index
    %c0_34 = arith.constant 0 : index
    %c0_35 = arith.constant 0 : index
    %29 = vector.load %arg5[%c0_32, %c0_33, %c0_34, %c0_35] : memref<1x1x144x256xf32, #tpu.memory_space<vmem>>, vector<1x1x144x256xf32>
    %30 = vector.shape_cast %29 : vector<1x1x144x256xf32> to vector<144x256xf32>
    %31 = vector.shape_cast %28 : vector<144x256xf32> to vector<1x1x144x256xf32>
    tpu.vector_store %arg5[%c0_32, %c0_33, %c0_34, %c0_35], %31 {strides = array<i32>} : memref<1x1x144x256xf32, #tpu.memory_space<vmem>>, vector<1x1x144x256xf32>,
    return
  }
  func.func @transform_0(%arg0: i32, %arg1: i32) -> (i32, i32, i32, i32) {
    %c0_i32 = arith.constant 0 : i32
    %c0_i32_0 = arith.constant 0 : i32
    %c0_i32_1 = arith.constant 0 : i32
    return %arg0, %arg1, %c0_i32, %c0_i32_0 : i32, i32, i32, i32
  }
  func.func @transform_1(%arg0: i32, %arg1: i32) -> (i32, i32) {
    %c0_i32 = arith.constant 0 : i32
    %c0_i32_0 = arith.constant 0 : i32
    %c0_i32_1 = arith.constant 0 : i32
    return %c0_i32, %c0_i32_0 : i32, i32
  }
  func.func @transform_2(%arg0: i32, %arg1: i32) -> (i32, i32) {
    %c0_i32 = arith.constant 0 : i32
    %c0_i32_0 = arith.constant 0 : i32
    %c0_i32_1 = arith.constant 0 : i32
    return %c0_i32, %c0_i32_0 : i32, i32
  }
  func.func @transform_3(%arg0: i32, %arg1: i32) -> (i32, i32, i32, i32) {
    %c0_i32 = arith.constant 0 : i32
    %c0_i32_0 = arith.constant 0 : i32
    %c0_i32_1 = arith.constant 0 : i32
    return %arg0, %arg1, %c0_i32, %c0_i32_0 : i32, i32, i32, i32
  }
}

</mosaic_0001>

<bundles_post_ra>
// kernel: tile.9
= control target key start
LH: loop header
LB: loop body
LE: loop exit
PB: predicated region body
PF: predicated region fallthrough
CT: control target
= control target key end

     0   :  { %s6_s8 = smov 3  ;;  %vm8_vm0 = vcmask 523264   ;;  %s31_s9 = smov 64   ;;  %vm15_vm1 = vcmask 1048064   ;;  %s51_s0 = inlined_call_operand.vmem [shape: f32[4,64], index: 0, kind: input, shape index: {}]   ;;  %s52_s1 = inlined_call_operand.vmem [shape: f32[1,256], index: 1, kind: output, shape index: {}]  }
   0x1   :  { %v4_v0 = vld [vmem:[%s51_s0] sm:$0xf]  ;;  %s11_s0 = smov 3 }
   0x2   :  { %5 = vst [vmem:[#allocation1] sm:$0xf] %v4_v0 }
   0x9   :  { %v12_v1 = vld [vmem:[#allocation1 + $0x1] ss:$2 sm:%s11_s0]   ;;  %v7_v2 = vld [vmem:[#allocation1] ss:$2 sm:%s6_s8]  }
   0xa   :  { %13 = vrot.lane.b32.xlu0 %v12_v1, %s31_s9  ;;  %9 = vst.msk [vmem:[#allocation0] ss:$8 sm:$0x3] %vm8_vm0, %v7_v2  }
  0x7c   :  { %v14_v3 = vpop.permute.xlu0 %13  }
  0x7d   :  { %16 = vst.msk [vmem:[#allocation0] ss:$8 sm:$0x3] %vm15_vm1, %v14_v3  }
  0x84   :  { %v19_v4 = vld [vmem:[#allocation0] sm:$0x1]  ;;  %v24_v5 = vld [vmem:[#allocation0 + $0x8] sm:$0x1] }
  0x85   :  { %22 = vst [vmem:[%s52_s1] sm:$0x1] %v19_v4 }
  0x86   :  { %29 = vst [vmem:[%s52_s1 + $0x1] sm:$0x1] %v24_v5 }

// kernel: tile.8
= control target key start
LH: loop header
LB: loop body
LE: loop exit
PB: predicated region body
PF: predicated region fallthrough
CT: control target
= control target key end

     0   :  { %2 = vsyncpa [#allocation1], 0  ;;  %s48_s8 = smov [#allocation0]   ;;  %s65_s0 = inlined_call_operand.hbm [shape: f32[64], index: 0, kind: input, shape index: {}]   ;;  %s66_s1 = inlined_call_operand.vmem [shape: f32[4,64], index: 1, kind: output, shape index: {}]  }
   0x1   :  { %s8_s0 = sshll.u32 %s65_s0, 4  ;;  %s10_s9 = sshll.u32 %s48_s8, 4  ;;  %s9_s0 = int_to_ptr.hbm [resolvable:$true] %s8_s0  ;;  %s11_s9 = int_to_ptr.vmem [resolvable:$true] %s10_s9 }
   0x2   :  { %13 = dma.hbm_to_vmem [thread:$0]  %s9_s0, 16, %s11_s9, [#allocation1]  }
   0x3   :  { %46 = dma.done.wait [#allocation1], 16  }
   0x4   :  { %47 = vsyncadd [#allocation1], 4294967280  ;;  %v18_v0 = vld [vmem:[#allocation0] ss:$0 sm:$0xff] }
   0x5   :  { %19 = vst [vmem:[%s66_s1] sm:$0xf] %v18_v0 }
   0x6   :  { %20 = vsyncpa [#allocation1], 1 }

// kernel: upsample_forward.1
= control target key start
LH: loop header
LB: loop body
LE: loop exit
PB: predicated region body
PF: predicated region fallthrough
CT: control target
= control target key end

     0   :  { %s4105_s12 = smov 0   ;;  %s4107_s13 = smov 0   ;;  %s6033_s0 = inlined_call_operand.vmem [shape: bf16[2,2,182,64], index: 0, kind: input, shape index: {}]   ;;  %s6034_s1 = inlined_call_operand.vmem [shape: bf16[576,256], index: 1, kind: input, shape index: {}]   ;;  %s6035_s2 = inlined_call_operand.vmem [shape: f32[1,256], index: 2, kind: input, shape index: {}]   ;;  %s6036_s3 = inlined_call_operand.vmem [shape: f32[2,2,144,256], index: 3, kind: output, shape index: {}]  }
   0x1   :  { %s4109_s14 = smov 0   ;;  %s4111_s15 = smov 0  }
   0x2   :  { %s4113_s16 = smov 0  }
   0x3 LB: > { %s22_s17 = sadd.s32 1, %s4074_s14  ;;  %s25_s18 = sadd.s32 1, %s4078_s15  ;;  %s4082_s16 = sphi %s4113_s16, %s13_s16   ;;  %s4078_s15 = sphi %s4111_s15, %s6089_s15   ;;  %s4074_s14 = sphi %s4109_s14, %s6088_s14   ;;  %s4070_s13 = sphi %s4107_s13, %s6087_s13   ;;  %s4066_s12 = sphi %s4105_s12, %s6086_s12  }
   0x4   : > { %p23_p0 = scmp.ge.s32.totalorder %s22_s17, 2  ;;  %p3314_p1 = scmp.ge.s32.totalorder %s4082_s16, 1 }
   0x5   : > { %p157_p2 = scmp.lt.s32.totalorder %s4082_s16, 5 }
   0x6   : > { %s6091_s17 = smov (%p23_p0, %s22_s17), 0  ;;  %s6093_s18 = smov (!%p23_p0, %s25_s18), %s4078_s15 }
   0x7   : > { %p158_p3 = pnand %p3314_p1, %p157_p2  ;;  %p27_p4 = scmp.ge.s32.totalorder %s6093_s18, 2 }
   0x9   : > { %s6095_s18 = smov (%p27_p4, %s6093_s18), 0  ;;  %161 = sbr.rel (%p158_p3) target bundleno = 693 (0x2b5), region = 32 }
   0xe   : > { %p189_p5 = scmp.lt.s32.totalorder %s4070_s13, 1  ;;  %p191_p6 = scmp.lt.s32.totalorder %s4066_s12, 1  ;;  %vm300_vm0 = vcmask 519168   ;;  %vm678_vm1 = vcmask 1042432   ;;  %vm679_vm2 = vcmask 1046532   ;;  %vm1221_vm7 = vcmask 1041408  }
   0xf   : > { %vm4160_vm3 = vmor %vm678_vm1, %vm679_vm2  ;;  %vm380_vm4 = vsmask.f32 3328  ;;  %s4084_s29 = smov 64   ;;  %vm381_vm5 = vsmask.f32 7440  ;;  %vm1222_vm8 = vcmask 1045508  }
  0x10   : > { %s6097_s13 = smov (!%p189_p5, %s4070_s13), 1  ;;  %s6099_s12 = smov (!%p191_p6, %s4066_s12), 1  ;;  %vm4197_vm6 = vmor %vm380_vm4, %vm381_vm5  ;;  %vm621_vm10 = vcmask 1043968   ;;  %vm1499_vm11 = vsmask.f32 1280  ;;  %vm1800_vm2 = vcmask 1040384  }
  0x11   : > { %s3998_s19 = smul.u32 46, %s6097_s13  ;;  %vm4522_vm9 = vmor %vm1221_vm7, %vm1222_vm8  ;;  %vm1500_vm12 = vsmask.f32 5392  ;;  %vm956_vm14 = vsmask.f32 2304  ;;  %vm2611_vm5 = vcmask 523264  }
  0x12   : > { %s3997_s20 = smul.u32 23, %s6099_s12  ;;  %vm4605_vm13 = vmor %vm1499_vm11, %vm1500_vm12  ;;  %vm957_vm15 = vsmask.f32 6416 }
  0x13   : > { %s3999_s21 = smul.u32 36, %s6099_s12  ;;  %vm5060_vm1 = vmor %vm956_vm14, %vm957_vm15 }
  0x14   : > { %s195_s22 = sadd.s32 %s3998_s19, %s3997_s20  ;;  %s4000_s23 = smul.u32 72, %s6097_s13 }
  0x15   : > { %s3315_s24 = sshll.u32 %s195_s22, 2 }
  0x16   : > { %s4138_s27 = scalar_lea.vmem %s6033_s0, %s3315_s24  ;;  %s4140_s28 = sadd.s32 %s4000_s23, %s3999_s21 }
  0x17   : > { %v3971_v0 = vld [vmem:[%s4138_s27 + $0x8] sm:$0xff]   ;;  %v3976_v1 = vld [vmem:[%s4138_s27 + $0x30] sm:$0xff]   ;;  %v3928_v7 = vld [vmem:[%s4138_s27] sm:$0xff]   ;;  %s3316_s23 = sshll.u32 %s4140_s28, 3 }
  0x18   : > { %v3972_v2 = vld [vmem:[%s4138_s27 + $0x10] sm:$0xff]   ;;  %v3933_v3 = vunpack.c.l.bf16 %v3971_v0  ;;  %v3934_v4 = vunpack.c.h.bf16 %v3971_v0  ;;  %v3953_v5 = vunpack.c.l.bf16 %v3976_v1  ;;  %v3954_v6 = vunpack.c.h.bf16 %v3976_v1  ;;  %v4147_v8 = vld [vmem:[%s4138_s27 + $0x18] sm:$0xff]   ;;  %v3975_v27 = vld [vmem:[%s4138_s27 + $0x28] sm:$0xff]   ;;  %s5831_s26 = scalar_lea.vmem %s6036_s3, %s3316_s23 }
  0x19   : > { %v3937_v9 = vunpack.c.l.bf16 %v3972_v2  ;;  %v3929_v10 = vunpack.c.l.bf16 %v3928_v7  ;;  %v3930_v11 = vunpack.c.h.bf16 %v3928_v7  ;;  %v3938_v12 = vunpack.c.h.bf16 %v3972_v2  ;;  %v3977_v20 = vld [vmem:[%s4138_s27 + $0x38] sm:$0xff]  }
  0x1a   : > { %v256_v13 = vmax.f32 %v3933_v3, 0.0  ;;  %v257_v14 = vmax.f32 %v3934_v4, 0.0  ;;  %v266_v15 = vmax.f32 %v3953_v5, 0.0  ;;  %v267_v16 = vmax.f32 %v3954_v6, 0.0 }
  0x1b   : > { %v258_v17 = vmax.f32 %v3937_v9, 0.0  ;;  %v254_v18 = vmax.f32 %v3929_v10, 0.0  ;;  %v3941_v19 = vunpack.c.l.bf16 %v4147_v8  ;;  %v255_v24 = vmax.f32 %v3930_v11, 0.0 }
  0x1c   : > { %v279_v21 = vpack.c.bf16 %v256_v13, %v256_v13  ;;  %v280_v22 = vpack.c.bf16 %v257_v14, %v257_v14  ;;  %v289_v23 = vpack.c.bf16 %v266_v15, %v266_v15  ;;  %v290_v25 = vpack.c.bf16 %v267_v16, %v267_v16 }
  0x1d   : > { %v281_v26 = vpack.c.bf16 %v258_v17, %v258_v17  ;;  %v259_v28 = vmax.f32 %v3938_v12, 0.0  ;;  %v260_v29 = vmax.f32 %v3941_v19, 0.0  ;;  %v3957_v30 = vunpack.c.l.bf16 %v3977_v20 }
  0x1e   : > { %303 = vst.msk [vmem:[#allocation3 + $0x8] sm:$0xf] %vm300_vm0, %v279_v21  ;;  %v3958_v31 = vunpack.c.h.bf16 %v3977_v20  ;;  %v277_v32 = vpack.c.bf16 %v254_v18, %v254_v18  ;;  %v278_v33 = vpack.c.bf16 %v255_v24, %v255_v24  ;;  %v3949_v36 = vunpack.c.l.bf16 %v3975_v27  ;;  %v3576_v18 = vld [vmem:[%s6034_s1 + $0x90] sm:$0xf] }
  0x1f   : > { %304 = vst.msk [vmem:[#allocation3 + $0xc] sm:$0xf] %vm300_vm0, %v280_v22  ;;  %v268_v34 = vmax.f32 %v3957_v30, 0.0  ;;  %v282_v37 = vpack.c.bf16 %v259_v28, %v259_v28  ;;  %v283_v38 = vpack.c.bf16 %v260_v29, %v260_v29  ;;  %v3950_v39 = vunpack.c.h.bf16 %v3975_v27  ;;  %v4209_v27 = vld [vmem:[%s4138_s27 + $0x40] sm:$0xff]  }
  0x20   : > { %313 = vst.msk [vmem:[#allocation3 + $0x30] sm:$0xf] %vm300_vm0, %v289_v23  ;;  %v269_v35 = vmax.f32 %v3958_v31, 0.0  ;;  %v264_v42 = vmax.f32 %v3949_v36, 0.0 }
  0x21   : > { %314 = vst.msk [vmem:[#allocation3 + $0x34] sm:$0xf] %vm300_vm0, %v290_v25  ;;  %v291_v40 = vpack.c.bf16 %v268_v34, %v268_v34  ;;  %v265_v47 = vmax.f32 %v3950_v39, 0.0  ;;  %v3942_v34 = vunpack.c.h.bf16 %v4147_v8 }
  0x22   : > { %305 = vst.msk [vmem:[#allocation3 + $0x10] sm:$0xf] %vm300_vm0, %v281_v26  ;;  %v292_v41 = vpack.c.bf16 %v269_v35, %v269_v35  ;;  %v287_v52 = vpack.c.bf16 %v264_v42, %v264_v42 }
  0x23   : > { %301 = vst.msk [vmem:[#allocation3] sm:$0xf] %vm300_vm0, %v277_v32  ;;  %v288_v58 = vpack.c.bf16 %v265_v47, %v265_v47 }
  0x24   : > { %302 = vst.msk [vmem:[#allocation3 + $0x4] sm:$0xf] %vm300_vm0, %v278_v33 }
  0x25   : > { %v772_v43 = vld [vmem:[#allocation3 + $0x8] sm:$0xe]  ;;  %306 = vst.msk [vmem:[#allocation3 + $0x14] sm:$0xf] %vm300_vm0, %v282_v37  ;;  %v3961_v37 = vunpack.c.l.bf16 %v4209_v27 }
  0x26   : > { %v773_v45 = vld [vmem:[#allocation3 + $0xc] sm:$0xf]  ;;  %v3318_v46 = vrot.slane %v772_v43, 9  ;;  %307 = vst.msk [vmem:[#allocation3 + $0x18] sm:$0xf] %vm300_vm0, %v283_v38 }
  0x27   : > { %v812_v48 = vrot.slane %v773_v45, 5  ;;  %v4165_v49 = vld [vmem:[#allocation3 + $0x30] sm:$0xf]  ;;  %315 = vst.msk [vmem:[#allocation3 + $0x38] sm:$0xf] %vm300_vm0, %v291_v40 }
  0x28   : > { %v783_v50 = vld [vmem:[#allocation3 + $0x34] sm:$0xf]  ;;  %v839_v51 = vrot.slane %v4165_v49, 5  ;;  %316 = vst.msk [vmem:[#allocation3 + $0x3c] sm:$0xf] %vm300_vm0, %v292_v41 }
  0x29   : > { %v813_v53 = vsel %vm4160_vm3, %v3318_v46, %v812_v48  ;;  %v842_v54 = vrot.slane %v783_v50, 5  ;;  %v4172_v55 = vld [vmem:[#allocation3 + $0x10] sm:$0xf]  ;;  %v814_v59 = vrot.slane %v812_v48, 4  ;;  %v4178_v0 = vld [vmem:[#allocation3 + $0x8] sm:$0xf] }
  0x2a   : > { %865 = vrot.lane.b32.xlu1 %v813_v53, %s4084_s29  ;;  %v841_v56 = vrot.slane %v839_v51, 4  ;;  %v361_v57 = vld [vmem:[#allocation3] sm:$0xf]  ;;  %v815_v60 = vrot.slane %v4172_v55, 5  ;;  %v364_v1 = vld [vmem:[#allocation3 + $0xc] sm:$0xf] }
  0x2b   : > { %v362_v61 = vld [vmem:[#allocation3 + $0x4] sm:$0xf]  ;;  %v384_v62 = vshrl.u32 %v361_v57, 16  ;;  %v387_v63 = vshll.u32 %v361_v57, 16  ;;  %311 = vst.msk [vmem:[#allocation3 + $0x28] sm:$0xf] %vm300_vm0, %v287_v52 }
  0x2c   : > { %v843_v2 = vsel %vm4160_vm3, %v841_v56, %v842_v54  ;;  %v393_v3 = vshll.u32 %v362_v61, 16  ;;  %v397_v4 = vshrl.u32 %v362_v61, 16  ;;  %v4182_v5 = vld [vmem:[#allocation3 + $0x14] sm:$0xf]  ;;  %v816_v14 = vsel %vm4160_vm3, %v814_v59, %v815_v60  ;;  %312 = vst.msk [vmem:[#allocation3 + $0x2c] sm:$0xf] %vm300_vm0, %v288_v58 }
  0x2d   : > { %885 = vrot.lane.b32.xlu0 %v843_v2, %s4084_s29  ;;  %v386_v6 = vrot.slane %v384_v62, 4  ;;  %v389_v7 = vrot.slane %v387_v63, 5  ;;  %v4186_v9 = vld [vmem:[#allocation3 + $0x18] sm:$0xf]  ;;  %v818_v10 = vrot.slane %v4182_v5, 5  ;;  %v403_v20 = vshll.u32 %v4178_v0, 16 }
  0x2e   : > { %v821_v11 = vrot.slane %v4186_v9, 5  ;;  %v784_v12 = vld [vmem:[#allocation3 + $0x38] sm:$0xf]  ;;  %v399_v13 = vrot.slane %v397_v4, 4  ;;  %v395_v16 = vrot.slane %v393_v3, 5  ;;  %v413_v22 = vshll.u32 %v364_v1, 16 }
  0x2f   : > { %v390_v15 = vor.u32 %v389_v7, %v386_v6  ;;  %v820_v17 = vrot.slane %v818_v10, 4  ;;  %v845_v19 = vrot.slane %v784_v12, 5  ;;  %v4202_v21 = vld [vmem:[#allocation3 + $0x3c] sm:$0xf]  ;;  %v417_v26 = vshrl.u32 %v364_v1, 16  ;;  %v3974_v62 = vld [vmem:[%s4138_s27 + $0x20] sm:$0xff]  }
  0x30   : > { %v400_v25 = vor.u32 %v399_v13, %v395_v16  ;;  %v844_v28 = vrot.slane %v842_v54, 4  ;;  %v848_v31 = vrot.slane %v4202_v21, 5  ;;  %v374_v33 = vld [vmem:[#allocation3 + $0x34] sm:$0xf]  ;;  %v4219_v39 = vrot.slane %v403_v20, 5 }
  0x31   : > { %v391_v23 = vrot.slane %v390_v15, 4  ;;  %v822_v24 = vsel %vm4160_vm3, %v820_v17, %v821_v11  ;;  %v847_v30 = vrot.slane %v845_v19, 4  ;;  %v365_v40 = vld [vmem:[#allocation3 + $0x10] sm:$0xf]  ;;  %v4221_v41 = vrot.slane %v413_v22, 5 }
  0x32   : > { %867 = vrot.lane.b32.xlu1 %v816_v14, %s4084_s29  ;;  %871 = vrot.lane.b32.xlu2 %v822_v24, %s4084_s29  ;;  %v371_v32 = vld [vmem:[#allocation3 + $0x28] sm:$0xf]  ;;  %v401_v38 = vrot.slane %v400_v25, 4  ;;  %v419_v42 = vrot.slane %v417_v26, 4  ;;  %v513_v47 = vshll.u32 %v374_v33, 16  ;;  %v517_v8 = vshrl.u32 %v374_v33, 16 }
  0x33   : > { %v396_v29 = vsel %vm4197_vm6, %v391_v23, %v395_v16  ;;  %v483_v35 = vshll.u32 %v371_v32, 16  ;;  %v487_v36 = vshrl.u32 %v371_v32, 16  ;;  %v372_v43 = vld [vmem:[#allocation3 + $0x2c] sm:$0xf]  ;;  %v846_v48 = vsel %vm4160_vm3, %v844_v28, %v845_v19  ;;  %v373_v54 = vld [vmem:[#allocation3 + $0x30] sm:$0xf] }
  0x34   : > { %v849_v50 = vsel %vm4160_vm3, %v847_v30, %v848_v31  ;;  %v493_v52 = vshll.u32 %v372_v43, 16  ;;  %v497_v53 = vshrl.u32 %v372_v43, 16  ;;  %v817_v55 = vrot.slane %v815_v60, 4  ;;  %v4239_v63 = vld [vmem:[#allocation3 + $0x38] sm:$0xf] }
  0x35   : > { %567 = vrot.lane.b32.xlu0 %v396_v29, %s4084_s29  ;;  %v4223_v45 = vrot.slane %v483_v35, 5  ;;  %v489_v46 = vrot.slane %v487_v36, 4  ;;  %v423_v56 = vshll.u32 %v365_v40, 16  ;;  %v261_v58 = vmax.f32 %v3942_v34, 0.0  ;;  %v366_v35 = vld [vmem:[#allocation3 + $0x14] sm:$0xf] }
  0x36   : > { %v406_v59 = vsel %vm4197_vm6, %v401_v38, %v4219_v39  ;;  %v420_v61 = vor.u32 %v419_v42, %v4221_v41  ;;  %v4241_v1 = vrot.slane %v513_v47, 5  ;;  %v519_v60 = vrot.slane %v517_v8, 4  ;;  %v3520_v49 = vld [vmem:[%s6034_s1 + $0x20] sm:$0xf] }
  0x37   : > { %v490_v57 = vor.u32 %v489_v46, %v4223_v45  ;;  %v503_v2 = vshll.u32 %v373_v54, 16  ;;  %v507_v3 = vshrl.u32 %v373_v54, 16  ;;  %v495_v6 = vrot.slane %v493_v52, 5 }
  0x38   : > { %v499_v7 = vrot.slane %v497_v53, 4  ;;  %v270_v12 = vmax.f32 %v3961_v37, 0.0  ;;  %v407_v13 = vshrl.u32 %v4178_v0, 16  ;;  %v819_v14 = vsel %vm4160_vm3, %v817_v55, %v818_v10 }
  0x39   : > { %v491_v4 = vrot.slane %v490_v57, 4  ;;  %v425_v15 = vrot.slane %v423_v56, 5  ;;  %v427_v16 = vshrl.u32 %v365_v40, 16  ;;  %v421_v17 = vrot.slane %v420_v61, 4 }
  0x3a   : > { %887 = vrot.lane.b32.xlu1 %v846_v48, %s4084_s29  ;;  %889 = vrot.lane.b32.xlu2 %v849_v50, %s4084_s29  ;;  %v523_v19 = vshll.u32 %v4239_v63, 16  ;;  %v293_v20 = vpack.c.bf16 %v270_v12, %v270_v12  ;;  %v3945_v22 = vunpack.c.l.bf16 %v3974_v62  ;;  %v520_v23 = vor.u32 %v519_v60, %v4241_v1  ;;  %v3979_v60 = vld [vmem:[%s4138_s27 + $0x48] sm:$0xff]  }
  0x3b   : > { %v505_v24 = vrot.slane %v503_v2, 5  ;;  %v509_v25 = vrot.slane %v507_v3, 4  ;;  %v284_v26 = vpack.c.bf16 %v261_v58, %v261_v58  ;;  %v496_v0 = vsel %vm4197_vm6, %v491_v4, %v495_v6  ;;  %v3980_v2 = vld [vmem:[%s4138_s27 + $0x50] sm:$0xff]  }
  0x3c   : > { %v500_v5 = vor.u32 %v499_v7, %v495_v6  ;;  %317 = vst.msk [vmem:[#allocation3 + $0x40] sm:$0xf] %vm300_vm0, %v293_v20  ;;  %v262_v10 = vmax.f32 %v3945_v22, 0.0  ;;  %v3962_v28 = vunpack.c.h.bf16 %v4209_v27  ;;  %v4256_v29 = vrot.slane %v523_v19, 5  ;;  %v367_v6 = vld [vmem:[#allocation3 + $0x18] sm:$0xf] }
  0x3d   : > { %569 = vrot.lane.b32.xlu0 %v406_v59, %s4084_s29  ;;  %308 = vst.msk [vmem:[#allocation3 + $0x1c] sm:$0xf] %vm300_vm0, %v284_v26  ;;  %v426_v33 = vsel %vm4197_vm6, %v421_v17, %v425_v15  ;;  %v510_v34 = vor.u32 %v509_v25, %v505_v24  ;;  %v429_v36 = vrot.slane %v427_v16, 4  ;;  %v3946_v37 = vunpack.c.h.bf16 %v3974_v62 }
  0x3e   : > { %v285_v30 = vpack.c.bf16 %v262_v10, %v262_v10  ;;  %v271_v32 = vmax.f32 %v3962_v28, 0.0  ;;  %v521_v38 = vrot.slane %v520_v23, 4  ;;  %v501_v40 = vrot.slane %v500_v5, 4 }
  0x3f   : > { %v409_v27 = vrot.slane %v407_v13, 4  ;;  %v263_v43 = vmax.f32 %v3946_v37, 0.0  ;;  %v511_v46 = vrot.slane %v510_v34, 4  ;;  %v430_v47 = vor.u32 %v429_v36, %v425_v15 }
  0x40   : > { %309 = vst.msk [vmem:[#allocation3 + $0x20] sm:$0xf] %vm300_vm0, %v285_v30  ;;  %v294_v42 = vpack.c.bf16 %v271_v32, %v271_v32  ;;  %v433_v8 = vshll.u32 %v366_v35, 16  ;;  %v526_v48 = vsel %vm4197_vm6, %v521_v38, %v4256_v29  ;;  %v506_v50 = vsel %vm4197_vm6, %v501_v40, %v505_v24 }
  0x41   : > { %v437_v52 = vshrl.u32 %v366_v35, 16  ;;  %v410_v53 = vor.u32 %v409_v27, %v4219_v39  ;;  %v286_v54 = vpack.c.bf16 %v263_v43, %v263_v43  ;;  %v516_v55 = vsel %vm4197_vm6, %v511_v46, %v4241_v1  ;;  %v376_v39 = vld [vmem:[#allocation3 + $0x3c] sm:$0xf] }
  0x42   : > { %869 = vrot.lane.b32.xlu1 %v819_v14, %s4084_s29  ;;  %587 = vrot.lane.b32.xlu2 %v496_v0, %s4084_s29  ;;  %318 = vst.msk [vmem:[#allocation3 + $0x44] sm:$0xf] %vm300_vm0, %v294_v42  ;;  %v431_v56 = vrot.slane %v430_v47, 4  ;;  %v435_v57 = vrot.slane %v433_v8, 5  ;;  %v850_v3 = vrot.slane %v848_v31, 4  ;;  %v527_v7 = vshrl.u32 %v4239_v63, 16 }
  0x43   : > { %v786_v58 = vld [vmem:[#allocation3 + $0x40] sm:$0xf]  ;;  %v411_v61 = vrot.slane %v410_v53, 4  ;;  %v439_v62 = vrot.slane %v437_v52, 4  ;;  %310 = vst.msk [vmem:[#allocation3 + $0x24] sm:$0xf] %vm300_vm0, %v286_v54  ;;  %v3966_v16 = vunpack.c.h.bf16 %v3979_v60  ;;  %v3969_v17 = vunpack.c.l.bf16 %v3980_v2 }
  0x44   : > { %v777_v59 = vld [vmem:[#allocation3 + $0x1c] sm:$0xf]  ;;  %v851_v4 = vrot.slane %v786_v58, 5  ;;  %v436_v12 = vsel %vm4197_vm6, %v431_v56, %v435_v57  ;;  %v533_v19 = vshll.u32 %v376_v39, 16  ;;  %v537_v21 = vshrl.u32 %v376_v39, 16 }
  0x45   : > { %573 = vrot.lane.b32.xlu0 %v426_v33, %s4084_s29  ;;  %v824_v1 = vrot.slane %v777_v59, 5  ;;  %v416_v13 = vsel %vm4197_vm6, %v411_v61, %v4221_v41  ;;  %v440_v14 = vor.u32 %v439_v62, %v435_v57  ;;  %v443_v31 = vshll.u32 %v367_v6, 16  ;;  %v368_v25 = vld [vmem:[#allocation3 + $0x1c] sm:$0xf]  ;;  %v377_v38 = vld [vmem:[#allocation3 + $0x40] sm:$0xf] }
  0x46   : > { %v3965_v20 = vunpack.c.l.bf16 %v3979_v60  ;;  %v852_v63 = vsel %vm4160_vm3, %v850_v3, %v851_v4  ;;  %v273_v23 = vmax.f32 %v3966_v16, 0.0  ;;  %v274_v24 = vmax.f32 %v3969_v17, 0.0 }
  0x47   : > { %v4288_v15 = vld [vmem:[#allocation3 + $0x20] sm:$0xf]  ;;  %v826_v22 = vrot.slane %v824_v1, 4  ;;  %v441_v26 = vrot.slane %v440_v14, 4  ;;  %v529_v0 = vrot.slane %v527_v7, 4  ;;  %v535_v30 = vrot.slane %v533_v19, 5 }
  0x48   : > { %v827_v41 = vrot.slane %v4288_v15, 5  ;;  %v272_v5 = vmax.f32 %v3965_v20, 0.0  ;;  %v296_v10 = vpack.c.bf16 %v273_v23, %v273_v23  ;;  %v297_v28 = vpack.c.bf16 %v274_v24, %v274_v24  ;;  %v4312_v54 = vld [vmem:[#allocation3 + $0x20] sm:$0xf]  ;;  %v3624_v15 = vld [vmem:[%s6034_s1 + $0xf0] sm:$0xf] }
  0x49   : > { %v539_v32 = vrot.slane %v537_v21, 4  ;;  %v445_v33 = vrot.slane %v443_v31, 5  ;;  %v823_v35 = vrot.slane %v821_v11, 4  ;;  %v453_v36 = vshll.u32 %v368_v25, 16  ;;  %v787_v43 = vld [vmem:[#allocation3 + $0x44] sm:$0xf] }
  0x4a   : > { %593 = vrot.lane.b32.xlu1 %v526_v48, %s4084_s29  ;;  %589 = vrot.lane.b32.xlu2 %v506_v50, %s4084_s29  ;;  %v295_v34 = vpack.c.bf16 %v272_v5, %v272_v5  ;;  %320 = vst.msk [vmem:[#allocation3 + $0x4c] sm:$0xf] %vm300_vm0, %v296_v10  ;;  %v828_v37 = vsel %vm4160_vm3, %v826_v22, %v827_v41  ;;  %v457_v40 = vshrl.u32 %v368_v25, 16  ;;  %v853_v46 = vrot.slane %v851_v4, 4  ;;  %v370_v53 = vld [vmem:[#allocation3 + $0x24] sm:$0xf] }
  0x4b   : > { %v446_v27 = vsel %vm4197_vm6, %v441_v26, %v445_v33  ;;  %v530_v42 = vor.u32 %v529_v0, %v4256_v29  ;;  %321 = vst.msk [vmem:[#allocation3 + $0x50] sm:$0xf] %vm300_vm0, %v297_v28  ;;  %v540_v9 = vor.u32 %v539_v32, %v535_v30  ;;  %v825_v11 = vsel %vm4160_vm3, %v823_v35, %v824_v1  ;;  %v378_v17 = vld [vmem:[#allocation3 + $0x44] sm:$0xf]  ;;  %v780_v5 = vld [vmem:[#allocation3 + $0x28] sm:$0xf] }
  0x4c   : > { %319 = vst.msk [vmem:[#allocation3 + $0x48] sm:$0xf] %vm300_vm0, %v295_v34  ;;  %v543_v47 = vshll.u32 %v377_v38, 16  ;;  %v447_v8 = vshrl.u32 %v367_v6, 16  ;;  %v854_v48 = vrot.slane %v787_v43, 5  ;;  %v455_v50 = vrot.slane %v453_v36, 5 }
  0x4d   : > { %591 = vrot.lane.b32.xlu0 %v516_v55, %s4084_s29  ;;  %v459_v52 = vrot.slane %v457_v40, 4  ;;  %v531_v29 = vrot.slane %v530_v42, 4  ;;  %v473_v55 = vshll.u32 %v370_v53, 16  ;;  %v477_v56 = vshrl.u32 %v370_v53, 16  ;;  %v779_v31 = vld [vmem:[#allocation3 + $0x24] sm:$0xf] }
  0x4e   : > { %v541_v57 = vrot.slane %v540_v9, 4  ;;  %v547_v58 = vshrl.u32 %v377_v38, 16  ;;  %v545_v59 = vrot.slane %v543_v47, 5  ;;  %v449_v61 = vrot.slane %v447_v8, 4  ;;  %v4351_v42 = vld [vmem:[#allocation3 + $0x2c] sm:$0xf] }
  0x4f   : > { %v4315_v62 = vrot.slane %v473_v55, 5  ;;  %v479_v39 = vrot.slane %v477_v56, 4  ;;  %v855_v60 = vsel %vm4160_vm3, %v853_v46, %v854_v48  ;;  %v460_v2 = vor.u32 %v459_v52, %v455_v50  ;;  %v4354_v9 = vld [vmem:[#allocation3 + $0xc] sm:$0xf]  ;;  %v3884_v55 = vld [vmem:[%s6034_s1 + $0xe4] sm:$0xf0] }
  0x50   : > { %v463_v3 = vshll.u32 %v4312_v54, 16  ;;  %v536_v4 = vsel %vm4197_vm6, %v531_v29, %v535_v30  ;;  %v546_v6 = vsel %vm4197_vm6, %v541_v57, %v545_v59  ;;  %v450_v7 = vor.u32 %v449_v61, %v445_v33  ;;  %v4366_v8 = vld [vmem:[#allocation3 + $0xc] sm:$0xf]  ;;  %v4380_v57 = vld [vmem:[#allocation3 + $0x10] sm:$0xf] }
  0x51   : > { %v480_v1 = vor.u32 %v479_v39, %v4315_v62  ;;  %v461_v14 = vrot.slane %v460_v2, 4  ;;  %v856_v19 = vrot.slane %v854_v48, 4  ;;  %v553_v24 = vshll.u32 %v378_v17, 16  ;;  %v4341_v28 = vld [vmem:[#allocation3 + $0x4c] sm:$0xf] }
  0x52   : > { %575 = vrot.lane.b32.xlu1 %v436_v12, %s4084_s29  ;;  %571 = vrot.lane.b32.xlu2 %v416_v13, %s4084_s29  ;;  %v549_v12 = vrot.slane %v547_v58, 4  ;;  %v4327_v16 = vrot.slane %v463_v3, 5  ;;  %v451_v22 = vrot.slane %v450_v7, 4  ;;  %v557_v26 = vshrl.u32 %v378_v17, 16  ;;  %v790_v40 = vld [vmem:[#allocation3 + $0x50] sm:$0x1] }
  0x53   : > { %v788_v13 = vld [vmem:[#allocation3 + $0x48] sm:$0xf]  ;;  %v4329_v21 = vrot.slane %v480_v1, 4  ;;  %v830_v10 = vrot.slane %v779_v31, 5  ;;  %v555_v33 = vrot.slane %v553_v24, 5  ;;  %v829_v34 = vrot.slane %v827_v41, 4 }
  0x54   : > { %v857_v20 = vrot.slane %v788_v13, 5  ;;  %v550_v23 = vor.u32 %v549_v12, %v545_v59  ;;  %v466_v25 = vsel %vm4197_vm6, %v461_v14, %v4327_v16  ;;  %v456_v30 = vsel %vm4197_vm6, %v451_v22, %v455_v50  ;;  %v379_v43 = vld [vmem:[#allocation3 + $0x48] sm:$0x1]  ;;  %v3886_v41 = vld [vmem:[%s6034_s1 + $0xf4] sm:$0xf0] }
  0x55   : > { %891 = vrot.lane.b32.xlu0 %v852_v63, %s4084_s29  ;;  %v486_v63 = vsel %vm4197_vm6, %v4329_v21, %v4223_v45  ;;  %v467_v35 = vshrl.u32 %v4312_v54, 16  ;;  %v833_v36 = vrot.slane %v780_v5, 5  ;;  %v832_v38 = vrot.slane %v830_v10, 4  ;;  %v4368_v48 = vld [vmem:[#allocation3 + $0x10] sm:$0xf] }
  0x56   : > { %v858_v0 = vsel %vm4160_vm3, %v856_v19, %v857_v20  ;;  %v551_v32 = vrot.slane %v550_v23, 4  ;;  %v831_v46 = vsel %vm4160_vm3, %v829_v34, %v830_v10  ;;  %v3625_v47 = vor.u32 %v3886_v41, %v3624_v15  ;;  %v3616_v50 = vld [vmem:[%s6034_s1 + $0xe0] sm:$0xf]  ;;  %v4395_v14 = vld [vmem:[#allocation3 + $0x8] sm:$0xc] }
  0x57   : > { %v563_v29 = vshll.u32 %v379_v43, 16  ;;  %v689_v53 = vrot.slane %v4366_v8, 5  ;;  %v692_v54 = vrot.slane %v4368_v48, 5  ;;  %v834_v56 = vsel %vm4160_vm3, %v832_v38, %v833_v36  ;;  %v3560_v17 = vld [vmem:[%s6034_s1 + $0x70] sm:$0xf] }
  0x58   : > { %2693 = vmatpush.bf16.msra.mxu1 %v3625_v47  ;;  %v3617_v58 = vor.u32 %v3884_v55, %v3616_v50  ;;  %3989 = vmatpush.bf16.msra.mxu3 %v3625_v47  ;;  %v863_v59 = vrot.slane %v790_v40, 5  ;;  %v4382_v61 = vrot.slane %v833_v36, 4  ;;  %v836_v39 = vrot.slane %v4351_v42, 5  ;;  %v4402_v19 = vld [vmem:[#allocation3 + $0x14] sm:$0xf] }
  0x59   : > { %v859_v3 = vrot.slane %v857_v20, 4  ;;  %v469_v1 = vrot.slane %v467_v35, 4  ;;  %v565_v12 = vrot.slane %v563_v29, 5  ;;  %v3870_v31 = vld [vmem:[%s6034_s1 + $0x74] sm:$0xf0]  ;;  %v3319_v40 = vrot.slane %v4395_v14, 10 }
  0x5a   : > { %875 = vrot.lane.b32.xlu1 %v828_v37, %s4084_s29  ;;  %577 = vrot.lane.b32.xlu2 %v446_v27, %s4084_s29  ;;  %v559_v37 = vrot.slane %v557_v26, 4  ;;  %v860_v27 = vrot.slane %v4341_v28, 5  ;;  %v3608_v20 = vld [vmem:[%s6034_s1 + $0xd0] sm:$0xf]  ;;  %v3561_v23 = vor.u32 %v3870_v31, %v3560_v17  ;;  %v3882_v24 = vld [vmem:[%s6034_s1 + $0xd4] sm:$0xf0] }
  0x5b   : > { %v470_v22 = vor.u32 %v469_v1, %v4327_v16  ;;  %v3868_v26 = vld [vmem:[%s6034_s1 + $0x64] sm:$0xf0]  ;;  %v3609_v16 = vor.u32 %v3882_v24, %v3608_v20  ;;  %v4424_v10 = vld [vmem:[#allocation3 + $0x30] sm:$0xf]  ;;  %v4426_v28 = vld [vmem:[#allocation3 + $0x34] sm:$0xf] }
  0x5c   : > { %v560_v52 = vor.u32 %v559_v37, %v555_v33  ;;  %v862_v2 = vrot.slane %v860_v27, 4  ;;  %2694 = vmatpush.bf16.msra.mxu1 %v3617_v58  ;;  %3990 = vmatpush.bf16.msra.mxu3 %v3617_v58  ;;  %v716_v35 = vrot.slane %v4424_v10, 5  ;;  %v719_v36 = vrot.slane %v4426_v28, 5  ;;  %v3880_v37 = vld [vmem:[%s6034_s1 + $0xc4] sm:$0xf0] }
  0x5d   : > { %873 = vrot.lane.b32.xlu0 %v825_v11, %s4084_s29  ;;  %v556_v11 = vsel %vm4197_vm6, %v551_v32, %v555_v33  ;;  %v861_v32 = vsel %vm4160_vm3, %v859_v3, %v860_v27  ;;  %v4433_v33 = vld [vmem:[#allocation3 + $0x18] sm:$0xf]  ;;  %3981 = vmatpush.bf16.msra.mxu2 %v3561_v23  ;;  %v1512_v27 = vshrl.u32 %v4402_v19, 16  ;;  %v4446_v15 = vld [vmem:[#allocation3 + $0x28] sm:$0xf]  ;;  %v471_v41 = vrot.slane %v470_v22, 4 }
  0x5e   : > { %v561_v7 = vrot.slane %v560_v52, 4  ;;  %2639 = vmatpush.bf16.msra.mxu0 %v3561_v23  ;;  %v710_v47 = vrot.slane %v4446_v15, 5  ;;  %v1522_v50 = vshrl.u32 %v4433_v33, 16  ;;  %v1525_v52 = vshll.u32 %v4433_v33, 16  ;;  %v4456_v29 = vld [vmem:[#allocation3 + $0x2c] sm:$0xf] }
  0x5f   : > { %v4458_v55 = vld [vmem:[#allocation3 + $0x1c] sm:$0xf]  ;;  %v640_v58 = vld [vmem:[#allocation3] sm:$0xe]  ;;  %v3866_v1 = vld [vmem:[%s6034_s1 + $0x54] sm:$0xf0]  ;;  %v476_v20 = vsel %vm4197_vm6, %v471_v41, %v4315_v62 }
  0x60   : > { %v566_v5 = vsel %vm4197_vm6, %v561_v7, %v565_v12  ;;  %2695 = vmatpush.bf16.msra.mxu1 %v3609_v16  ;;  %3991 = vmatpush.bf16.msra.mxu3 %v3609_v16  ;;  %v837_v7 = vsel %vm4160_vm3, %v4382_v61, %v836_v39  ;;  %v713_v17 = vrot.slane %v4456_v29, 5  ;;  %v3878_v31 = vld [vmem:[%s6034_s1 + $0xb4] sm:$0xf0]  ;;  %v1532_v23 = vshrl.u32 %v4458_v55, 16  ;;  %v3864_v62 = vld [vmem:[%s6034_s1 + $0x44] sm:$0xf0] }
  0x61   : > { %v1514_v16 = vrot.slane %v1512_v27, 6  ;;  %v838_v33 = vrot.slane %v836_v39, 4  ;;  %v3528_v42 = vld [vmem:[%s6034_s1 + $0x30] sm:$0xf]  ;;  %v3862_v39 = vld [vmem:[%s6034_s1 + $0x34] sm:$0xf0] }
  0x62   : > { %893 = vrot.lane.b32.xlu1 %v855_v60, %s4084_s29  ;;  %595 = vrot.lane.b32.xlu2 %v536_v4, %s4084_s29  ;;  %v691_v60 = vrot.slane %v689_v53, 4  ;;  %v1226_v4 = vrot.slane %v4354_v9, 6  ;;  %vm323_vm6 = vcmask 518144  }
  0x64   : > { %v693_v13 = vsel %vm4160_vm3, %v691_v60, %v692_v54  ;;  %v4442_v38 = vrot.slane %v1226_v4, 4  ;;  %v3544_v60 = vld [vmem:[%s6034_s1 + $0x50] sm:$0xf] }
  0x65   : > { %597 = vrot.lane.b32.xlu0 %v546_v6, %s4084_s29  ;;  %v1229_v6 = vrot.slane %v4380_v57, 6  ;;  %757 = vst.msk [vmem:[#allocation2 + $0x40] sm:$0xf] %vm300_vm0, %v693_v13  ;;  %v3545_v12 = vor.u32 %v3866_v1, %v3544_v60  ;;  %v712_v13 = vrot.slane %v710_v47, 4  ;;  %v1480_v60 = vld [vmem:[#allocation3 + $0x10] sm:$0xc] }
  0x66   : > { %v1503_v45 = vshrl.u32 %v1480_v60, 16  ;;  %v3512_v57 = vld [vmem:[%s6034_s1 + $0x10] sm:$0xf] }
  0x67   : > { %v714_v24 = vsel %vm4160_vm3, %v712_v13, %v713_v17  ;;  %v1230_v21 = vsel %vm4522_vm9, %v4442_v38, %v1229_v6  ;;  %v1227_v38 = vsel %vm4522_vm9, %v3319_v40, %v1226_v4  ;;  %v715_v4 = vrot.slane %v713_v17, 4 }
  0x68   : > { %764 = vst.msk [vmem:[#allocation2 + $0xcc] sm:$0xf] %vm300_vm0, %v714_v24  ;;  %v1505_v14 = vrot.slane %v1503_v45, 6 }
  0x69   : > { %v717_v29 = vsel %vm4160_vm3, %v715_v4, %v716_v35 }
  0x6a   : > { %581 = vrot.lane.b32.xlu1 %v466_v25, %s4084_s29  ;;  %895 = vrot.lane.b32.xlu2 %v858_v0, %s4084_s29  ;;  %v3552_v25 = vld [vmem:[%s6034_s1 + $0x60] sm:$0xf]  ;;  %v864_v0 = vsel %vm4160_vm3, %v862_v2, %v863_v59  ;;  %v641_v59 = vld [vmem:[#allocation3 + $0x4] sm:$0xf]  ;;  %v3317_v2 = vrot.slane %v640_v58, 9  ;;  %v1534_v58 = vrot.slane %v1532_v23, 6 }
  0x6b   : > { %v3553_v34 = vor.u32 %v3868_v26, %v3552_v25  ;;  %v683_v3 = vrot.slane %v641_v59, 5  ;;  %v3536_v25 = vld [vmem:[%s6034_s1 + $0x40] sm:$0xf]  ;;  %v3529_v59 = vor.u32 %v3862_v39, %v3528_v42  ;;  %v1231_v23 = vrot.slane %v1229_v6, 4  ;;  %v3858_v6 = vld [vmem:[%s6034_s1 + $0x14] sm:$0xf0] }
  0x6c   : > { %v3537_v26 = vor.u32 %v3864_v62, %v3536_v25  ;;  %v3513_v10 = vor.u32 %v3858_v6, %v3512_v57  ;;  %765 = vst.msk [vmem:[#allocation2 + $0xe0] sm:$0xf] %vm300_vm0, %v717_v29  ;;  %v1485_v42 = vld [vmem:[#allocation3 + $0x24] sm:$0xf]  ;;  %v1191_v29 = vld [vmem:[#allocation3 + $0x28] sm:$0xf] }
  0x6d   : > { %579 = vrot.lane.b32.xlu0 %v456_v30, %s4084_s29  ;;  %v3600_v30 = vld [vmem:[%s6034_s1 + $0xc0] sm:$0xf]  ;;  %3982 = vmatpush.bf16.msra.mxu2 %v3553_v34  ;;  %v684_v61 = vsel %vm4160_vm3, %v3317_v2, %v683_v3  ;;  %v685_v41 = vrot.slane %v683_v3, 4  ;;  %v4539_v2 = vld [vmem:[#allocation3 + $0x14] sm:$0xf] }
  0x6e   : > { %v3601_v43 = vor.u32 %v3880_v37, %v3600_v30  ;;  %2640 = vmatpush.bf16.msra.mxu0 %v3553_v34  ;;  %754 = vst.msk [vmem:[#allocation2 + $0x4] sm:$0xf] %vm300_vm0, %v684_v61  ;;  %v3876_v30 = vld [vmem:[%s6034_s1 + $0xa4] sm:$0xf0]  ;;  %v4516_v37 = vld [vmem:[#allocation3 + $0x20] sm:$0xf] }
  0x6f   : > { %v3568_v61 = vld [vmem:[%s6034_s1 + $0x80] sm:$0xf]  ;;  %v1545_v9 = vshll.u32 %v4516_v37, 16  ;;  %v1232_v24 = vrot.slane %v4539_v2, 6  ;;  %v1552_v2 = vshrl.u32 %v1485_v42, 16 }
  0x70   : > { %2696 = vmatpush.bf16.msra.mxu1 %v3601_v43  ;;  %3992 = vmatpush.bf16.msra.mxu3 %v3601_v43  ;;  %v4518_v43 = vld [vmem:[#allocation3 + $0x8] sm:$0xf] }
  0x71   : > { %3983 = vmatpush.bf16.msra.mxu2 %v3545_v12 }
  0x72   : > { %599 = vrot.lane.b32.xlu1 %v556_v11, %s4084_s29  ;;  %877 = vrot.lane.b32.xlu2 %v831_v46, %s4084_s29  ;;  %v1515_v11 = vshll.u32 %v4402_v19, 16  ;;  %v718_v46 = vrot.slane %v716_v35, 4  ;;  %v3592_v19 = vld [vmem:[%s6034_s1 + $0xb0] sm:$0xf] }
  0x73   : > { %v3593_v22 = vor.u32 %v3878_v31, %v3592_v19  ;;  %2641 = vmatpush.bf16.msra.mxu0 %v3545_v12  ;;  %v1506_v12 = vshll.u32 %v1480_v60, 16 }
  0x75   : > { %879 = vrot.lane.b32.xlu0 %v834_v56, %s4084_s29  ;;  %v720_v56 = vsel %vm4160_vm3, %v718_v46, %v719_v36  ;;  %2697 = vmatpush.bf16.msra.mxu1 %v3593_v22  ;;  %v1517_v46 = vrot.slane %v1515_v11, 7  ;;  %v1524_v11 = vrot.slane %v1522_v50, 6  ;;  %v1542_v50 = vshrl.u32 %v4516_v37, 16 }
  0x76   : > { %766 = vst.msk [vmem:[#allocation2 + $0xf4] sm:$0xf] %vm300_vm0, %v720_v56  ;;  %3993 = vmatpush.bf16.msra.mxu3 %v3593_v22  ;;  %3984 = vmatpush.bf16.msra.mxu2 %v3537_v26  ;;  %v1527_v56 = vrot.slane %v1525_v52, 7  ;;  %v3874_v52 = vld [vmem:[%s6034_s1 + $0x94] sm:$0xf0]  ;;  %v1508_v40 = vrot.slane %v1506_v12, 7 }
  0x77   : > { %2642 = vmatpush.bf16.msra.mxu0 %v3537_v26  ;;  %v3577_v13 = vor.u32 %v3874_v52, %v3576_v18  ;;  %v1518_v19 = vor.u32 %v1517_v46, %v1514_v16  ;;  %v3872_v22 = vld [vmem:[%s6034_s1 + $0x84] sm:$0xf0]  ;;  %v1544_v35 = vrot.slane %v1542_v50, 6  ;;  %v1188_v50 = vld [vmem:[#allocation3 + $0x1c] sm:$0xf]  ;;  %v1554_v52 = vrot.slane %v1552_v2, 6 }
  0x78   : > { %v3569_v25 = vor.u32 %v3872_v22, %v3568_v61  ;;  %v1509_v17 = vor.u32 %v1508_v40, %v1505_v14  ;;  %v3856_v46 = vld [vmem:[%s6034_s1 + $0x4] sm:$0xf0]  ;;  %v337_v14 = vld [vmem:[#allocation3 + $0x30] sm:$0xf] }
  0x79   : > { %v1520_v26 = vrot.slane %v1518_v19, 4  ;;  %355 = vst.msk [vmem:[#allocation2 + $0xf0] sm:$0xf] %vm300_vm0, %v337_v14 }
  0x7a   : > { %899 = vrot.lane.b32.xlu1 %v864_v0, %s4084_s29  ;;  %601 = vrot.lane.b32.xlu2 %v566_v5, %s4084_s29  ;;  %v335_v0 = vld [vmem:[#allocation3 + $0x28] sm:$0xf]  ;;  %v3584_v5 = vld [vmem:[%s6034_s1 + $0xa0] sm:$0xf] }
  0x7b   : > { %353 = vst.msk [vmem:[#allocation2 + $0xc8] sm:$0xf] %vm300_vm0, %v335_v0  ;;  %v3585_v34 = vor.u32 %v3876_v30, %v3584_v5  ;;  %3985 = vmatpush.bf16.msra.mxu2 %v3529_v59  ;;  %2643 = vmatpush.bf16.msra.mxu0 %v3529_v59  ;;  %v1528_v0 = vor.u32 %v1527_v56, %v1524_v11  ;;  %v326_v5 = vld [vmem:[#allocation3 + $0x4] sm:$0xf]  ;;  %v1547_v30 = vrot.slane %v1545_v9, 7 }
  0x7c   : > { %344 = vst.msk [vmem:[#allocation2 + $0x14] sm:$0xf] %vm300_vm0, %v326_v5  ;;  %v1187_v11 = vld [vmem:[#allocation3 + $0x18] sm:$0xf] }
  0x7d   : > { %897 = vrot.lane.b32.xlu0 %v861_v32, %s4084_s29  ;;  %v1535_v32 = vshll.u32 %v4458_v55, 16  ;;  %v686_v55 = vrot.slane %v4518_v43, 5  ;;  %2698 = vmatpush.bf16.msra.mxu1 %v3585_v34  ;;  %v1529_v56 = vsel %vm4605_vm13, %v1520_v26, %v1528_v0  ;;  %v1548_v59 = vor.u32 %v1547_v30, %v1544_v35 }
  0x7e   : > { %3994 = vmatpush.bf16.msra.mxu3 %v3585_v34  ;;  %v1233_v34 = vsel %vm4522_vm9, %v1231_v23, %v1232_v24  ;;  %v1530_v43 = vrot.slane %v1528_v0, 4  ;;  %v329_v0 = vld [vmem:[#allocation3 + $0x10] sm:$0xf]  ;;  %v1247_v35 = vrot.slane %v1191_v29, 6  ;;  %v339_v29 = vld [vmem:[#allocation3 + $0x38] sm:$0xf] }
  0x7f   : > { %v1537_v3 = vrot.slane %v1535_v32, 7  ;;  %v687_v1 = vsel %vm4160_vm3, %v685_v41, %v686_v55  ;;  %v1510_v32 = vrot.slane %v1509_v17, 4  ;;  %v3504_v41 = vld [vmem:[%s6034_s1] sm:$0xf]  ;;  %v688_v60 = vrot.slane %v686_v55, 4 }
  0x80   : > { %755 = vst.msk [vmem:[#allocation2 + $0x18] sm:$0xf] %vm300_vm0, %v687_v1  ;;  %v3505_v39 = vor.u32 %v3856_v46, %v3504_v41  ;;  %v1234_v1 = vrot.slane %v1232_v24, 4  ;;  %v1488_v17 = vld [vmem:[#allocation3 + $0x30] sm:$0xf] }
  0x81   : > { %2699 = vmatpush.bf16.msra.mxu1 %v3577_v13  ;;  %v1538_v16 = vor.u32 %v1537_v3, %v1534_v58  ;;  %v1519_v37 = vsel %vm4605_vm13, %v1510_v32, %v1518_v19  ;;  %v1555_v3 = vshll.u32 %v1485_v42, 16  ;;  %v690_v45 = vsel %vm4160_vm3, %v688_v60, %v689_v53  ;;  %347 = vst.msk [vmem:[#allocation2 + $0x50] sm:$0xf] %vm300_vm0, %v329_v0  ;;  %v4664_v32 = vld [vmem:[#allocation3 + $0x38] sm:$0xf] }
  0x82   : > { %881 = vrot.lane.b32.xlu1 %v837_v7, %s4084_s29  ;;  %583 = vrot.lane.b32.xlu2 %v476_v20, %s4084_s29  ;;  %v325_v7 = vld [vmem:[#allocation3] sm:$0xf]  ;;  %v336_v20 = vld [vmem:[#allocation3 + $0x2c] sm:$0xf]  ;;  %756 = vst.msk [vmem:[#allocation2 + $0x2c] sm:$0xf] %vm300_vm0, %v690_v45 }
  0x83   : > { %343 = vst.msk [vmem:[#allocation2] sm:$0xf] %vm300_vm0, %v325_v7  ;;  %3995 = vmatpush.bf16.msra.mxu3 %v3577_v13  ;;  %v1540_v58 = vrot.slane %v1538_v16, 4  ;;  %v1235_v7 = vrot.slane %v1187_v11, 6  ;;  %v1557_v12 = vrot.slane %v1555_v3, 7  ;;  %v1539_v53 = vsel %vm4605_vm13, %v1530_v43, %v1538_v16 }
  0x84   : > { %354 = vst.msk [vmem:[#allocation2 + $0xdc] sm:$0xf] %vm300_vm0, %v336_v20  ;;  %v1189_v13 = vld [vmem:[#allocation3 + $0x20] sm:$0xf]  ;;  %v1487_v20 = vld [vmem:[#allocation3 + $0x2c] sm:$0xf] }
  0x85   : > { %585 = vrot.lane.b32.xlu0 %v486_v63, %s4084_s29  ;;  %v840_v63 = vsel %vm4160_vm3, %v838_v33, %v839_v51  ;;  %v3860_v51 = vld [vmem:[%s6034_s1 + $0x24] sm:$0xf0]  ;;  %2700 = vmatpush.bf16.msra.mxu1 %v3569_v25  ;;  %v1549_v55 = vsel %vm4605_vm13, %v1540_v58, %v1548_v59  ;;  %v1236_v8 = vsel %vm4522_vm9, %v1234_v1, %v1235_v7  ;;  %v1572_v9 = vshrl.u32 %v1487_v20, 16  ;;  %v330_v11 = vld [vmem:[#allocation3 + $0x14] sm:$0xf] }
  0x86   : > { %v3521_v31 = vor.u32 %v3860_v51, %v3520_v49  ;;  %v1238_v49 = vrot.slane %v1188_v50, 6  ;;  %v1550_v51 = vrot.slane %v1548_v59, 4  ;;  %v4643_v19 = vor.u32 %v1557_v12, %v1554_v52  ;;  %v1486_v59 = vld [vmem:[#allocation3 + $0x28] sm:$0xf]  ;;  %348 = vst.msk [vmem:[#allocation2 + $0x64] sm:$0xf] %vm300_vm0, %v330_v11 }
  0x87   : > { %3996 = vmatpush.bf16.msra.mxu3 %v3569_v25  ;;  %v1575_v4 = vshll.u32 %v1487_v20, 16  ;;  %v1241_v23 = vrot.slane %v1189_v13, 6  ;;  %v1237_v57 = vrot.slane %v1235_v7, 4  ;;  %v1574_v6 = vrot.slane %v1572_v9, 6  ;;  %v3784_v50 = vld [vmem:[%s6034_s1 + $0x230] sm:$0xf] }
  0x88   : > { %3986 = vmatpush.bf16.msra.mxu2 %v3521_v31  ;;  %2644 = vmatpush.bf16.msra.mxu0 %v3521_v31  ;;  %v4645_v31 = vld [vmem:[#allocation3 + $0x24] sm:$0xf]  ;;  %v1240_v40 = vrot.slane %v1238_v49, 4  ;;  %v1582_v30 = vshrl.u32 %v1488_v17, 16  ;;  %v1585_v46 = vshll.u32 %v1488_v17, 16  ;;  %v721_v42 = vrot.slane %v719_v36, 4 }
  0x89   : > { %v1244_v24 = vrot.slane %v4645_v31, 6  ;;  %v1577_v26 = vrot.slane %v1575_v4, 7  ;;  %v1239_v5 = vsel %vm4522_vm9, %v1237_v57, %v1238_v49  ;;  %v1562_v2 = vshrl.u32 %v1486_v59, 16  ;;  %v3926_v52 = vld [vmem:[%s6034_s1 + $0x234] sm:$0xf0] }
  0x8a   : > { %1281 = vrot.lane.b32.xlu1 %v1230_v21, %s4084_s29  ;;  %883 = vrot.lane.b32.xlu2 %v840_v63, %s4084_s29  ;;  %v327_v21 = vld [vmem:[#allocation3 + $0x8] sm:$0xf]  ;;  %v328_v63 = vld [vmem:[#allocation3 + $0xc] sm:$0xf]  ;;  %v1584_v36 = vrot.slane %v1582_v30, 6  ;;  %v1565_v3 = vshll.u32 %v1486_v59, 16 }
  0x8b   : > { %345 = vst.msk [vmem:[#allocation2 + $0x28] sm:$0xf] %vm300_vm0, %v327_v21  ;;  %v1246_v16 = vrot.slane %v1244_v24, 4  ;;  %v4666_v41 = vor.u32 %v1577_v26, %v1574_v6  ;;  %v4684_v21 = vld [vmem:[#allocation3 + $0x2c] sm:$0xf]  ;;  %v1249_v13 = vrot.slane %v1247_v35, 4 }
  0x8c   : > { %v872_v62 = vpop.permute.xlu2 %871  ;;  %3987 = vmatpush.bf16.msra.mxu2 %v3513_v10  ;;  %2645 = vmatpush.bf16.msra.mxu0 %v3513_v10  ;;  %346 = vst.msk [vmem:[#allocation2 + $0x3c] sm:$0xf] %vm300_vm0, %v328_v63  ;;  %v1242_v10 = vsel %vm4522_vm9, %v1240_v40, %v1241_v23  ;;  %v1564_v63 = vrot.slane %v1562_v2, 6  ;;  %v1567_v43 = vrot.slane %v1565_v3, 7  ;;  %v3869_v12 = vld [vmem:[%s6034_s1 + $0x74] sm:$0xf] }
  0x8d   : > { %1279 = vrot.lane.b32.xlu0 %v1227_v38, %s4084_s29  ;;  %922 = vst.msk [vmem:[#allocation2 + $0x40] sm:$0xf] %vm621_vm10, %v872_v62  ;;  %v338_v38 = vld [vmem:[#allocation3 + $0x34] sm:$0xf]  ;;  %v1559_v62 = vsel %vm4605_vm13, %v1550_v51, %v4643_v19  ;;  %v1248_v28 = vsel %vm4522_vm9, %v1246_v16, %v1247_v35  ;;  %v1580_v7 = vrot.slane %v4666_v41, 4  ;;  %v1250_v49 = vrot.slane %v4684_v21, 6 }
  0x8e   : > { %356 = vst.msk [vmem:[#allocation2 + $0x104] sm:$0xf] %vm300_vm0, %v338_v38  ;;  %v1560_v51 = vrot.slane %v4643_v19, 4  ;;  %v645_v9 = vld [vmem:[#allocation3 + $0x14] sm:$0xf]  ;;  %v694_v17 = vrot.slane %v692_v54, 4 }
  0x8f   : > { %v4705_v4 = vld [vmem:[#allocation3 + $0x18] sm:$0xf]  ;;  %v1251_v6 = vsel %vm4522_vm9, %v1249_v13, %v1250_v49  ;;  %357 = vst.msk [vmem:[#allocation2 + $0x118] sm:$0xf] %vm300_vm0, %v339_v29  ;;  %v3688_v54 = vld [vmem:[%s6034_s1 + $0x170] sm:$0xf] }
  0x90   : > { %3988 = vmatpush.bf16.msra.mxu2 %v3505_v39  ;;  %2646 = vmatpush.bf16.msra.mxu0 %v3505_v39  ;;  %v722_v39 = vrot.slane %v4664_v32, 5  ;;  %v698_v19 = vrot.slane %v4705_v4, 5  ;;  %v3902_v0 = vld [vmem:[%s6034_s1 + $0x174] sm:$0xf0]  ;;  %v1489_v16 = vld [vmem:[#allocation3 + $0x34] sm:$0xf] }
  0x91   : > { %v1490_v35 = vld [vmem:[#allocation3 + $0x38] sm:$0xf]  ;;  %v1592_v11 = vshrl.u32 %v1489_v16, 16  ;;  %v3867_v59 = vld [vmem:[%s6034_s1 + $0x64] sm:$0xf] }
  0x92   : > { %1283 = vrot.lane.b32.xlu1 %v1233_v34, %s4084_s29  ;;  %1690 = vrot.lane.b32.xlu2 %v1519_v37, %s4084_s29  ;;  %v723_v58 = vsel %vm4160_vm3, %v721_v42, %v722_v39  ;;  %v1605_v2 = vshll.u32 %v1490_v35, 16  ;;  %v724_v13 = vrot.slane %v722_v39, 4  ;;  %v3680_v32 = vld [vmem:[%s6034_s1 + $0x160] sm:$0xf]  ;;  %v3900_v29 = vld [vmem:[%s6034_s1 + $0x164] sm:$0xf0] }
  0x93   : > { %767 = vst.msk [vmem:[#allocation2 + $0x108] sm:$0xf] %vm300_vm0, %v723_v58  ;;  %v1602_v58 = vshrl.u32 %v1490_v35, 16  ;;  %v3898_v4 = vld [vmem:[%s6034_s1 + $0x154] sm:$0xf0] }
  0x94   : > { %v890_v18 = vpop.permute.xlu2 %889  ;;  %v3346_v39 = vld [vmem:[#allocation2 + $0x3c] sm:$0xf0]  ;;  %v4878_v21 = vld [vmem:[#allocation3 + $0x20] sm:$0xf] }
  0x95   : > { %1692 = vrot.lane.b32.xlu0 %v1529_v56, %s4084_s29  ;;  %931 = vst.msk [vmem:[#allocation2 + $0xf4] sm:$0xf] %vm621_vm10, %v890_v18  ;;  %v1243_v56 = vrot.slane %v1241_v23, 4  ;;  %v1587_v18 = vrot.slane %v1585_v46, 7  ;;  %v695_v23 = vrot.slane %v645_v9, 5 }
  0x96   : > { %v3918_v46 = vld [vmem:[%s6034_s1 + $0x1f4] sm:$0xf0]  ;;  %v340_v9 = vld [vmem:[#allocation3 + $0x3c] sm:$0xf] }
  0x97   : > { %v697_v26 = vrot.slane %v695_v23, 4  ;;  %v696_v48 = vsel %vm4160_vm3, %v694_v17, %v695_v23  ;;  %358 = vst.msk [vmem:[#allocation2 + $0x12c] sm:$0xf] %vm300_vm0, %v340_v9  ;;  %v3744_v17 = vld [vmem:[%s6034_s1 + $0x1e0] sm:$0xf] }
  0x98   : > { %758 = vst.msk [vmem:[#allocation2 + $0x54] sm:$0xf] %vm300_vm0, %v696_v48  ;;  %v3916_v48 = vld [vmem:[%s6034_s1 + $0x1e4] sm:$0xf0] }
  0x99   : > { %v3745_v35 = vor.u32 %v3916_v48, %v3744_v17 }
  0x9a   : > { %1696 = vrot.lane.b32.xlu1 %v1549_v55, %s4084_s29  ;;  %1285 = vrot.lane.b32.xlu2 %v1236_v8, %s4084_s29  ;;  %v1245_v55 = vsel %vm4522_vm9, %v1243_v56, %v1244_v24  ;;  %v3785_v8 = vor.u32 %v3926_v52, %v3784_v50  ;;  %v1595_v56 = vshll.u32 %v1489_v16, 16  ;;  %v1607_v50 = vrot.slane %v1605_v2, 7  ;;  %v655_v52 = vld [vmem:[#allocation3 + $0x3c] sm:$0xf] }
  0x9c   : > { %v866_v61 = vpop.permute.xlu1 %865  ;;  %v588_v22 = vpop.permute.xlu2 %587  ;;  %2859 = vmatpush.bf16.msrb.mxu0 %v3785_v8 }
  0x9d   : > { %919 = vst.msk [vmem:[#allocation2 + $0x4] sm:$0xf] %vm621_vm10, %v866_v61  ;;  %1694 = vrot.lane.b32.xlu0 %v1539_v53, %s4084_s29  ;;  %v3562_v53 = vld [vmem:[%s6034_s1 + $0x78] sm:$0xf0] }
  0x9e   : > { %632 = vst.msk [vmem:[#allocation2 + $0xc8] sm:$0xf] %vm621_vm10, %v588_v22  ;;  %v3565_v61 = vor.u32 %v3869_v12, %v3562_v53  ;;  %v4703_v22 = vor.u32 %v1567_v43, %v1564_v63  ;;  %v1597_v63 = vrot.slane %v1595_v56, 7 }
  0x9f   : > { %v886_v25 = vpop.permute.xlu0 %885 }
  0xa0   : > { %929 = vst.msk [vmem:[#allocation2 + $0xcc] sm:$0xf] %vm621_vm10, %v886_v25  ;;  %v4715_v25 = vor.u32 %v1587_v18, %v1584_v36  ;;  %2909 = vmatpush.bf16.msrb.mxu1 %v3565_v61 }
  0xa2   : > { %1698 = vrot.lane.b32.xlu1 %v1559_v62, %s4084_s29  ;;  %1287 = vrot.lane.b32.xlu2 %v1239_v5, %s4084_s29  ;;  %v1569_v62 = vsel %vm4605_vm13, %v1560_v51, %v4703_v22  ;;  %v3689_v5 = vor.u32 %v3902_v0, %v3688_v54  ;;  %v1590_v3 = vrot.slane %v4715_v25, 4  ;;  %v725_v51 = vrot.slane %v655_v52, 5  ;;  %v4805_v0 = vld [vmem:[#allocation3 + $0x34] sm:$0xf] }
  0xa3   : > { %v1570_v54 = vrot.slane %v4703_v22, 4 }
  0xa4   : > { %v868_v34 = vpop.permute.xlu1 %867  ;;  %v590_v37 = vpop.permute.xlu2 %589  ;;  %v3810_v1 = vld [vmem:[#allocation2 + $0x4] sm:$0xf]  ;;  %2747 = vmatpush.bf16.msrb.mxu2 %v3689_v5  ;;  %v726_v23 = vsel %vm4160_vm3, %v724_v13, %v725_v51 }
  0xa5   : > { %920 = vst.msk [vmem:[#allocation2 + $0x18] sm:$0xf] %vm621_vm10, %v868_v34  ;;  %1289 = vrot.lane.b32.xlu0 %v1242_v10, %s4084_s29  ;;  %v3424_v45 = vld [vmem:[#allocation2 + $0xc8] sm:$0xf]  ;;  %v699_v10 = vsel %vm4160_vm3, %v697_v26, %v698_v19  ;;  %v1589_v34 = vsel %vm4605_vm13, %v1580_v7, %v4715_v25  ;;  %v727_v25 = vrot.slane %v725_v51, 4  ;;  %v3681_v26 = vor.u32 %v3900_v29, %v3680_v32 }
  0xa6   : > { %633 = vst.msk [vmem:[#allocation2 + $0xdc] sm:$0xf] %vm621_vm10, %v590_v37  ;;  %v3752_v37 = vld [vmem:[%s6034_s1 + $0x1f0] sm:$0xf]  ;;  %v1579_v22 = vsel %vm4605_vm13, %v1570_v54, %v4666_v41  ;;  %v1491_v51 = vld [vmem:[#allocation3 + $0x3c] sm:$0xf] }
  0xa7   : > { %v568_v60 = vpop.permute.xlu0 %567  ;;  %v3835_v30 = vld [vmem:[#allocation2 + $0xcc] sm:$0xf]  ;;  %759 = vst.msk [vmem:[#allocation2 + $0x68] sm:$0xf] %vm300_vm0, %v699_v10  ;;  %v3753_v42 = vor.u32 %v3918_v46, %v3752_v37  ;;  %v1256_v37 = vrot.slane %v4805_v0, 6 }
  0xa8   : > { %622 = vst.msk [vmem:[#allocation2] sm:$0xf] %vm621_vm10, %v568_v60  ;;  %2748 = vmatpush.bf16.msrb.mxu2 %v3681_v26  ;;  %v4865_v32 = vld [vmem:[#allocation3 + $0x30] sm:$0xf]  ;;  %v342_v54 = vld [vmem:[#allocation3 + $0x44] sm:$0xf] }
  0xa9   : > { %2801 = vmatpush.bf16.msrb.mxu3 %v3753_v42  ;;  %768 = vst.msk [vmem:[#allocation2 + $0x11c] sm:$0xf] %vm300_vm0, %v726_v23  ;;  %v3776_v42 = vld [vmem:[%s6034_s1 + $0x220] sm:$0xf]  ;;  %v1258_v41 = vrot.slane %v1256_v37, 4  ;;  %v1612_v23 = vshrl.u32 %v1491_v51, 16 }
  0xaa   : > { %1293 = vrot.lane.b32.xlu1 %v1248_v28, %s4084_s29  ;;  %1700 = vrot.lane.b32.xlu2 %v1569_v62, %s4084_s29  ;;  %360 = vst.msk [vmem:[#allocation2 + $0x154] sm:$0xf] %vm300_vm0, %v342_v54  ;;  %v1494_v0 = vld [vmem:[#allocation3 + $0x48] sm:$0xf] }
  0xab   : > { %v1614_v17 = vrot.slane %v1612_v23, 6 }
  0xac   : > { %v888_v38 = vpop.permute.xlu1 %887  ;;  %v3326_v31 = vld [vmem:[#allocation2 + $0x14] sm:$0xf0]  ;;  %v572_v20 = vpop.permute.xlu2 %571 }
  0xad   : > { %930 = vst.msk [vmem:[#allocation2 + $0xe0] sm:$0xf] %vm621_vm10, %v888_v38  ;;  %v4708_v14 = vor.u32 %v3810_v1, %v3326_v31  ;;  %v3837_v40 = vld [vmem:[#allocation2 + $0xd8] sm:$0xf0]  ;;  %1291 = vrot.lane.b32.xlu0 %v1245_v55, %s4084_s29  ;;  %v3554_v1 = vld [vmem:[%s6034_s1 + $0x68] sm:$0xf0]  ;;  %2802 = vmatpush.bf16.msrb.mxu3 %v3745_v35 }
  0xae   : > { %v4712_v24 = vor.u32 %v3837_v40, %v3424_v45  ;;  %624 = vst.msk [vmem:[#allocation2 + $0x28] sm:$0xf] %vm621_vm10, %v572_v20  ;;  %v1594_v45 = vrot.slane %v1592_v11, 6  ;;  %v3557_v43 = vor.u32 %v3867_v59, %v3554_v1  ;;  %v1604_v55 = vrot.slane %v1602_v58, 6  ;;  %v4770_v38 = vld [vmem:[#allocation3 + $0x40] sm:$0xf] }
  0xaf   : > { %v570_v57 = vpop.permute.xlu0 %569  ;;  %2701 = vmatmul.bf16.vlgmr.msra.gmra.mxu1 %v4708_v14  ;;  %v3324_v18 = vld [vmem:[#allocation2] sm:$0xf]  ;;  %v728_v61 = vrot.slane %v4770_v38, 5  ;;  %v3924_v11 = vld [vmem:[%s6034_s1 + $0x224] sm:$0xf0]  ;;  %v704_v35 = vrot.slane %v4878_v21, 5 }
  0xb0   : > { %623 = vst.msk [vmem:[#allocation2 + $0x14] sm:$0xf] %vm621_vm10, %v570_v57  ;;  %2672 = vmatmul.bf16.vlgmr.msra.gmra.mxu2 %v4712_v24  ;;  %v1598_v53 = vor.u32 %v1597_v63, %v1594_v45  ;;  %2910 = vmatpush.bf16.msrb.mxu1 %v3557_v43  ;;  %v4775_v20 = vor.u32 %v1607_v50, %v1604_v55  ;;  %v332_v59 = vld [vmem:[#allocation3 + $0x1c] sm:$0xf]  ;;  %v3736_v55 = vld [vmem:[%s6034_s1 + $0x1d0] sm:$0xf] }
  0xb1   : > { %v3777_v58 = vor.u32 %v3924_v11, %v3776_v42  ;;  %350 = vst.msk [vmem:[#allocation2 + $0x8c] sm:$0xf] %vm300_vm0, %v332_v59  ;;  %v3546_v43 = vld [vmem:[%s6034_s1 + $0x58] sm:$0xf0]  ;;  %v3914_v50 = vld [vmem:[%s6034_s1 + $0x1d4] sm:$0xf0] }
  0xb2   : > { %1295 = vrot.lane.b32.xlu1 %v1251_v6, %s4084_s29  ;;  %v1600_v40 = vrot.slane %v1598_v53, 4  ;;  %v1599_v62 = vsel %vm4605_vm13, %v1590_v3, %v1598_v53  ;;  %v729_v6 = vsel %vm4160_vm3, %v727_v25, %v728_v61  ;;  %1702 = vrot.lane.b32.xlu2 %v1579_v22, %s4084_s29  ;;  %v3672_v3 = vld [vmem:[%s6034_s1 + $0x150] sm:$0xf]  ;;  %v3737_v13 = vor.u32 %v3914_v50, %v3736_v55  ;;  %v3896_v22 = vld [vmem:[%s6034_s1 + $0x144] sm:$0xf0] }
  0xb3   : > { %769 = vst.msk [vmem:[#allocation2 + $0x130] sm:$0xf] %vm300_vm0, %v729_v6  ;;  %2860 = vmatpush.bf16.msrb.mxu0 %v3777_v58  ;;  %v3673_v63 = vor.u32 %v3898_v4, %v3672_v3  ;;  %v1615_v25 = vshll.u32 %v1491_v51, 16  ;;  %v341_v6 = vld [vmem:[#allocation3 + $0x40] sm:$0xf]  ;;  %v730_v51 = vrot.slane %v728_v61, 4 }
  0xb4   : > { %v870_v60 = vpop.permute.xlu1 %869  ;;  %v3426_v28 = vld [vmem:[#allocation2 + $0xdc] sm:$0xf0]  ;;  %v578_v36 = vpop.permute.xlu2 %577  ;;  %v1609_v57 = vsel %vm4605_vm13, %v1600_v40, %v4775_v20  ;;  %v1610_v40 = vrot.slane %v4775_v20, 4  ;;  %2803 = vmatpush.bf16.msrb.mxu3 %v3737_v13  ;;  %359 = vst.msk [vmem:[#allocation2 + $0x140] sm:$0xf] %vm300_vm0, %v341_v6 }
  0xb5   : > { %921 = vst.msk [vmem:[#allocation2 + $0x2c] sm:$0xf] %vm621_vm10, %v870_v60  ;;  %v4763_v7 = vor.u32 %v3835_v30, %v3426_v28  ;;  %1704 = vrot.lane.b32.xlu0 %v1589_v34, %s4084_s29  ;;  %v4809_v30 = vld [vmem:[#allocation3 + $0x38] sm:$0xf]  ;;  %v700_v60 = vrot.slane %v698_v19, 4  ;;  %2749 = vmatpush.bf16.msrb.mxu2 %v3673_v63  ;;  %v1617_v48 = vrot.slane %v1615_v25, 7 }
  0xb6   : > { %627 = vst.msk [vmem:[#allocation2 + $0x64] sm:$0xf] %vm621_vm10, %v578_v36  ;;  %v1259_v46 = vrot.slane %v4809_v30, 6  ;;  %v647_v28 = vld [vmem:[#allocation3 + $0x1c] sm:$0xf] }
  0xb7   : > { %6056 = vst [vmem:[#allocation4_spill] sm:$0xff] %v4763_v7  ;;  %v574_v12 = vpop.permute.xlu0 %573  ;;  %2726 = vmatmul.bf16.vlgmr.msra.gmra.mxu3 %v4763_v7  ;;  %v3812_v8 = vld [vmem:[#allocation2 + $0x10] sm:$0xf0]  ;;  %v331_v36 = vld [vmem:[#allocation3 + $0x18] sm:$0xf]  ;;  %v701_v2 = vrot.slane %v647_v28, 5 }
  0xb8   : > { %625 = vst.msk [vmem:[#allocation2 + $0x3c] sm:$0xf] %vm621_vm10, %v574_v12  ;;  %v4773_v31 = vor.u32 %v3812_v8, %v3324_v18  ;;  %v1260_v1 = vsel %vm4522_vm9, %v1258_v41, %v1259_v46  ;;  %v3865_v19 = vld [vmem:[%s6034_s1 + $0x54] sm:$0xf]  ;;  %v3344_v18 = vld [vmem:[#allocation2 + $0x28] sm:$0xf] }
  0xb9   : > { %349 = vst.msk [vmem:[#allocation2 + $0x78] sm:$0xf] %vm300_vm0, %v331_v36  ;;  %v702_v45 = vsel %vm4160_vm3, %v700_v60, %v701_v2  ;;  %v3549_v53 = vor.u32 %v3865_v19, %v3546_v43  ;;  %v3728_v11 = vld [vmem:[%s6034_s1 + $0x1c0] sm:$0xf]  ;;  %v3863_v41 = vld [vmem:[%s6034_s1 + $0x44] sm:$0xf] }
  0xba   : > { %2647 = vmatmul.bf16.vlgmr.msra.gmra.mxu0 %v4773_v31  ;;  %1708 = vrot.lane.b32.xlu1 %v1609_v57, %s4084_s29  ;;  %760 = vst.msk [vmem:[#allocation2 + $0x7c] sm:$0xf] %vm300_vm0, %v702_v45  ;;  %v1253_v57 = vrot.slane %v4865_v32, 6  ;;  %v1196_v3 = vld [vmem:[#allocation3 + $0x3c] sm:$0xf] }
  0xbb   : > { %2911 = vmatpush.bf16.msrb.mxu1 %v3549_v53  ;;  %v3840_v4 = vld [vmem:[#allocation2 + $0xf4] sm:$0xf]  ;;  %v1262_v45 = vrot.slane %v1196_v3, 6  ;;  %v657_v43 = vld [vmem:[#allocation3 + $0x44] sm:$0xf]  ;;  %v1642_v3 = vshrl.u32 %v1494_v0, 16 }
  0xbc   : > { %v594_v10 = vpop.permute.xlu1 %593  ;;  %v3815_v5 = vld [vmem:[#allocation2 + $0x2c] sm:$0xf]  ;;  %v596_v16 = vpop.permute.xlu2 %595  ;;  %v658_v30 = vld [vmem:[#allocation3 + $0x48] sm:$0x1]  ;;  %v333_v53 = vld [vmem:[#allocation3 + $0x20] sm:$0xf] }
  0xbd   : > { %635 = vst.msk [vmem:[#allocation2 + $0x104] sm:$0xf] %vm621_vm10, %v594_v10  ;;  %v4812_v34 = vor.u32 %v3815_v5, %v3346_v39  ;;  %1706 = vrot.lane.b32.xlu0 %v1599_v62, %s4084_s29  ;;  %v1252_v39 = vrot.slane %v1250_v49, 4  ;;  %v703_v10 = vrot.slane %v701_v2, 4  ;;  %v3664_v49 = vld [vmem:[%s6034_s1 + $0x140] sm:$0xf] }
  0xbe   : > { %636 = vst.msk [vmem:[#allocation2 + $0x118] sm:$0xf] %vm621_vm10, %v596_v16  ;;  %v4885_v16 = vor.u32 %v1617_v48, %v1614_v17  ;;  %v3665_v42 = vor.u32 %v3896_v22, %v3664_v49  ;;  %v3538_v2 = vld [vmem:[%s6034_s1 + $0x48] sm:$0xf0]  ;;  %v734_v13 = vrot.slane %v658_v30, 5  ;;  %v1255_v61 = vrot.slane %v1253_v57, 4 }
  0xbf   : > { %v592_v56 = vpop.permute.xlu0 %591  ;;  %2706 = vmatmul.bf16.gmra.mxu1 %v4812_v34  ;;  %v3817_v12 = vld [vmem:[#allocation2 + $0x38] sm:$0xf0]  ;;  %v1254_v5 = vsel %vm4522_vm9, %v1252_v39, %v1253_v57  ;;  %v705_v28 = vsel %vm4160_vm3, %v703_v10, %v704_v35  ;;  %v3541_v19 = vor.u32 %v3863_v41, %v3538_v2  ;;  %351 = vst.msk [vmem:[#allocation2 + $0xa0] sm:$0xf] %vm300_vm0, %v333_v53  ;;  %v3894_v25 = vld [vmem:[%s6034_s1 + $0x134] sm:$0xf0] }
  0xc0   : > { %634 = vst.msk [vmem:[#allocation2 + $0xf0] sm:$0xf] %vm621_vm10, %v592_v56  ;;  %v4871_v20 = vor.u32 %v3817_v12, %v3344_v18  ;;  %1297 = vrot.lane.b32.xlu2 %v1254_v5, %s4084_s29  ;;  %v3912_v56 = vld [vmem:[%s6034_s1 + $0x1c4] sm:$0xf0]  ;;  %v1619_v60 = vsel %vm4605_vm13, %v1610_v40, %v4885_v16  ;;  %2750 = vmatpush.bf16.msrb.mxu2 %v3665_v42  ;;  %v4916_v18 = vld [vmem:[#allocation3 + $0x40] sm:$0xf] }
  0xc1   : > { %v3729_v36 = vor.u32 %v3912_v56, %v3728_v11  ;;  %v1265_v63 = vrot.slane %v4916_v18, 6  ;;  %761 = vst.msk [vmem:[#allocation2 + $0x90] sm:$0xf] %vm300_vm0, %v705_v28  ;;  %2912 = vmatpush.bf16.msrb.mxu1 %v3541_v19  ;;  %v3720_v38 = vld [vmem:[%s6034_s1 + $0x1b0] sm:$0xf]  ;;  %v1257_v42 = vsel %vm4522_vm9, %v1255_v61, %v1256_v37 }
  0xc2   : > { %1710 = vrot.lane.b32.xlu1 %v1619_v60, %s4084_s29  ;;  %v3822_v32 = vld [vmem:[#allocation2 + $0x60] sm:$0xf0]  ;;  %v3768_v17 = vld [vmem:[%s6034_s1 + $0x210] sm:$0xf]  ;;  %v3922_v6 = vld [vmem:[%s6034_s1 + $0x214] sm:$0xf0] }
  0xc3   : > { %2804 = vmatpush.bf16.msrb.mxu3 %v3729_v36  ;;  %v3769_v49 = vor.u32 %v3922_v6, %v3768_v17  ;;  %v3861_v22 = vld [vmem:[%s6034_s1 + $0x34] sm:$0xf]  ;;  %v3530_v56 = vld [vmem:[%s6034_s1 + $0x38] sm:$0xf0]  ;;  %v334_v30 = vld [vmem:[#allocation3 + $0x24] sm:$0xf] }
  0xc4   : > { %v576_v52 = vpop.permute.xlu1 %575  ;;  %v896_v8 = vpop.permute.xlu2 %895  ;;  %v3842_v9 = vld [vmem:[#allocation2 + $0x100] sm:$0xf0]  ;;  %v3533_v41 = vor.u32 %v3861_v22, %v3530_v56  ;;  %352 = vst.msk [vmem:[#allocation2 + $0xb4] sm:$0xf] %vm300_vm0, %v334_v30  ;;  %v3908_v61 = vld [vmem:[%s6034_s1 + $0x1a4] sm:$0xf0] }
  0xc5   : > { %626 = vst.msk [vmem:[#allocation2 + $0x50] sm:$0xf] %vm621_vm10, %v576_v52  ;;  %1301 = vrot.lane.b32.xlu0 %v1260_v1, %s4084_s29  ;;  %v1261_v1 = vrot.slane %v1259_v46, 4  ;;  %v1264_v52 = vrot.slane %v1262_v45, 4  ;;  %2861 = vmatpush.bf16.msrb.mxu0 %v3769_v49  ;;  %v1267_v17 = vrot.slane %v1265_v63, 4  ;;  %v4042_v22 = vld [vmem:[%s4138_s27 + $0x50] sm:$0xff]  }
  0xc6   : > { %934 = vst.msk [vmem:[#allocation2 + $0x130] sm:$0xf] %vm621_vm10, %v896_v8  ;;  %v731_v8 = vrot.slane %v657_v43, 5  ;;  %2913 = vmatpush.bf16.msrb.mxu1 %v3533_v41  ;;  %v3859_v49 = vld [vmem:[%s6034_s1 + $0x24] sm:$0xf] }
  0xc7   : > { %v892_v62 = vpop.permute.xlu0 %891  ;;  %v3444_v29 = vld [vmem:[#allocation2 + $0xf0] sm:$0xf]  ;;  %v1263_v12 = vsel %vm4522_vm9, %v1261_v1, %v1262_v45  ;;  %v1266_v40 = vsel %vm4522_vm9, %v1264_v52, %v1265_v63  ;;  %v1645_v1 = vshll.u32 %v1494_v0, 16  ;;  %v1644_v52 = vrot.slane %v1642_v3, 6  ;;  %v938_v56 = vld [vmem:[#allocation3 + $0xc] sm:$0xf] }
  0xc8   : > { %932 = vst.msk [vmem:[#allocation2 + $0x108] sm:$0xf] %vm621_vm10, %v892_v62  ;;  %v4873_v26 = vor.u32 %v3842_v9, %v3444_v29  ;;  %v3656_v9 = vld [vmem:[%s6034_s1 + $0x130] sm:$0xf]  ;;  %v733_v23 = vrot.slane %v731_v8, 4  ;;  %v732_v39 = vsel %vm4160_vm3, %v730_v51, %v731_v8  ;;  %1299 = vrot.lane.b32.xlu2 %v1257_v42, %s4084_s29  ;;  %v3970_v42 = vunpack.c.h.bf16 %v4042_v22 }
  0xc9   : > { %v3657_v62 = vor.u32 %v3894_v25, %v3656_v9  ;;  %v3910_v29 = vld [vmem:[%s6034_s1 + $0x1b4] sm:$0xf0]  ;;  %770 = vst.msk [vmem:[#allocation2 + $0x144] sm:$0xf] %vm300_vm0, %v732_v39  ;;  %v3648_v8 = vld [vmem:[%s6034_s1 + $0x120] sm:$0xf] }
  0xca   : > { %2652 = vmatmul.bf16.gmra.mxu0 %v4871_v20  ;;  %2677 = vmatmul.bf16.gmra.mxu2 %v4873_v26  ;;  %v735_v10 = vsel %vm4160_vm3, %v733_v23, %v734_v13  ;;  %v3721_v5 = vor.u32 %v3910_v29, %v3720_v38  ;;  %v3892_v13 = vld [vmem:[%s6034_s1 + $0x124] sm:$0xf0]  ;;  %v3712_v51 = vld [vmem:[%s6034_s1 + $0x1a0] sm:$0xf]  ;;  %v939_v41 = vld [vmem:[#allocation3 + $0x10] sm:$0xf] }
  0xcb   : > { %1305 = vrot.lane.b32.xlu1 %v1266_v40, %s4084_s29  ;;  %2751 = vmatpush.bf16.msrb.mxu2 %v3657_v62  ;;  %771 = vst.msk [vmem:[#allocation2 + $0x158] sm:$0xf] %vm300_vm0, %v735_v10  ;;  %v3649_v38 = vor.u32 %v3892_v13, %v3648_v8  ;;  %v3713_v29 = vor.u32 %v3908_v61, %v3712_v51  ;;  %v979_v3 = vshrl.u32 %v939_v41, 16  ;;  %v5041_v30 = vmax.f32 %v3970_v42, 0.0  ;;  %v3890_v61 = vld [vmem:[%s6034_s1 + $0x114] sm:$0xf0] }
  0xcc   : > { %v876_v58 = vpop.permute.xlu1 %875  ;;  %v878_v59 = vpop.permute.xlu2 %877  ;;  %v3364_v54 = vld [vmem:[#allocation2 + $0x50] sm:$0xf]  ;;  %2805 = vmatpush.bf16.msrb.mxu3 %v3721_v5  ;;  %v1496_v22 = vld [vmem:[#allocation3 + $0x50] sm:$0xf] }
  0xcd   : > { %924 = vst.msk [vmem:[#allocation2 + $0x68] sm:$0xf] %vm621_vm10, %v876_v58  ;;  %1303 = vrot.lane.b32.xlu0 %v1263_v12, %s4084_s29  ;;  %v1493_v58 = vld [vmem:[#allocation3 + $0x44] sm:$0xf]  ;;  %v4974_v36 = vor.u32 %v3822_v32, %v3364_v54  ;;  %v3466_v19 = vld [vmem:[#allocation2 + $0x12c] sm:$0xf0] }
  0xce   : > { %925 = vst.msk [vmem:[#allocation2 + $0x7c] sm:$0xf] %vm621_vm10, %v878_v59  ;;  %v1632_v37 = vshrl.u32 %v1493_v58, 16  ;;  %v1635_v28 = vshll.u32 %v1493_v58, 16  ;;  %v1647_v12 = vrot.slane %v1645_v1, 7  ;;  %v981_v8 = vrot.slane %v979_v3, 5 }
  0xcf   : > { %v874_v55 = vpop.permute.xlu0 %873  ;;  %v3446_v50 = vld [vmem:[#allocation2 + $0x104] sm:$0xf0]  ;;  %v3464_v32 = vld [vmem:[#allocation2 + $0x118] sm:$0xf]  ;;  %2752 = vmatpush.bf16.msrb.mxu2 %v3649_v38 }
  0xd0   : > { %923 = vst.msk [vmem:[#allocation2 + $0x54] sm:$0xf] %vm621_vm10, %v874_v55  ;;  %v4922_v46 = vor.u32 %v3840_v4, %v3446_v50  ;;  %v649_v4 = vld [vmem:[#allocation3 + $0x24] sm:$0xf]  ;;  %v1634_v45 = vrot.slane %v1632_v37, 6  ;;  %v1637_v43 = vrot.slane %v1635_v28, 7  ;;  %v4996_v25 = vor.u32 %v1647_v12, %v1644_v52  ;;  %2806 = vmatpush.bf16.msrb.mxu3 %v3713_v29 }
  0xd1   : > { %v706_v55 = vrot.slane %v704_v35, 4  ;;  %v707_v50 = vrot.slane %v649_v4, 5  ;;  %v1492_v54 = vld [vmem:[#allocation3 + $0x40] sm:$0xf]  ;;  %v969_v37 = vshrl.u32 %v938_v56, 16  ;;  %v972_v28 = vshll.u32 %v938_v56, 16 }
  0xd2   : > { %6057 = vst [vmem:[#allocation5_spill] sm:$0xff] %v4922_v46  ;;  %2731 = vmatmul.bf16.gmra.mxu3 %v4922_v46  ;;  %v4986_v53 = vor.u32 %v1637_v43, %v1634_v45  ;;  %v1622_v63 = vshrl.u32 %v1492_v54, 16  ;;  %v1625_v5 = vshll.u32 %v1492_v54, 16  ;;  %v982_v43 = vshll.u32 %v939_v41, 16  ;;  %v3640_v38 = vld [vmem:[%s6034_s1 + $0x110] sm:$0xf] }
  0xd3   : > { %v708_v21 = vsel %vm4160_vm3, %v706_v55, %v707_v50  ;;  %v709_v35 = vrot.slane %v707_v50, 4  ;;  %v971_v52 = vrot.slane %v969_v37, 5  ;;  %v974_v12 = vrot.slane %v972_v28, 6  ;;  %v3704_v54 = vld [vmem:[%s6034_s1 + $0x190] sm:$0xf] }
  0xd4   : > { %v894_v48 = vpop.permute.xlu1 %893  ;;  %v602_v57 = vpop.permute.xlu2 %601  ;;  %v3366_v11 = vld [vmem:[#allocation2 + $0x64] sm:$0xf0]  ;;  %762 = vst.msk [vmem:[#allocation2 + $0xa4] sm:$0xf] %vm300_vm0, %v708_v21  ;;  %v1640_v39 = vrot.slane %v4986_v53, 4  ;;  %v1624_v58 = vrot.slane %v1622_v63, 6 }
  0xd5   : > { %933 = vst.msk [vmem:[#allocation2 + $0x11c] sm:$0xf] %vm621_vm10, %v894_v48  ;;  %v711_v62 = vsel %vm4160_vm3, %v709_v35, %v710_v47  ;;  %v5013_v48 = vld [vmem:[#allocation3 + $0x44] sm:$0xf]  ;;  %v1620_v47 = vrot.slane %v4885_v16, 4  ;;  %v1627_v0 = vrot.slane %v1625_v5, 7 }
  0xd6   : > { %639 = vst.msk [vmem:[#allocation2 + $0x154] sm:$0xf] %vm621_vm10, %v602_v57  ;;  %v1649_v44 = vsel %vm4605_vm13, %v1640_v39, %v4996_v25  ;;  %v1268_v15 = vrot.slane %v5013_v48, 6  ;;  %v3522_v16 = vld [vmem:[%s6034_s1 + $0x28] sm:$0xf0]  ;;  %v984_v35 = vrot.slane %v982_v43, 6 }
  0xd7   : > { %v598_v59 = vpop.permute.xlu0 %597  ;;  %v3820_v60 = vld [vmem:[#allocation2 + $0x54] sm:$0xf]  ;;  %763 = vst.msk [vmem:[#allocation2 + $0xb8] sm:$0xf] %vm300_vm0, %v711_v62  ;;  %1716 = vrot.lane.b32.xlu0 %v1649_v44, %s4084_s29  ;;  %v5039_v45 = vor.u32 %v1627_v0, %v1624_v58  ;;  %v3906_v44 = vld [vmem:[%s6034_s1 + $0x194] sm:$0xf0] }
  0xd8   : > { %637 = vst.msk [vmem:[#allocation2 + $0x12c] sm:$0xf] %vm621_vm10, %v598_v59  ;;  %v4976_v2 = vor.u32 %v3820_v60, %v3366_v11  ;;  %v1269_v11 = vsel %vm4522_vm9, %v1267_v17, %v1268_v15  ;;  %v3525_v59 = vor.u32 %v3859_v49, %v3522_v16  ;;  %v937_v60 = vld [vmem:[#allocation3 + $0x8] sm:$0xe]  ;;  %v5064_v62 = vor.u32 %v984_v35, %v981_v8  ;;  %v3760_v58 = vld [vmem:[%s6034_s1 + $0x200] sm:$0xf] }
  0xd9   : > { %1307 = vrot.lane.b32.xlu1 %v1269_v11, %s4084_s29  ;;  %v960_v55 = vshrl.u32 %v937_v60, 16  ;;  %v963_v50 = vshll.u32 %v937_v60, 16  ;;  %v1629_v21 = vsel %vm4605_vm13, %v1620_v47, %v5039_v45  ;;  %v3641_v17 = vor.u32 %v3890_v61, %v3640_v38  ;;  %v1495_v47 = vld [vmem:[#allocation3 + $0x4c] sm:$0xf]  ;;  %v5103_v61 = vld [vmem:[#allocation3 + $0x18] sm:$0xf] }
  0xda   : > { %2657 = vmatmul.bf16.gmra.mxu0 %v4974_v36  ;;  %2711 = vmatmul.bf16.gmra.mxu1 %v4976_v2  ;;  %v1650_v63 = vrot.slane %v4996_v25, 4  ;;  %v3705_v49 = vor.u32 %v3906_v44, %v3704_v54  ;;  %v1652_v42 = vshrl.u32 %v1495_v47, 16  ;;  %v1655_v11 = vshll.u32 %v1495_v47, 16  ;;  %v3920_v25 = vld [vmem:[%s6034_s1 + $0x204] sm:$0xf0] }
  0xdb   : > { %2914 = vmatpush.bf16.msrb.mxu1 %v3525_v59  ;;  %v962_v13 = vrot.slane %v960_v55, 5  ;;  %v965_v51 = vrot.slane %v963_v50, 6  ;;  %1712 = vrot.lane.b32.xlu2 %v1629_v21, %s4084_s29  ;;  %v1662_v56 = vshrl.u32 %v1496_v22, 16  ;;  %v1665_v41 = vshll.u32 %v1496_v22, 16  ;;  %v3632_v50 = vld [vmem:[%s6034_s1 + $0x100] sm:$0xf] }
  0xdc   : > { %v582_v9 = vpop.permute.xlu1 %581  ;;  %v3845_v40 = vld [vmem:[#allocation2 + $0x11c] sm:$0xf]  ;;  %v584_v23 = vpop.permute.xlu2 %583  ;;  %2753 = vmatpush.bf16.msrb.mxu2 %v3641_v17  ;;  %2807 = vmatpush.bf16.msrb.mxu3 %v3705_v49  ;;  %v1654_v37 = vrot.slane %v1652_v42, 6  ;;  %v1657_v28 = vrot.slane %v1655_v11, 7  ;;  %v3761_v3 = vor.u32 %v3920_v25, %v3760_v58  ;;  %v1394_v17 = vrot.slane %v5103_v61, 6 }
  0xdd   : > { %629 = vst.msk [vmem:[#allocation2 + $0x8c] sm:$0xf] %vm621_vm10, %v582_v9  ;;  %v5010_v6 = vor.u32 %v3845_v40, %v3466_v19  ;;  %v966_v29 = vor.u32 %v965_v51, %v962_v13  ;;  %v1351_v13 = vld [vmem:[#allocation3 + $0x10] sm:$0xc]  ;;  %v1352_v51 = vld [vmem:[#allocation3 + $0x14] sm:$0xf] }
  0xde   : > { %630 = vst.msk [vmem:[#allocation2 + $0xa0] sm:$0xf] %vm621_vm10, %v584_v23  ;;  %v975_v23 = vor.u32 %v974_v12, %v971_v52  ;;  %v1658_v55 = vor.u32 %v1657_v28, %v1654_v37  ;;  %2862 = vmatpush.bf16.msrb.mxu0 %v3761_v3  ;;  %v3888_v52 = vld [vmem:[%s6034_s1 + $0x104] sm:$0xf0]  ;;  %v3320_v38 = vrot.slane %v1351_v13, 10  ;;  %vm1801_vm3 = vcmask 1044484  }
  0xdf   : > { %6058 = vst [vmem:[#allocation6_spill] sm:$0xff] %v5010_v6  ;;  %v580_v57 = vpop.permute.xlu0 %579  ;;  %v3847_v10 = vld [vmem:[#allocation2 + $0x128] sm:$0xf0]  ;;  %v967_v5 = vrot.slane %v966_v29, 4  ;;  %v3633_v35 = vor.u32 %v3888_v52, %v3632_v50  ;;  %v1391_v29 = vrot.slane %v1352_v51, 6  ;;  %vm5169_vm4 = vmor %vm1800_vm2, %vm1801_vm3 }
  0xe0   : > { %628 = vst.msk [vmem:[#allocation2 + $0x78] sm:$0xf] %vm621_vm10, %v580_v57  ;;  %v5022_v18 = vor.u32 %v3847_v10, %v3464_v32  ;;  %v3852_v57 = vld [vmem:[#allocation2 + $0x150] sm:$0xf0]  ;;  %v977_v10 = vrot.slane %v975_v23, 4 }
  0xe1   : > { %v976_v60 = vsel %vm5060_vm1, %v967_v5, %v975_v23  ;;  %v1659_v23 = vsel %vm4605_vm13, %v1650_v63, %v1658_v55  ;;  %2754 = vmatpush.bf16.msrb.mxu2 %v3633_v35  ;;  %v3857_v54 = vld [vmem:[%s6034_s1 + $0x14] sm:$0xf]  ;;  %v3696_v47 = vld [vmem:[%s6034_s1 + $0x180] sm:$0xf]  ;;  %v3904_v63 = vld [vmem:[%s6034_s1 + $0x184] sm:$0xf0]  ;;  %v1392_v49 = vsel %vm4522_vm9, %v3320_v38, %v1391_v29 }
  0xe2   : > { %2682 = vmatmul.bf16.gmra.mxu2 %v5022_v18  ;;  %2736 = vmatmul.bf16.gmra.mxu3 %v5010_v6  ;;  %v986_v16 = vsel %vm5060_vm1, %v977_v10, %v5064_v62  ;;  %1165 = vst.msk [vmem:[#allocation2 + $0x8] sm:$0xf] %vm300_vm0, %v976_v60  ;;  %v1630_v5 = vrot.slane %v5039_v45, 4  ;;  %v1393_v42 = vrot.slane %v1391_v29, 4  ;;  %v3697_v11 = vor.u32 %v3904_v63, %v3696_v47  ;;  %v940_v3 = vld [vmem:[#allocation3 + $0x14] sm:$0xf] }
  0xe3   : > { %1166 = vst.msk [vmem:[#allocation2 + $0x1c] sm:$0xf] %vm300_vm0, %v986_v16  ;;  %1718 = vrot.lane.b32.xlu0 %v1659_v23, %s4084_s29  ;;  %v5128_v16 = vld [vmem:[#allocation3 + $0x4c] sm:$0xf]  ;;  %v3626_v38 = vld [vmem:[%s6034_s1 + $0xf8] sm:$0xf0] }
  0xe4   : > { %v600_v1 = vpop.permute.xlu1 %599  ;;  %v3827_v4 = vld [vmem:[#allocation2 + $0x88] sm:$0xf0]  ;;  %v884_v19 = vpop.permute.xlu2 %883  ;;  %1462 = vst.msk [vmem:[#allocation2 + $0xc] sm:$0xf] %vm300_vm0, %v1392_v49  ;;  %v1639_v45 = vsel %vm4605_vm13, %v1630_v5, %v4986_v53  ;;  %v1395_v60 = vsel %vm4522_vm9, %v1393_v42, %v1394_v17  ;;  %2808 = vmatpush.bf16.msrb.mxu3 %v3697_v11  ;;  %v3506_v53 = vld [vmem:[%s6034_s1 + $0x8] sm:$0xf0] }
  0xe5   : > { %638 = vst.msk [vmem:[#allocation2 + $0x140] sm:$0xf] %vm621_vm10, %v600_v1  ;;  %v3825_v1 = vld [vmem:[#allocation2 + $0x7c] sm:$0xf]  ;;  %1714 = vrot.lane.b32.xlu2 %v1639_v45, %s4084_s29  ;;  %v3404_v45 = vld [vmem:[#allocation2 + $0xa0] sm:$0xf] }
  0xe6   : > { %928 = vst.msk [vmem:[#allocation2 + $0xb8] sm:$0xf] %vm621_vm10, %v884_v19  ;;  %v1667_v19 = vrot.slane %v1665_v41, 7  ;;  %v987_v41 = vrot.slane %v5064_v62, 4  ;;  %v3855_v62 = vld [vmem:[%s6034_s1 + $0x4] sm:$0xf] }
  0xe7   : > { %v880_v9 = vpop.permute.xlu0 %879  ;;  %v3384_v40 = vld [vmem:[#allocation2 + $0x78] sm:$0xf]  ;;  %v3509_v28 = vor.u32 %v3855_v62, %v3506_v53  ;;  %1463 = vst.msk [vmem:[#allocation2 + $0x20] sm:$0xf] %vm300_vm0, %v1395_v60  ;;  %v3905_v39 = vld [vmem:[%s6034_s1 + $0x194] sm:$0xf] }
  0xe8   : > { %926 = vst.msk [vmem:[#allocation2 + $0x90] sm:$0xf] %vm621_vm10, %v880_v9  ;;  %v5056_v32 = vor.u32 %v3827_v4, %v3384_v40  ;;  %v1664_v4 = vrot.slane %v1662_v56, 6  ;;  %v1660_v40 = vrot.slane %v1658_v55, 4  ;;  %v1201_v56 = vld [vmem:[#allocation3 + $0x50] sm:$0x3] }
  0xe9   : > { %v992_v55 = vshll.u32 %v940_v3, 16  ;;  %v3570_v5 = vld [vmem:[%s6034_s1 + $0x88] sm:$0xf0] }
  0xea   : > { %2662 = vmatmul.bf16.gmra.mxu0 %v5056_v32  ;;  %v5096_v21 = vor.u32 %v1667_v19, %v1664_v4  ;;  %v989_v19 = vshrl.u32 %v940_v3, 16 }
  0xeb   : > { %v994_v51 = vrot.slane %v992_v55, 6 }
  0xec   : > { %v900_v0 = vpop.permute.xlu1 %899  ;;  %v3484_v59 = vld [vmem:[#allocation2 + $0x140] sm:$0xf]  ;;  %v1669_v10 = vsel %vm4605_vm13, %v1660_v40, %v5096_v21  ;;  %v1691_v22 = vpop.permute.xlu2 %1690  ;;  %v991_v13 = vrot.slane %v989_v19, 5 }
  0xed   : > { %936 = vst.msk [vmem:[#allocation2 + $0x158] sm:$0xf] %vm621_vm10, %v900_v0  ;;  %v5087_v43 = vor.u32 %v3852_v57, %v3484_v59  ;;  %v3514_v57 = vld [vmem:[%s6034_s1 + $0x18] sm:$0xf0]  ;;  %1720 = vrot.lane.b32.xlu1 %v1669_v10, %s4084_s29  ;;  %v1274_v0 = vrot.slane %v5128_v16, 6  ;;  %v1277_v59 = vrot.slane %v1201_v56, 6 }
  0xee   : > { %v3517_v44 = vor.u32 %v3857_v54, %v3514_v57  ;;  %1744 = vst.msk [vmem:[#allocation2 + $0xc] sm:$0xf] %vm621_vm10, %v1691_v22  ;;  %v3406_v35 = vld [vmem:[#allocation2 + $0xb4] sm:$0xf0]  ;;  %v1763_v57 = vld [vmem:[#allocation3 + $0x14] sm:$0xf] }
  0xef   : > { %v898_v12 = vpop.permute.xlu0 %897  ;;  %v3386_v8 = vld [vmem:[#allocation2 + $0x8c] sm:$0xf0]  ;;  %v1276_v37 = vrot.slane %v1274_v0, 4  ;;  %v1762_v54 = vld [vmem:[#allocation3 + $0x10] sm:$0x8]  ;;  %v1805_v56 = vrot.slane %v1763_v57, 7 }
  0xf0   : > { %935 = vst.msk [vmem:[#allocation2 + $0x144] sm:$0xf] %vm621_vm10, %v898_v12  ;;  %v5099_v9 = vor.u32 %v3825_v1, %v3386_v8  ;;  %2915 = vmatpush.bf16.msrb.mxu1 %v3517_v44  ;;  %v941_v12 = vld [vmem:[#allocation3 + $0x18] sm:$0xf]  ;;  %v3885_v8 = vld [vmem:[%s6034_s1 + $0xf4] sm:$0xf]  ;;  %v995_v44 = vor.u32 %v994_v51, %v991_v13  ;;  %v298_v13 = vpack.c.bf16 %v5041_v30, %v5041_v30 }
  0xf1   : > { %v1278_v52 = vsel %vm4522_vm9, %v1276_v37, %v1277_v59  ;;  %v999_v40 = vshrl.u32 %v941_v12, 16  ;;  %v1002_v23 = vshll.u32 %v941_v12, 16  ;;  %v3629_v29 = vor.u32 %v3885_v8, %v3626_v38  ;;  %v5165_v10 = vld [vmem:[#allocation3 + $0x18] sm:$0xf]  ;;  %v3901_v22 = vld [vmem:[%s6034_s1 + $0x174] sm:$0xf] }
  0xf2   : > { %2687 = vmatmul.bf16.gmra.mxu2 %v5087_v43  ;;  %2716 = vmatmul.bf16.gmra.mxu1 %v5099_v9  ;;  %v3321_v49 = vrot.slane %v1762_v54, 11  ;;  %v996_v59 = vsel %vm5060_vm1, %v987_v41, %v995_v44  ;;  %v997_v60 = vrot.slane %v995_v44, 4  ;;  %v1354_v51 = vld [vmem:[#allocation3 + $0x1c] sm:$0xf]  ;;  %v1396_v38 = vrot.slane %v1394_v17, 4 }
  0xf3   : > { %1313 = vrot.lane.b32.xlu0 %v1278_v52, %s4084_s29  ;;  %v1001_v47 = vrot.slane %v999_v40, 5  ;;  %v1004_v63 = vrot.slane %v1002_v23, 6  ;;  %2963 = vmatpush.bf16.msra.mxu2 %v3629_v29  ;;  %1167 = vst.msk [vmem:[#allocation2 + $0x30] sm:$0xf] %vm300_vm0, %v996_v59  ;;  %v1270_v52 = vrot.slane %v1268_v15, 4  ;;  %v1397_v15 = vrot.slane %v1354_v51, 6 }
  0xf4   : > { %v882_v58 = vpop.permute.xlu1 %881  ;;  %v3486_v25 = vld [vmem:[#allocation2 + $0x154] sm:$0xf0]  ;;  %2916 = vmatpush.bf16.msrb.mxu1 %v3509_v28  ;;  %v1806_v37 = vsel %vm5169_vm4, %v3321_v49, %v1805_v56  ;;  %v1807_v28 = vrot.slane %v1805_v56, 4  ;;  %v1286_v55 = vpop.permute.xlu2 %1285  ;;  %v5208_v40 = vld [vmem:[#allocation3 + $0x20] sm:$0xf] }
  0xf5   : > { %927 = vst.msk [vmem:[#allocation2 + $0xa4] sm:$0xf] %vm621_vm10, %v882_v58  ;;  %v1808_v58 = vrot.slane %v5165_v10, 7  ;;  %v5183_v62 = vor.u32 %v1004_v63, %v1001_v47  ;;  %v1400_v23 = vrot.slane %v5208_v40, 6  ;;  %v3917_v30 = vld [vmem:[%s6034_s1 + $0x1f4] sm:$0xf]  ;;  %v1398_v47 = vsel %vm4522_vm9, %v1396_v38, %v1397_v15 }
  0xf6   : > { %1876 = vst.msk [vmem:[#allocation2 + $0x10] sm:$0xf] %vm300_vm0, %v1806_v37  ;;  %v3754_v29 = vld [vmem:[%s6034_s1 + $0x1f8] sm:$0xf0]  ;;  %v1399_v61 = vrot.slane %v1397_v15, 4 }
  0xf7   : > { %v586_v1 = vpop.permute.xlu0 %585  ;;  %v3850_v4 = vld [vmem:[#allocation2 + $0x144] sm:$0xf]  ;;  %v1006_v41 = vsel %vm5060_vm1, %v997_v60, %v5183_v62  ;;  %v3757_v17 = vor.u32 %v3917_v30, %v3754_v29  ;;  %v3925_v54 = vld [vmem:[%s6034_s1 + $0x234] sm:$0xf]  ;;  %322 = vst.msk [vmem:[#allocation3 + $0x54] sm:$0xf] %vm300_vm0, %v298_v13 }
  0xf8   : > { %631 = vst.msk [vmem:[#allocation2 + $0xb4] sm:$0xf] %vm621_vm10, %v586_v1  ;;  %v5153_v50 = vor.u32 %v3850_v4, %v3486_v25  ;;  %v3690_v25 = vld [vmem:[%s6034_s1 + $0x178] sm:$0xf0]  ;;  %v5190_v1 = vld [vmem:[#allocation3 + $0x48] sm:$0xf]  ;;  %v1401_v49 = vsel %vm4522_vm9, %v1399_v61, %v1400_v23 }
  0xf9   : > { %v3693_v3 = vor.u32 %v3901_v22, %v3690_v25  ;;  %v1271_v12 = vrot.slane %v5190_v1, 6  ;;  %1168 = vst.msk [vmem:[#allocation2 + $0x44] sm:$0xf] %vm300_vm0, %v1006_v41  ;;  %v3786_v63 = vld [vmem:[%s6034_s1 + $0x238] sm:$0xf0]  ;;  %3071 = vmatpush.bf16.msra.mxu0 %v3757_v17  ;;  %v1007_v56 = vrot.slane %v5183_v62, 4 }
  0xfa   : > { %6061 = vst [vmem:[#allocation7_spill] sm:$0xff] %v5153_v50  ;;  %2741 = vmatmul.bf16.gmra.mxu3 %v5153_v50  ;;  %v3789_v22 = vor.u32 %v3925_v54, %v3786_v63  ;;  %v1765_v41 = vld [vmem:[#allocation3 + $0x1c] sm:$0xf]  ;;  %v1810_v15 = vrot.slane %v1808_v58, 4  ;;  %v3883_v17 = vld [vmem:[%s6034_s1 + $0xe4] sm:$0xf] }
  0xfb   : > { %3017 = vmatpush.bf16.msra.mxu3 %v3693_v3  ;;  %v1272_v48 = vsel %vm4522_vm9, %v1270_v52, %v1271_v12  ;;  %1336 = vst.msk [vmem:[#allocation2 + $0x44] sm:$0xf] %vm621_vm10, %v1286_v55  ;;  %v1811_v38 = vrot.slane %v1765_v41, 7  ;;  %v3618_v54 = vld [vmem:[%s6034_s1 + $0xe8] sm:$0xf0]  ;;  %v1402_v41 = vrot.slane %v1400_v23, 4 }
  0xfc   : > { %v1282_v42 = vpop.permute.xlu1 %1281  ;;  %v3830_v11 = vld [vmem:[#allocation2 + $0xa4] sm:$0xf]  ;;  %1309 = vrot.lane.b32.xlu2 %v1272_v48, %s4084_s29  ;;  %1465 = vst.msk [vmem:[#allocation2 + $0x48] sm:$0xf] %vm300_vm0, %v1401_v49  ;;  %3129 = vmatpush.bf16.msra.mxu1 %v3789_v22  ;;  %v1288_v48 = vpop.permute.xlu2 %1287  ;;  %v1670_v49 = vrot.slane %v5096_v21, 4 }
  0xfd   : > { %1334 = vst.msk [vmem:[#allocation2 + $0x1c] sm:$0xf] %vm621_vm10, %v1282_v42  ;;  %v5185_v53 = vor.u32 %v3830_v11, %v3406_v35  ;;  %v1809_v35 = vsel %vm5169_vm4, %v1807_v28, %v1808_v58  ;;  %v942_v42 = vld [vmem:[#allocation3 + $0x1c] sm:$0xf]  ;;  %v943_v11 = vld [vmem:[#allocation3 + $0x20] sm:$0xf] }
  0xfe   : > { %1877 = vst.msk [vmem:[#allocation2 + $0x24] sm:$0xf] %vm300_vm0, %v1809_v35  ;;  %v1009_v25 = vshrl.u32 %v942_v42, 16  ;;  %v1019_v37 = vshrl.u32 %v943_v11, 16  ;;  %v1022_v28 = vshll.u32 %v943_v11, 16  ;;  %v1813_v22 = vrot.slane %v1811_v38, 4 }
  0xff   : > { %v1280_v4 = vpop.permute.xlu0 %1279  ;;  %v3832_v19 = vld [vmem:[#allocation2 + $0xb0] sm:$0xf0]  ;;  %1464 = vst.msk [vmem:[#allocation2 + $0x34] sm:$0xf] %vm300_vm0, %v1398_v47  ;;  %v3340_v55 = vld [vmem:[#allocation2 + $0x10] sm:$0xf] }
 0x100   : > { %1333 = vst.msk [vmem:[#allocation2 + $0x8] sm:$0xf] %vm621_vm10, %v1280_v4  ;;  %v5200_v8 = vor.u32 %v3832_v19, %v3404_v45  ;;  %v1012_v45 = vshll.u32 %v942_v42, 16  ;;  %v1011_v4 = vrot.slane %v1009_v25, 5  ;;  %v1021_v52 = vrot.slane %v1019_v37, 5 }
 0x101   : > { %v1024_v62 = vrot.slane %v1022_v28, 6  ;;  %v5249_v35 = vld [vmem:[#allocation3 + $0x20] sm:$0xf]  ;;  %v1497_v29 = vld [vmem:[#allocation3 + $0x54] sm:$0xf]  ;;  %v3621_v42 = vor.u32 %v3883_v17, %v3618_v54  ;;  %v1812_v28 = vsel %vm5169_vm4, %v1810_v15, %v1811_v38 }
 0x102   : > { %2667 = vmatmul.bf16.gmra.mxu0 %v5200_v8  ;;  %2721 = vmatmul.bf16.gmra.mxu1 %v5185_v53  ;;  %v1014_v19 = vrot.slane %v1012_v45, 6  ;;  %v1814_v30 = vrot.slane %v5249_v35, 7  ;;  %v1675_v47 = vshll.u32 %v1497_v29, 16  ;;  %v3899_v11 = vld [vmem:[%s6034_s1 + $0x164] sm:$0xf] }
 0x103   : > { %v5255_v61 = vor.u32 %v1024_v62, %v1021_v52  ;;  %v3682_v21 = vld [vmem:[%s6034_s1 + $0x168] sm:$0xf0]  ;;  %2964 = vmatpush.bf16.msra.mxu2 %v3621_v42  ;;  %v3915_v15 = vld [vmem:[%s6034_s1 + $0x1e4] sm:$0xf]  ;;  %1878 = vst.msk [vmem:[#allocation2 + $0x38] sm:$0xf] %vm300_vm0, %v1812_v28 }
 0x104   : > { %v3813_v57 = vld [vmem:[#allocation2 + $0x18] sm:$0xf0]  ;;  %v1284_v44 = vpop.permute.xlu1 %1283  ;;  %v1015_v51 = vor.u32 %v1014_v19, %v1011_v4  ;;  %v3685_v4 = vor.u32 %v3899_v11, %v3682_v21  ;;  %v1273_v19 = vrot.slane %v1271_v12, 4  ;;  %v1815_v62 = vsel %vm5169_vm4, %v1813_v22, %v1814_v30  ;;  %v3818_v12 = vld [vmem:[#allocation2 + $0x40] sm:$0xf0] }
 0x105   : > { %1335 = vst.msk [vmem:[#allocation2 + $0x30] sm:$0xf] %vm621_vm10, %v1284_v44  ;;  %v3814_v13 = vld [vmem:[#allocation2 + $0x20] sm:$0xf0]  ;;  %v1672_v44 = vshrl.u32 %v1497_v29, 16 }
 0x106   : > { %v1016_v10 = vsel %vm5060_vm1, %v1007_v56, %v1015_v51  ;;  %v1017_v58 = vrot.slane %v1015_v51, 4  ;;  %v5270_v25 = vor.u32 %v3814_v13, %v3340_v55  ;;  %v1356_v13 = vld [vmem:[#allocation3 + $0x24] sm:$0xf]  ;;  %v5295_v51 = vld [vmem:[#allocation3 + $0x28] sm:$0xf]  ;;  %3018 = vmatpush.bf16.msra.mxu3 %v3685_v4  ;;  %v1275_v40 = vsel %vm4522_vm9, %v1273_v19, %v1274_v0 }
 0x107   : > { %v1693_v59 = vpop.permute.xlu0 %1692  ;;  %v3332_v60 = vld [vmem:[#allocation2 + $0x8] sm:$0xf]  ;;  %v1674_v45 = vrot.slane %v1672_v44, 6  ;;  %1169 = vst.msk [vmem:[#allocation2 + $0x58] sm:$0xf] %vm300_vm0, %v1016_v10  ;;  %v1403_v23 = vrot.slane %v1356_v13, 6  ;;  %1311 = vrot.lane.b32.xlu2 %v1275_v40, %s4084_s29 }
 0x108   : > { %1745 = vst.msk [vmem:[#allocation2 + $0x20] sm:$0xf] %vm621_vm10, %v1693_v59  ;;  %v5247_v3 = vor.u32 %v3813_v57, %v3332_v60  ;;  %v3811_v57 = vld [vmem:[#allocation2 + $0xc] sm:$0xf]  ;;  %v1677_v59 = vrot.slane %v1675_v47, 7  ;;  %v1026_v56 = vsel %vm5060_vm1, %v1017_v58, %v5255_v61  ;;  %v1027_v19 = vrot.slane %v5255_v61, 4 }
 0x109   : > { %1337 = vst.msk [vmem:[#allocation2 + $0x58] sm:$0xf] %vm621_vm10, %v1288_v48  ;;  %v1406_v48 = vrot.slane %v5295_v51, 6  ;;  %v3746_v16 = vld [vmem:[%s6034_s1 + $0x1e8] sm:$0xf0]  ;;  %v1404_v29 = vsel %vm4522_vm9, %v1402_v41, %v1403_v23  ;;  %v1405_v17 = vrot.slane %v1403_v23, 4 }
 0x10a   : > { %2755 = vmatmul.bf16.vlgmr.msrb.gmra.mxu2 %v5247_v3  ;;  %v5288_v52 = vor.u32 %v1677_v59, %v1674_v45  ;;  %1170 = vst.msk [vmem:[#allocation2 + $0x6c] sm:$0xf] %vm300_vm0, %v1026_v56  ;;  %v230_v0 = vld [vmem:[%s4138_s27 + $0x58] sm:$0x7]  ;;  %v3749_v54 = vor.u32 %v3915_v15, %v3746_v16  ;;  %v944_v44 = vld [vmem:[#allocation3 + $0x24] sm:$0xf] }
 0x10b   : > { %1879 = vst.msk [vmem:[#allocation2 + $0x4c] sm:$0xf] %vm300_vm0, %v1815_v62  ;;  %v945_v58 = vld [vmem:[#allocation3 + $0x28] sm:$0xf]  ;;  %v1032_v42 = vshll.u32 %v944_v44, 16  ;;  %v1816_v13 = vrot.slane %v1814_v30, 4 }
 0x10c   : > { %v1697_v63 = vpop.permute.xlu1 %1696  ;;  %v3352_v1 = vld [vmem:[#allocation2 + $0x30] sm:$0xf]  ;;  %v1679_v38 = vsel %vm4605_vm13, %v1670_v49, %v5288_v52  ;;  %1466 = vst.msk [vmem:[#allocation2 + $0x5c] sm:$0xf] %vm300_vm0, %v1404_v29  ;;  %3072 = vmatpush.bf16.msra.mxu0 %v3749_v54  ;;  %v1029_v49 = vshrl.u32 %v944_v44, 16  ;;  %v1039_v11 = vshrl.u32 %v945_v58, 16 }
 0x10d   : > { %1747 = vst.msk [vmem:[#allocation2 + $0x48] sm:$0xf] %vm621_vm10, %v1697_v63  ;;  %1722 = vrot.lane.b32.xlu1 %v1679_v38, %s4084_s29  ;;  %v1701_v63 = vpop.permute.xlu2 %1700  ;;  %v5329_v22 = vor.u32 %v3818_v12, %v3352_v1  ;;  %v1042_v21 = vshll.u32 %v945_v58, 16  ;;  %v1034_v28 = vrot.slane %v1032_v42, 6  ;;  %v3360_v41 = vld [vmem:[#allocation2 + $0x38] sm:$0xf] }
 0x10e   : > { %v1031_v56 = vrot.slane %v1029_v49, 5  ;;  %v1041_v4 = vrot.slane %v1039_v11, 5  ;;  %v1767_v40 = vld [vmem:[#allocation3 + $0x24] sm:$0xf]  ;;  %v5338_v23 = vld [vmem:[#allocation3 + $0x28] sm:$0xf] }
 0x10f   : > { %v3334_v60 = vld [vmem:[#allocation2 + $0x1c] sm:$0xf0]  ;;  %v1695_v37 = vpop.permute.xlu0 %1694  ;;  %v1044_v62 = vrot.slane %v1042_v21, 6  ;;  %v1817_v38 = vrot.slane %v1767_v40, 7  ;;  %v1820_v16 = vrot.slane %v5338_v23, 7 }
 0x110   : > { %v5286_v55 = vor.u32 %v3811_v57, %v3334_v60  ;;  %1746 = vst.msk [vmem:[#allocation2 + $0x34] sm:$0xf] %vm621_vm10, %v1695_v37  ;;  %v253_v57 = vunpack.c.l.bf16 %v230_v0  ;;  %v1035_v12 = vor.u32 %v1034_v28, %v1031_v56  ;;  %v3881_v61 = vld [vmem:[%s6034_s1 + $0xd4] sm:$0xf]  ;;  %v3610_v35 = vld [vmem:[%s6034_s1 + $0xd8] sm:$0xf0] }
 0x111   : > { %v5340_v15 = vor.u32 %v1044_v62, %v1041_v4  ;;  %v3613_v29 = vor.u32 %v3881_v61, %v3610_v35  ;;  %v1818_v44 = vsel %vm5169_vm4, %v1816_v13, %v1817_v38  ;;  %v1358_v42 = vld [vmem:[#allocation3 + $0x2c] sm:$0xf]  ;;  %v3372_v4 = vld [vmem:[#allocation2 + $0x58] sm:$0xf]  ;;  %v3738_v40 = vld [vmem:[%s6034_s1 + $0x1d8] sm:$0xf0] }
 0x112   : > { %2809 = vmatmul.bf16.vlgmr.msrb.gmra.mxu3 %v5286_v55  ;;  %3790 = vmatmul.msk.bf16.vlgmr.msrb.gmra.mxu0 %vm2611_vm5, %v5270_v25  ;;  %v276_v10 = vmax.f32 %v253_v57, 0.0  ;;  %v3819_v1 = vld [vmem:[#allocation2 + $0x48] sm:$0xf0]  ;;  %v1037_v30 = vrot.slane %v1035_v12, 4  ;;  %v1036_v0 = vsel %vm5060_vm1, %v1027_v19, %v1035_v12  ;;  %1880 = vst.msk [vmem:[#allocation2 + $0x60] sm:$0xf] %vm300_vm0, %v1818_v44 }
 0x113   : > { %2917 = vmatmul.bf16.vlgmr.msrb.gmra.mxu1 %v4773_v31  ;;  %v1407_v31 = vsel %vm4522_vm9, %v1405_v17, %v1406_v48  ;;  %v3897_v17 = vld [vmem:[%s6034_s1 + $0x154] sm:$0xf]  ;;  %1171 = vst.msk [vmem:[#allocation2 + $0x80] sm:$0xf] %vm300_vm0, %v1036_v0  ;;  %2965 = vmatpush.bf16.msra.mxu2 %v3613_v29  ;;  %v1680_v19 = vrot.slane %v5288_v52, 4  ;;  %v1047_v35 = vrot.slane %v5340_v15, 4 }
 0x114   : > { %v1699_v47 = vpop.permute.xlu1 %1698  ;;  %1467 = vst.msk [vmem:[#allocation2 + $0x70] sm:$0xf] %vm300_vm0, %v1407_v31  ;;  %v299_v59 = vpack.c.bf16 %v276_v10, %v276_v10  ;;  %v3354_v37 = vld [vmem:[#allocation2 + $0x44] sm:$0xf0]  ;;  %v1408_v31 = vrot.slane %v1406_v48, 4  ;;  %v5364_v10 = vor.u32 %v3819_v1, %v3360_v41  ;;  %v1046_v58 = vsel %vm5060_vm1, %v1037_v30, %v5340_v15 }
 0x115   : > { %1748 = vst.msk [vmem:[#allocation2 + $0x5c] sm:$0xf] %vm621_vm10, %v1699_v47  ;;  %v1819_v47 = vrot.slane %v1817_v38, 4  ;;  %v1409_v48 = vrot.slane %v1358_v42, 6  ;;  %v3913_v52 = vld [vmem:[%s6034_s1 + $0x1d4] sm:$0xf] }
 0x116   : > { %1749 = vst.msk [vmem:[#allocation2 + $0x70] sm:$0xf] %vm621_vm10, %v1701_v63  ;;  %v3674_v63 = vld [vmem:[%s6034_s1 + $0x158] sm:$0xf0]  ;;  %v946_v61 = vld [vmem:[#allocation3 + $0x2c] sm:$0xf] }
 0x117   : > { %v1290_v45 = vpop.permute.xlu0 %1289  ;;  %v3816_v60 = vld [vmem:[#allocation2 + $0x34] sm:$0xf]  ;;  %324 = vst.msk [vmem:[#allocation3 + $0x58] sm:$0x7] %vm323_vm6, %v299_v59  ;;  %v3677_v49 = vor.u32 %v3897_v17, %v3674_v63  ;;  %v1821_v51 = vsel %vm5169_vm4, %v1819_v47, %v1820_v16  ;;  %v5376_v59 = vld [vmem:[#allocation3 + $0x30] sm:$0xf] }
 0x118   : > { %1338 = vst.msk [vmem:[#allocation2 + $0x6c] sm:$0xf] %vm621_vm10, %v1290_v45  ;;  %v5354_v54 = vor.u32 %v3816_v60, %v3354_v37  ;;  %v1410_v60 = vsel %vm4522_vm9, %v1408_v31, %v1409_v48  ;;  %v1703_v37 = vpop.permute.xlu2 %1702  ;;  %v1411_v28 = vrot.slane %v1409_v48, 4  ;;  %v1412_v41 = vrot.slane %v5376_v59, 6  ;;  %v947_v17 = vld [vmem:[#allocation3 + $0x30] sm:$0xf] }
 0x119   : > { %1172 = vst.msk [vmem:[#allocation2 + $0x94] sm:$0xf] %vm300_vm0, %v1046_v58  ;;  %3019 = vmatpush.bf16.msra.mxu3 %v3677_v49  ;;  %v1049_v0 = vshrl.u32 %v946_v61, 16  ;;  %v1052_v29 = vshll.u32 %v946_v61, 16  ;;  %v2020_v63 = vld [vmem:[%s6035_s2] sm:$0x3] }
 0x11a   : > { %2760 = vmatmul.bf16.gmra.mxu2 %v5329_v22  ;;  %1881 = vst.msk [vmem:[#allocation2 + $0x74] sm:$0xf] %vm300_vm0, %v1821_v51  ;;  %v1413_v12 = vsel %vm4522_vm9, %v1411_v28, %v1412_v41  ;;  %v1059_v15 = vshrl.u32 %v947_v17, 16  ;;  %v1062_v58 = vshll.u32 %v947_v17, 16  ;;  %v3778_v49 = vld [vmem:[%s6034_s1 + $0x228] sm:$0xf0] }
 0x11b   : > { %1468 = vst.msk [vmem:[#allocation2 + $0x84] sm:$0xf] %vm300_vm0, %v1410_v60  ;;  %v1051_v42 = vrot.slane %v1049_v0, 5  ;;  %v1054_v33 = vrot.slane %v1052_v29, 6  ;;  %v1822_v51 = vrot.slane %v1820_v16, 4 }
 0x11c   : > { %v1294_v57 = vpop.permute.xlu1 %1293  ;;  %1750 = vst.msk [vmem:[#allocation2 + $0x84] sm:$0xf] %vm621_vm10, %v1703_v37  ;;  %v3821_v48 = vld [vmem:[#allocation2 + $0x5c] sm:$0xf]  ;;  %v3380_v59 = vld [vmem:[#allocation2 + $0x60] sm:$0xf] }
 0x11d   : > { %1340 = vst.msk [vmem:[#allocation2 + $0x94] sm:$0xf] %vm621_vm10, %v1294_v57  ;;  %v3923_v57 = vld [vmem:[%s6034_s1 + $0x224] sm:$0xf]  ;;  %v1769_v60 = vld [vmem:[#allocation3 + $0x2c] sm:$0xf]  ;;  %v1055_v28 = vor.u32 %v1054_v33, %v1051_v42 }
 0x11e   : > { %v1498_v45 = vld [vmem:[#allocation3 + $0x58] sm:$0x7]  ;;  %1469 = vst.msk [vmem:[#allocation2 + $0x98] sm:$0xf] %vm300_vm0, %v1413_v12  ;;  %v5418_v37 = vperm.slane %v2020_v63, 0  ;;  %v1414_v12 = vrot.slane %v1412_v41, 4 }
 0x11f   : > { %v1292_v11 = vpop.permute.xlu0 %1291  ;;  %v1682_v56 = vshrl.u32 %v1498_v45, 16  ;;  %v1685_v21 = vshll.u32 %v1498_v45, 16  ;;  %v3823_v62 = vld [vmem:[#allocation2 + $0x68] sm:$0xf0]  ;;  %v3374_v45 = vld [vmem:[#allocation2 + $0x6c] sm:$0xf0] }
 0x120   : > { %1339 = vst.msk [vmem:[#allocation2 + $0x80] sm:$0xf] %vm621_vm10, %v1292_v11  ;;  %v5400_v30 = vor.u32 %v3823_v62, %v3372_v4  ;;  %v3781_v11 = vor.u32 %v3923_v57, %v3778_v49  ;;  %v5420_v4 = vld [vmem:[#allocation3 + $0x30] sm:$0xf]  ;;  %v3879_v23 = vld [vmem:[%s6034_s1 + $0xc4] sm:$0xf]  ;;  %v1298_v0 = vpop.permute.xlu2 %1297 }
 0x121   : > { %v1684_v13 = vrot.slane %v1682_v56, 6  ;;  %v1687_v1 = vrot.slane %v1685_v21, 7  ;;  %v1061_v56 = vrot.slane %v1059_v15, 5  ;;  %v1064_v21 = vrot.slane %v1062_v58, 6  ;;  %v3824_v16 = vld [vmem:[#allocation2 + $0x70] sm:$0xf0] }
 0x122   : > { %2814 = vmatmul.bf16.gmra.mxu3 %v5354_v54  ;;  %3791 = vmatmul.msk.bf16.gmra.mxu0 %vm2611_vm5, %v5364_v10  ;;  %v1361_v61 = vld [vmem:[#allocation3 + $0x38] sm:$0xf]  ;;  %v5439_v41 = vor.u32 %v3824_v16, %v3380_v59  ;;  %v3666_v15 = vld [vmem:[%s6034_s1 + $0x148] sm:$0xf0]  ;;  %v948_v58 = vld [vmem:[#allocation3 + $0x34] sm:$0xf] }
 0x123   : > { %2922 = vmatmul.bf16.gmra.mxu1 %v4871_v20  ;;  %v1688_v38 = vor.u32 %v1687_v1, %v1684_v13  ;;  %v3741_v20 = vor.u32 %v3913_v52, %v3738_v40  ;;  %v5425_v62 = vor.u32 %v1064_v21, %v1061_v56  ;;  %v1826_v13 = vrot.slane %v5420_v4, 7  ;;  %v3602_v1 = vld [vmem:[%s6034_s1 + $0xc8] sm:$0xf0] }
 0x124   : > { %v1296_v31 = vpop.permute.xlu1 %1295  ;;  %3130 = vmatpush.bf16.msra.mxu1 %v3781_v11  ;;  %v1056_v52 = vsel %vm5060_vm1, %v1047_v35, %v1055_v28  ;;  %v1057_v40 = vrot.slane %v1055_v28, 4  ;;  %v3605_v29 = vor.u32 %v3879_v23, %v3602_v1  ;;  %v1418_v57 = vrot.slane %v1361_v61, 6  ;;  %v3828_v56 = vld [vmem:[#allocation2 + $0x90] sm:$0xf0]  ;;  %v1771_v61 = vld [vmem:[#allocation3 + $0x34] sm:$0xf] }
 0x125   : > { %v1689_v44 = vsel %vm4605_vm13, %v1680_v19, %v1688_v38  ;;  %3073 = vmatpush.bf16.msra.mxu0 %v3741_v20  ;;  %v1823_v19 = vrot.slane %v1769_v60, 7  ;;  %v1360_v20 = vld [vmem:[#allocation3 + $0x34] sm:$0xf]  ;;  %1173 = vst.msk [vmem:[#allocation2 + $0xa8] sm:$0xf] %vm300_vm0, %v1056_v52  ;;  %v1067_v11 = vrot.slane %v5425_v62, 4 }
 0x126   : > { %1724 = vrot.lane.b32.xlu2 %v1689_v44, %s4084_s29  ;;  %v1415_v17 = vrot.slane %v1360_v20, 6  ;;  %v3895_v44 = vld [vmem:[%s6034_s1 + $0x144] sm:$0xf]  ;;  %1341 = vst.msk [vmem:[#allocation2 + $0xa8] sm:$0xf] %vm621_vm10, %v1296_v31  ;;  %v1066_v35 = vsel %vm5060_vm1, %v1057_v40, %v5425_v62  ;;  %2966 = vmatpush.bf16.msra.mxu2 %v3605_v29 }
 0x127   : > { %v1705_v47 = vpop.permute.xlu0 %1704  ;;  %v1825_v38 = vrot.slane %v1823_v19, 4  ;;  %v1824_v63 = vsel %vm5169_vm4, %v1822_v51, %v1823_v19  ;;  %1174 = vst.msk [vmem:[#allocation2 + $0xbc] sm:$0xf] %vm300_vm0, %v1066_v35  ;;  %v3669_v33 = vor.u32 %v3895_v44, %v3666_v15  ;;  %v1072_v51 = vshll.u32 %v948_v58, 16  ;;  %v3392_v59 = vld [vmem:[#allocation2 + $0x80] sm:$0xf] }
 0x128   : > { %1751 = vst.msk [vmem:[#allocation2 + $0x98] sm:$0xf] %vm621_vm10, %v1705_v47  ;;  %v5437_v47 = vor.u32 %v3821_v48, %v3374_v45  ;;  %v1417_v42 = vrot.slane %v1415_v17, 4  ;;  %v1069_v48 = vshrl.u32 %v948_v58, 16  ;;  %v949_v45 = vld [vmem:[#allocation3 + $0x38] sm:$0xf]  ;;  %v1416_v16 = vsel %vm4522_vm9, %v1414_v12, %v1415_v17  ;;  %v1300_v35 = vpop.permute.xlu2 %1299 }
 0x129   : > { %v1827_v49 = vsel %vm5169_vm4, %v1825_v38, %v1826_v13  ;;  %1342 = vst.msk [vmem:[#allocation2 + $0xbc] sm:$0xf] %vm621_vm10, %v1298_v0  ;;  %3020 = vmatpush.bf16.msra.mxu3 %v3669_v33  ;;  %v1079_v28 = vshrl.u32 %v949_v45, 16  ;;  %v1082_v4 = vshll.u32 %v949_v45, 16  ;;  %v3911_v19 = vld [vmem:[%s6034_s1 + $0x1c4] sm:$0xf]  ;;  %v5479_v58 = vor.u32 %v3828_v56, %v3392_v59 }
 0x12a   : > { %2765 = vmatmul.bf16.gmra.mxu2 %v5400_v30  ;;  %1882 = vst.msk [vmem:[#allocation2 + $0x88] sm:$0xf] %vm300_vm0, %v1824_v63  ;;  %v1419_v21 = vsel %vm4522_vm9, %v1417_v42, %v1418_v57  ;;  %v1071_v62 = vrot.slane %v1069_v48, 5  ;;  %v1074_v1 = vrot.slane %v1072_v51, 6  ;;  %v3730_v52 = vld [vmem:[%s6034_s1 + $0x1c8] sm:$0xf0] }
 0x12b   : > { %1883 = vst.msk [vmem:[#allocation2 + $0x9c] sm:$0xf] %vm300_vm0, %v1827_v49  ;;  %v1081_v40 = vrot.slane %v1079_v28, 5  ;;  %v1084_v38 = vrot.slane %v1082_v4, 6  ;;  %v3733_v20 = vor.u32 %v3911_v19, %v3730_v52  ;;  %v5473_v44 = vld [vmem:[#allocation3 + $0x38] sm:$0xf] }
 0x12c   : > { %v1709_v60 = vpop.permute.xlu1 %1708  ;;  %v2702_v23 = vpop.f32.mrf.mxu1  ;;  %1471 = vst.msk [vmem:[#allocation2 + $0xc0] sm:$0xf] %vm300_vm0, %v1419_v21  ;;  %v1075_v29 = vor.u32 %v1074_v1, %v1071_v62  ;;  %v1828_v12 = vrot.slane %v1826_v13, 4  ;;  %v1829_v17 = vrot.slane %v1771_v61, 7  ;;  %v1420_v15 = vrot.slane %v1418_v57, 4 }
 0x12d   : > { %1753 = vst.msk [vmem:[#allocation2 + $0xc0] sm:$0xf] %vm621_vm10, %v1709_v60  ;;  %v5476_v63 = vor.u32 %v1084_v38, %v1081_v40  ;;  %3074 = vmatpush.bf16.msra.mxu0 %v3733_v20  ;;  %v1362_v13 = vld [vmem:[#allocation3 + $0x3c] sm:$0xf]  ;;  %v5493_v56 = vld [vmem:[#allocation3 + $0x40] sm:$0xf] }
 0x12e   : > { %1470 = vst.msk [vmem:[#allocation2 + $0xac] sm:$0xf] %vm300_vm0, %v1416_v16  ;;  %v1076_v49 = vsel %vm5060_vm1, %v1067_v11, %v1075_v29  ;;  %v1077_v42 = vrot.slane %v1075_v29, 4  ;;  %v1831_v33 = vrot.slane %v1829_v17, 4  ;;  %v1421_v21 = vrot.slane %v1362_v13, 6 }
 0x12f   : > { %v1707_v31 = vpop.permute.xlu0 %1706  ;;  %1175 = vst.msk [vmem:[#allocation2 + $0xd0] sm:$0xf] %vm300_vm0, %v1076_v49  ;;  %v3826_v57 = vld [vmem:[#allocation2 + $0x84] sm:$0xf]  ;;  %v3394_v59 = vld [vmem:[#allocation2 + $0x94] sm:$0xf0]  ;;  %v1830_v11 = vsel %vm5169_vm4, %v1828_v12, %v1829_v17 }
 0x130   : > { %1752 = vst.msk [vmem:[#allocation2 + $0xac] sm:$0xf] %vm621_vm10, %v1707_v31  ;;  %v1086_v31 = vsel %vm5060_vm1, %v1077_v42, %v5476_v63  ;;  %v1423_v19 = vrot.slane %v1421_v21, 4  ;;  %v1424_v16 = vrot.slane %v5493_v56, 6  ;;  %v1422_v1 = vsel %vm4522_vm9, %v1420_v15, %v1421_v21  ;;  %v3877_v52 = vld [vmem:[%s6034_s1 + $0xb4] sm:$0xf] }
 0x131   : > { %1343 = vst.msk [vmem:[#allocation2 + $0xd0] sm:$0xf] %vm621_vm10, %v1300_v35  ;;  %v3400_v28 = vld [vmem:[#allocation2 + $0x88] sm:$0xf]  ;;  %v3594_v40 = vld [vmem:[%s6034_s1 + $0xb8] sm:$0xf0]  ;;  %v5527_v35 = vor.u32 %v3826_v57, %v3394_v59 }
 0x132   : > { %2819 = vmatmul.bf16.gmra.mxu3 %v5437_v47  ;;  %3792 = vmatmul.msk.bf16.gmra.mxu0 %vm2611_vm5, %v5439_v41  ;;  %1176 = vst.msk [vmem:[#allocation2 + $0xe4] sm:$0xf] %vm300_vm0, %v1086_v31  ;;  %v3829_v61 = vld [vmem:[#allocation2 + $0x98] sm:$0xf0]  ;;  %v3597_v29 = vor.u32 %v3877_v52, %v3594_v40  ;;  %v950_v17 = vld [vmem:[#allocation3 + $0x3c] sm:$0xf] }
 0x133   : > { %2927 = vmatmul.bf16.gmra.mxu1 %v4974_v36  ;;  %v2673_v0 = vpop.f32.mrf.mxu2  ;;  %v1832_v36 = vrot.slane %v5473_v44, 7  ;;  %1884 = vst.msk [vmem:[#allocation2 + $0xb0] sm:$0xf] %vm300_vm0, %v1830_v11  ;;  %v3893_v44 = vld [vmem:[%s6034_s1 + $0x134] sm:$0xf]  ;;  %v5530_v42 = vor.u32 %v3829_v61, %v3400_v28  ;;  %v1092_v13 = vshll.u32 %v950_v17, 16 }
 0x134   : > { %v2674_v51 = vadd.f32 %v2673_v0, %v5418_v37  ;;  %v1425_v0 = vsel %vm4522_vm9, %v1423_v19, %v1424_v16  ;;  %v5521_v12 = vpop.f32.mrf.mxu1  ;;  %1472 = vst.msk [vmem:[#allocation2 + $0xd4] sm:$0xf] %vm300_vm0, %v1422_v1  ;;  %2967 = vmatpush.bf16.msra.mxu2 %v3597_v29  ;;  %v951_v49 = vld [vmem:[#allocation3 + $0x40] sm:$0xf]  ;;  %v1087_v28 = vrot.slane %v5476_v63, 4 }
 0x135   : > { %v1833_v4 = vsel %vm5169_vm4, %v1831_v33, %v1832_v36  ;;  %1473 = vst.msk [vmem:[#allocation2 + $0xe8] sm:$0xf] %vm300_vm0, %v1425_v0  ;;  %v1089_v33 = vshrl.u32 %v950_v17, 16  ;;  %v1102_v21 = vshll.u32 %v951_v49, 16  ;;  %v1834_v57 = vrot.slane %v1832_v36, 4  ;;  %v1713_v19 = vpop.permute.xlu2 %1712 }
 0x136   : > { %1885 = vst.msk [vmem:[#allocation2 + $0xc4] sm:$0xf] %vm300_vm0, %v1833_v4  ;;  %v1094_v31 = vrot.slane %v1092_v13, 6  ;;  %v3412_v4 = vld [vmem:[#allocation2 + $0xa8] sm:$0xf] }
 0x137   : > { %v2648_v48 = vpop.f32.mrf.mxu0  ;;  %v1302_v45 = vpop.permute.xlu0 %1301  ;;  %v1091_v59 = vrot.slane %v1089_v33, 5  ;;  %v5537_v1 = vld [vmem:[#allocation3 + $0x40] sm:$0xf]  ;;  %v3833_v40 = vld [vmem:[#allocation2 + $0xb8] sm:$0xf0] }
 0x138   : > { %v2649_v60 = vadd.f32 %v2648_v48, %v5418_v37  ;;  %1344 = vst.msk [vmem:[#allocation2 + $0xe4] sm:$0xf] %vm621_vm10, %v1302_v45  ;;  %v1099_v48 = vshrl.u32 %v951_v49, 16  ;;  %v1711_v45 = vpop.permute.xlu1 %1710  ;;  %v1838_v61 = vrot.slane %v5537_v1, 7  ;;  %v5558_v49 = vor.u32 %v3833_v40, %v3412_v4  ;;  %v3921_v13 = vld [vmem:[%s6034_s1 + $0x214] sm:$0xf] }
 0x139   : > { %1754 = vst.msk [vmem:[#allocation2 + $0xd4] sm:$0xf] %vm621_vm10, %v1711_v45  ;;  %v1095_v36 = vor.u32 %v1094_v31, %v1091_v59  ;;  %v1364_v59 = vld [vmem:[#allocation3 + $0x44] sm:$0xf]  ;;  %v1426_v31 = vrot.slane %v1424_v16, 4 }
 0x13a   : > { %2770 = vmatmul.bf16.gmra.mxu2 %v5479_v58  ;;  %v2727_v62 = vpop.f32.mrf.mxu3  ;;  %v5509_v38 = vadd.f32 %v2702_v23, %v2649_v60  ;;  %v3658_v23 = vld [vmem:[%s6034_s1 + $0x138] sm:$0xf0]  ;;  %v1101_v11 = vrot.slane %v1099_v48, 5  ;;  %1755 = vst.msk [vmem:[#allocation2 + $0xe8] sm:$0xf] %vm621_vm10, %v1713_v19  ;;  %v1427_v4 = vrot.slane %v1364_v59, 6 }
 0x13b   : > { %v5511_v20 = vadd.f32 %v2727_v62, %v2674_v51  ;;  %v3661_v15 = vor.u32 %v3893_v44, %v3658_v23  ;;  %v1773_v60 = vld [vmem:[#allocation3 + $0x3c] sm:$0xf]  ;;  %v1104_v62 = vrot.slane %v1102_v21, 6  ;;  %v3909_v23 = vld [vmem:[%s6034_s1 + $0x1b4] sm:$0xf]  ;;  %v1097_v17 = vrot.slane %v1095_v36, 4  ;;  %v5576_v19 = vpop.f32.mrf.mxu2 }
 0x13c   : > { %v1835_v52 = vrot.slane %v1773_v60, 7  ;;  %v3770_v48 = vld [vmem:[%s6034_s1 + $0x218] sm:$0xf0]  ;;  %v2707_v45 = vpop.f32.mrf.mxu1  ;;  %v5580_v1 = vld [vmem:[#allocation3 + $0x48] sm:$0xf]  ;;  %v1428_v56 = vsel %vm4522_vm9, %v1426_v31, %v1427_v4  ;;  %v1429_v16 = vrot.slane %v1427_v4, 4 }
 0x13d   : > { %3021 = vmatpush.bf16.msra.mxu3 %v3661_v15  ;;  %v5545_v63 = vor.u32 %v1104_v62, %v1101_v11  ;;  %v1096_v15 = vsel %vm5060_vm1, %v1087_v28, %v1095_v36  ;;  %v3414_v40 = vld [vmem:[#allocation2 + $0xbc] sm:$0xf0]  ;;  %v3420_v36 = vld [vmem:[#allocation2 + $0xb0] sm:$0xf]  ;;  %1474 = vst.msk [vmem:[#allocation2 + $0xfc] sm:$0xf] %vm300_vm0, %v1428_v56 }
 0x13e   : > { %v1836_v29 = vsel %vm5169_vm4, %v1834_v57, %v1835_v52  ;;  %v1837_v44 = vrot.slane %v1835_v52, 4  ;;  %1177 = vst.msk [vmem:[#allocation2 + $0xf8] sm:$0xf] %vm300_vm0, %v1096_v15  ;;  %v3773_v57 = vor.u32 %v3921_v13, %v3770_v48  ;;  %v3831_v52 = vld [vmem:[#allocation2 + $0xac] sm:$0xf]  ;;  %v1840_v4 = vrot.slane %v1838_v61, 4 }
 0x13f   : > { %v5533_v51 = vpop.f32.mrf.mxu0  ;;  %v1304_v0 = vpop.permute.xlu0 %1303  ;;  %1886 = vst.msk [vmem:[#allocation2 + $0xd8] sm:$0xf] %vm300_vm0, %v1836_v29  ;;  %v1106_v21 = vsel %vm5060_vm1, %v1097_v17, %v5545_v63  ;;  %v952_v29 = vld [vmem:[#allocation3 + $0x44] sm:$0xf]  ;;  %v3834_v15 = vld [vmem:[#allocation2 + $0xc0] sm:$0xf0] }
 0x140   : > { %1345 = vst.msk [vmem:[#allocation2 + $0xf8] sm:$0xf] %vm621_vm10, %v1304_v0  ;;  %v1839_v60 = vsel %vm5169_vm4, %v1837_v44, %v1838_v61  ;;  %v1306_v28 = vpop.permute.xlu1 %1305  ;;  %3131 = vmatpush.bf16.msra.mxu1 %v3773_v57  ;;  %v6037_v0 = vrot.slane %v5580_v1, 6  ;;  %v3875_v44 = vld [vmem:[%s6034_s1 + $0xa4] sm:$0xf]  ;;  %v1107_v31 = vrot.slane %v5545_v63, 4  ;;  %v5612_v56 = vor.u32 %v3834_v15, %v3420_v36 }
 0x141   : > { %1178 = vst.msk [vmem:[#allocation2 + $0x10c] sm:$0xf] %vm300_vm0, %v1106_v21  ;;  %v3891_v13 = vld [vmem:[%s6034_s1 + $0x124] sm:$0xf]  ;;  %v3650_v48 = vld [vmem:[%s6034_s1 + $0x128] sm:$0xf0] }
 0x142   : > { %2824 = vmatmul.bf16.gmra.mxu3 %v5527_v35  ;;  %3793 = vmatmul.msk.bf16.gmra.mxu0 %vm2611_vm5, %v5530_v42  ;;  %1346 = vst.msk [vmem:[#allocation2 + $0x10c] sm:$0xf] %vm621_vm10, %v1306_v28  ;;  %v3653_v21 = vor.u32 %v3891_v13, %v3650_v48  ;;  %v953_v57 = vld [vmem:[#allocation3 + $0x48] sm:$0xf]  ;;  %v5607_v59 = vpop.f32.mrf.mxu3  ;;  %v3838_v36 = vld [vmem:[#allocation2 + $0xe0] sm:$0xf0] }
 0x143   : > { %2932 = vmatmul.bf16.gmra.mxu1 %v5056_v32  ;;  %v3722_v32 = vld [vmem:[%s6034_s1 + $0x1b8] sm:$0xf0]  ;;  %1887 = vst.msk [vmem:[#allocation2 + $0xec] sm:$0xf] %vm300_vm0, %v1839_v60  ;;  %v1112_v60 = vshll.u32 %v952_v29, 16  ;;  %v1122_v28 = vshll.u32 %v953_v57, 16 }
 0x144   : > { %v3725_v33 = vor.u32 %v3909_v23, %v3722_v32  ;;  %v3586_v23 = vld [vmem:[%s6034_s1 + $0xa8] sm:$0xf0]  ;;  %v1431_v32 = vsel %vm4522_vm9, %v1429_v16, %v6037_v0  ;;  %3022 = vmatpush.bf16.msra.mxu3 %v3653_v21 }
 0x145   : > { %1475 = vst.msk [vmem:[#allocation2 + $0x110] sm:$0xf] %vm300_vm0, %v1431_v32  ;;  %v1776_v32 = vld [vmem:[#allocation3 + $0x48] sm:$0xf]  ;;  %v1124_v0 = vrot.slane %v1122_v28, 6 }
 0x146   : > { %3075 = vmatpush.bf16.msra.mxu0 %v3725_v33  ;;  %v3589_v33 = vor.u32 %v3875_v44, %v3586_v23  ;;  %v1114_v44 = vrot.slane %v1112_v60, 6  ;;  %v1775_v23 = vld [vmem:[#allocation3 + $0x44] sm:$0xf]  ;;  %v1844_v50 = vrot.slane %v1776_v32, 7  ;;  %v1366_v28 = vld [vmem:[#allocation3 + $0x4c] sm:$0xf] }
 0x147   : > { %v2653_v11 = vpop.f32.mrf.mxu0  ;;  %v5644_v32 = vld [vmem:[#allocation3 + $0x50] sm:$0xf] }
 0x148   : > { %v2654_v62 = vadd.f32 %v2653_v11, %v5418_v37  ;;  %2968 = vmatpush.bf16.msra.mxu2 %v3589_v33  ;;  %v1119_v11 = vshrl.u32 %v953_v57, 16  ;;  %v1841_v33 = vrot.slane %v1775_v23, 7 }
 0x149   : > { %v1717_v60 = vpop.permute.xlu0 %1716 }
 0x14a   : > { %2775 = vmatmul.bf16.gmra.mxu2 %v5558_v49  ;;  %v5594_v17 = vadd.f32 %v2707_v45, %v2654_v62  ;;  %v1109_v45 = vshrl.u32 %v952_v29, 16  ;;  %v5610_v62 = vor.u32 %v3831_v52, %v3414_v40  ;;  %v1715_v29 = vpop.permute.xlu2 %1714  ;;  %v1121_v48 = vrot.slane %v1119_v11, 5  ;;  %v5617_v52 = vpop.f32.mrf.mxu1  ;;  %v3432_v40 = vld [vmem:[#allocation2 + $0xd0] sm:$0xf]  ;;  %1757 = vst.msk [vmem:[#allocation2 + $0x110] sm:$0xf] %vm621_vm10, %v1717_v60 }
 0x14b   : > { %1756 = vst.msk [vmem:[#allocation2 + $0xfc] sm:$0xf] %vm621_vm10, %v1715_v29  ;;  %v1842_v21 = vsel %vm5169_vm4, %v1840_v4, %v1841_v33  ;;  %v1433_v29 = vrot.slane %v1366_v28, 6  ;;  %v5652_v60 = vor.u32 %v3838_v36, %v3432_v40  ;;  %v955_v36 = vld [vmem:[#allocation3 + $0x50] sm:$0x3] }
 0x14c   : > { %v1111_v16 = vrot.slane %v1109_v45, 5  ;;  %v5619_v15 = vor.u32 %v1124_v0, %v1121_v48  ;;  %v1843_v45 = vrot.slane %v1841_v33, 4  ;;  %1888 = vst.msk [vmem:[#allocation2 + $0x100] sm:$0xf] %vm300_vm0, %v1842_v21  ;;  %v6039_v33 = vrot.slane %v5644_v32, 6 }
 0x14d   : > { %v2678_v63 = vpop.f32.mrf.mxu2  ;;  %v1777_v21 = vld [vmem:[#allocation3 + $0x4c] sm:$0xf]  ;;  %6066 = vst [vmem:[#allocation9_spill] sm:$0xff] %v5652_v60 }
 0x14e   : > { %v1115_v61 = vor.u32 %v1114_v44, %v1111_v16  ;;  %v2679_v0 = vadd.f32 %v2678_v63, %v5418_v37  ;;  %v1845_v4 = vsel %vm5169_vm4, %v1843_v45, %v1844_v50  ;;  %v3907_v16 = vld [vmem:[%s6034_s1 + $0x1a4] sm:$0xf]  ;;  %v6064_v63 = vrot.slane %v5580_v1, 6 }
 0x14f   : > { %v5614_v13 = vpop.f32.mrf.mxu0  ;;  %1889 = vst.msk [vmem:[#allocation2 + $0x114] sm:$0xf] %vm300_vm0, %v1845_v4  ;;  %v1847_v28 = vrot.slane %v1777_v21, 7  ;;  %v5667_v21 = vld [vmem:[#allocation3 + $0x50] sm:$0xf] }
 0x150   : > { %v1116_v57 = vsel %vm5060_vm1, %v1107_v31, %v1115_v61  ;;  %v1117_v11 = vrot.slane %v1115_v61, 4  ;;  %v3714_v31 = vld [vmem:[%s6034_s1 + $0x1a8] sm:$0xf0]  ;;  %v1432_v61 = vrot.slane %v6064_v63, 4  ;;  %v3434_v63 = vld [vmem:[#allocation2 + $0xe4] sm:$0xf0] }
 0x151   : > { %1179 = vst.msk [vmem:[#allocation2 + $0x120] sm:$0xf] %vm300_vm0, %v1116_v57  ;;  %v3717_v23 = vor.u32 %v3907_v16, %v3714_v31  ;;  %v1308_v57 = vpop.permute.xlu1 %1307 }
 0x152   : > { %2829 = vmatmul.bf16.gmra.mxu3 %v5610_v62  ;;  %3794 = vmatmul.msk.bf16.gmra.mxu0 %vm2611_vm5, %v5612_v56  ;;  %v1126_v44 = vsel %vm5060_vm1, %v1117_v11, %v5619_v15  ;;  %v954_v11 = vld [vmem:[#allocation3 + $0x4c] sm:$0xf]  ;;  %1347 = vst.msk [vmem:[#allocation2 + $0x120] sm:$0xf] %vm621_vm10, %v1308_v57  ;;  %v1434_v31 = vsel %vm4522_vm9, %v1432_v61, %v1433_v29 }
 0x153   : > { %2937 = vmatmul.bf16.gmra.mxu1 %v5200_v8  ;;  %v1846_v8 = vrot.slane %v1844_v50, 4  ;;  %1180 = vst.msk [vmem:[#allocation2 + $0x134] sm:$0xf] %vm300_vm0, %v1126_v44  ;;  %3076 = vmatpush.bf16.msra.mxu0 %v3717_v23  ;;  %v1435_v50 = vrot.slane %v1433_v29, 4  ;;  %v1129_v1 = vshrl.u32 %v954_v11, 16  ;;  %v1132_v44 = vshll.u32 %v954_v11, 16 }
 0x154   : > { %1476 = vst.msk [vmem:[#allocation2 + $0x124] sm:$0xf] %vm300_vm0, %v1434_v31  ;;  %v3873_v11 = vld [vmem:[%s6034_s1 + $0x94] sm:$0xf] }
 0x155   : > { %v2732_v48 = vpop.f32.mrf.mxu3  ;;  %v1437_v40 = vsel %vm4522_vm9, %v1435_v50, %v6039_v33  ;;  %v1848_v4 = vsel %vm5169_vm4, %v1846_v8, %v1847_v28  ;;  %v1131_v29 = vrot.slane %v1129_v1, 5  ;;  %v1134_v61 = vrot.slane %v1132_v44, 6  ;;  %v3440_v50 = vld [vmem:[#allocation2 + $0xd8] sm:$0xf]  ;;  %v3578_v8 = vld [vmem:[%s6034_s1 + $0x98] sm:$0xf0]  ;;  %v5679_v44 = vpop.f32.mrf.mxu2 }
 0x156   : > { %v5650_v45 = vadd.f32 %v2732_v48, %v2679_v0  ;;  %v3836_v48 = vld [vmem:[#allocation2 + $0xd4] sm:$0xf]  ;;  %1477 = vst.msk [vmem:[#allocation2 + $0x138] sm:$0xf] %vm300_vm0, %v1437_v40  ;;  %v3581_v31 = vor.u32 %v3873_v11, %v3578_v8  ;;  %v1139_v1 = vshrl.u32 %v955_v36, 16  ;;  %v1850_v33 = vrot.slane %v5667_v21, 7  ;;  %v1310_v46 = vpop.permute.xlu2 %1309  ;;  %v1719_v8 = vpop.permute.xlu0 %1718 }
 0x157   : > { %v2658_v16 = vpop.f32.mrf.mxu0  ;;  %v2712_v23 = vpop.f32.mrf.mxu1  ;;  %v1135_v40 = vor.u32 %v1134_v61, %v1131_v29  ;;  %1890 = vst.msk [vmem:[#allocation2 + $0x128] sm:$0xf] %vm300_vm0, %v1848_v4  ;;  %v5685_v7 = vor.u32 %v3836_v48, %v3434_v63  ;;  %v3642_v4 = vld [vmem:[%s6034_s1 + $0x118] sm:$0xf0]  ;;  %v3452_v21 = vld [vmem:[#allocation2 + $0xf8] sm:$0xf] }
 0x158   : > { %6065 = vst [vmem:[#allocation8_spill] sm:$0xff] %v5650_v45  ;;  %v2659_v0 = vadd.f32 %v2658_v16, %v5418_v37  ;;  %v3839_v16 = vld [vmem:[#allocation2 + $0xe8] sm:$0xf0]  ;;  %2969 = vmatpush.bf16.msra.mxu2 %v3581_v31  ;;  %v1127_v45 = vrot.slane %v5619_v15, 4  ;;  %v3844_v27 = vld [vmem:[#allocation2 + $0x110] sm:$0xf0] }
 0x159   : > { %v5687_v11 = vor.u32 %v3839_v16, %v3440_v50  ;;  %1348 = vst.msk [vmem:[#allocation2 + $0x134] sm:$0xf] %vm621_vm10, %v1310_v46  ;;  %v1137_v48 = vrot.slane %v1135_v40, 4  ;;  %v1368_v50 = vld [vmem:[#allocation3 + $0x54] sm:$0xf] }
 0x15a   : > { %v5669_v57 = vadd.f32 %v2712_v23, %v2659_v0  ;;  %2780 = vmatmul.bf16.gmra.mxu2 %v5652_v60  ;;  %v1142_v0 = vshll.u32 %v955_v36, 16  ;;  %v1849_v23 = vrot.slane %v1847_v28, 4  ;;  %v1141_v60 = vrot.slane %v1139_v1, 5  ;;  %v3889_v36 = vld [vmem:[%s6034_s1 + $0x114] sm:$0xf] }
 0x15b   : > { %v1136_v15 = vsel %vm5060_vm1, %v1127_v45, %v1135_v40  ;;  %v3645_v29 = vor.u32 %v3889_v36, %v3642_v4  ;;  %v3843_v45 = vld [vmem:[#allocation2 + $0x108] sm:$0xf0]  ;;  %v1439_v31 = vrot.slane %v1368_v50, 6  ;;  %v1779_v40 = vld [vmem:[#allocation3 + $0x54] sm:$0xf] }
 0x15c   : > { %v1851_v28 = vsel %vm5169_vm4, %v1849_v23, %v1850_v33  ;;  %v1144_v63 = vrot.slane %v1142_v0, 6  ;;  %1181 = vst.msk [vmem:[#allocation2 + $0x148] sm:$0xf] %vm300_vm0, %v1136_v15  ;;  %v1853_v1 = vrot.slane %v1779_v40, 7  ;;  %v6068_v23 = vrot.slane %v5644_v32, 6 }
 0x15d   : > { %v5682_v6 = vpop.f32.mrf.mxu3  ;;  %1891 = vst.msk [vmem:[#allocation2 + $0x13c] sm:$0xf] %vm300_vm0, %v1851_v28  ;;  %3023 = vmatpush.bf16.msra.mxu3 %v3645_v29  ;;  %v1441_v28 = vrot.slane %v1439_v31, 4  ;;  %v5715_v4 = vor.u32 %v3843_v45, %v3452_v21  ;;  %v1780_v50 = vld [vmem:[#allocation3 + $0x58] sm:$0x7] }
 0x15e   : > { %6067 = vst [vmem:[#allocation10_spill] sm:$0xff] %v5682_v6  ;;  %v1145_v61 = vor.u32 %v1144_v63, %v1141_v60  ;;  %v1369_v60 = vld [vmem:[#allocation3 + $0x58] sm:$0x3]  ;;  %v1438_v36 = vrot.slane %v6068_v23, 4  ;;  %v3841_v40 = vld [vmem:[#allocation2 + $0xfc] sm:$0xf] }
 0x15f   : > { %v5702_v46 = vpop.f32.mrf.mxu0  ;;  %1758 = vst.msk [vmem:[#allocation2 + $0x124] sm:$0xf] %vm621_vm10, %v1719_v8  ;;  %v1721_v15 = vpop.permute.xlu1 %1720  ;;  %v1442_v21 = vrot.slane %v1369_v60, 6  ;;  %v1852_v8 = vrot.slane %v1850_v33, 4  ;;  %v1856_v6 = vrot.slane %v1780_v50, 7 }
 0x160   : > { %v1146_v16 = vsel %vm5060_vm1, %v1137_v48, %v1145_v61  ;;  %v3706_v48 = vld [vmem:[%s6034_s1 + $0x198] sm:$0xf0]  ;;  %v5723_v63 = vpop.f32.mrf.mxu1  ;;  %1759 = vst.msk [vmem:[#allocation2 + $0x138] sm:$0xf] %vm621_vm10, %v1721_v15  ;;  %v1440_v61 = vsel %vm4522_vm9, %v1438_v36, %v1439_v31  ;;  %v3919_v31 = vld [vmem:[%s6034_s1 + $0x204] sm:$0xf] }
 0x161   : > { %1182 = vst.msk [vmem:[#allocation2 + $0x15c] sm:$0xf] %vm300_vm0, %v1146_v16  ;;  %v3709_v32 = vor.u32 %v3905_v39, %v3706_v48  ;;  %v1855_v16 = vrot.slane %v1853_v1, 4  ;;  %v1443_v23 = vsel %vm4522_vm9, %v1441_v28, %v1442_v21  ;;  %v3762_v33 = vld [vmem:[%s6034_s1 + $0x208] sm:$0xf0]  ;;  %v1854_v60 = vsel %vm5169_vm4, %v1852_v8, %v1853_v1 }
 0x162   : > { %2834 = vmatmul.bf16.gmra.mxu3 %v5685_v7  ;;  %3795 = vmatmul.msk.bf16.gmra.mxu0 %vm2611_vm5, %v5687_v11  ;;  %1478 = vst.msk [vmem:[#allocation2 + $0x14c] sm:$0xf] %vm300_vm0, %v1440_v61  ;;  %v3765_v15 = vor.u32 %v3919_v31, %v3762_v33  ;;  %v1312_v61 = vpop.permute.xlu2 %1311  ;;  %v3848_v31 = vld [vmem:[#allocation2 + $0x130] sm:$0xf0] }
 0x163   : > { %2942 = vmatmul.bf16.gmra.mxu1 %v4712_v24  ;;  %3077 = vmatpush.bf16.msra.mxu0 %v3709_v32  ;;  %1479 = vst.msk [vmem:[#allocation2 + $0x160] sm:$0xf] %vm300_vm0, %v1443_v23  ;;  %v1857_v39 = vsel %vm5169_vm4, %v1855_v16, %v1856_v6  ;;  %v3871_v6 = vld [vmem:[%s6034_s1 + $0x84] sm:$0xf]  ;;  %v3472_v23 = vld [vmem:[#allocation2 + $0x120] sm:$0xf] }
 0x164   : > { %1892 = vst.msk [vmem:[#allocation2 + $0x150] sm:$0xf] %vm300_vm0, %v1854_v60  ;;  %3132 = vmatpush.bf16.msra.mxu1 %v3765_v15  ;;  %v3573_v50 = vor.u32 %v3871_v6, %v3570_v5  ;;  %v3887_v16 = vld [vmem:[%s6034_s1 + $0x104] sm:$0xf]  ;;  %v3480_v15 = vld [vmem:[#allocation2 + $0x128] sm:$0xf] }
 0x165   : > { %v2683_v0 = vpop.f32.mrf.mxu2  ;;  %v2737_v29 = vpop.f32.mrf.mxu3  ;;  %1893 = vst.msk [vmem:[#allocation2 + $0x164] sm:$0xf] %vm300_vm0, %v1857_v39  ;;  %v3698_v39 = vld [vmem:[%s6034_s1 + $0x188] sm:$0xf0]  ;;  %v3849_v6 = vld [vmem:[#allocation2 + $0x138] sm:$0xf0] }
 0x166   : > { %v2684_v24 = vadd.f32 %v2683_v0, %v5418_v37  ;;  %v3460_v0 = vld [vmem:[#allocation2 + $0x100] sm:$0xf]  ;;  %v1314_v28 = vpop.permute.xlu0 %1313  ;;  %1349 = vst.msk [vmem:[#allocation2 + $0x148] sm:$0xf] %vm621_vm10, %v1312_v61  ;;  %2970 = vmatpush.bf16.msra.mxu2 %v3573_v50 }
 0x167   : > { %v2663_v36 = vpop.f32.mrf.mxu0  ;;  %1350 = vst.msk [vmem:[#allocation2 + $0x15c] sm:$0xf] %vm621_vm10, %v1314_v28  ;;  %v5753_v32 = vor.u32 %v3844_v27, %v3460_v0  ;;  %v3474_v61 = vld [vmem:[#allocation2 + $0x134] sm:$0xf0] }
 0x168   : > { %v5728_v45 = vadd.f32 %v2737_v29, %v2684_v24  ;;  %v3454_v24 = vld [vmem:[#allocation2 + $0x10c] sm:$0xf0]  ;;  %v2664_v29 = vadd.f32 %v2663_v36, %v5418_v37  ;;  %v5778_v36 = vor.u32 %v3848_v31, %v3472_v23 }
 0x169   : > { %v5751_v1 = vor.u32 %v3841_v40, %v3454_v24  ;;  %v3634_v40 = vld [vmem:[%s6034_s1 + $0x108] sm:$0xf0] }
 0x16a   : > { %2785 = vmatmul.bf16.gmra.mxu2 %v5715_v4  ;;  %v3637_v0 = vor.u32 %v3887_v16, %v3634_v40  ;;  %6069 = vst [vmem:[#allocation11_spill] sm:$0xff] %v5778_v36  ;;  %v5794_v40 = vor.u32 %v3849_v6, %v3480_v15 }
 0x16c   : > { %3024 = vmatpush.bf16.msra.mxu3 %v3637_v0  ;;  %6071 = vst [vmem:[#allocation13_spill] sm:$0xff] %v5794_v40 }
 0x16d   : > { %v5747_v48 = vpop.f32.mrf.mxu2  ;;  %v5774_v33 = vpop.f32.mrf.mxu3 }
 0x16e   : > { %v3853_v15 = vld [vmem:[#allocation2 + $0x158] sm:$0xf0] }
 0x16f   : > { %v2717_v21 = vpop.f32.mrf.mxu1  ;;  %v5776_v60 = vpop.f32.mrf.mxu0 }
 0x170   : > { %v5762_v8 = vadd.f32 %v2717_v21, %v2664_v29  ;;  %v3846_v29 = vld [vmem:[#allocation2 + $0x124] sm:$0xf] }
 0x171   : > { %v5792_v16 = vor.u32 %v3846_v29, %v3474_v61 }
 0x172   : > { %2839 = vmatmul.bf16.gmra.mxu3 %v5751_v1  ;;  %3796 = vmatmul.msk.bf16.gmra.mxu0 %vm2611_vm5, %v5753_v32 }
 0x173   : > { %2947 = vmatmul.bf16.gmra.mxu1 %v4873_v26  ;;  %v3903_v26 = vld [vmem:[%s6034_s1 + $0x184] sm:$0xf] }
 0x174   : > { %v3701_v5 = vor.u32 %v3903_v26, %v3698_v39 }
 0x175   : > { %v2688_v24 = vpop.f32.mrf.mxu2 }
 0x176   : > { %v2689_v28 = vadd.f32 %v2688_v24, %v5418_v37  ;;  %3078 = vmatpush.bf16.msra.mxu0 %v3701_v5 }
 0x177   : > { %v5780_v27 = vpop.f32.mrf.mxu1 }
 0x17a   : > { %2790 = vmatmul.bf16.gmra.mxu2 %v5778_v36 }
 0x17d   : > { %v2742_v21 = vpop.f32.mrf.mxu3  ;;  %v2690_v24 = vpop.f32.mrf.mxu2 }
 0x17e   : > { %v5790_v50 = vadd.f32 %v2742_v21, %v2689_v28  ;;  %v3492_v28 = vld [vmem:[#allocation2 + $0x148] sm:$0xf]  ;;  %v2691_v39 = vadd.f32 %v2690_v24, %v5418_v37  ;;  %v3854_v24 = vld [vmem:[#allocation2 + $0x160] sm:$0xf0] }
 0x17f   : > { %v2722_v0 = vpop.f32.mrf.mxu1  ;;  %v2668_v23 = vpop.f32.mrf.mxu0  ;;  %v5808_v5 = vor.u32 %v3853_v15, %v3492_v28 }
 0x180   : > { %6070 = vst [vmem:[#allocation12_spill] sm:$0xff] %v5790_v50  ;;  %v2669_v31 = vadd.f32 %v2668_v23, %v5418_v37  ;;  %v1725_v36 = vpop.permute.xlu2 %1724  ;;  %v1723_v61 = vpop.permute.xlu1 %1722 }
 0x181   : > { %1761 = vst.msk [vmem:[#allocation2 + $0x160] sm:$0xf] %vm621_vm10, %v1725_v36 }
 0x182   : > { %2844 = vmatmul.bf16.gmra.mxu3 %v5792_v16  ;;  %3797 = vmatmul.msk.bf16.gmra.mxu0 %vm2611_vm5, %v5794_v40  ;;  %v5800_v26 = vadd.f32 %v2722_v0, %v2669_v31  ;;  %1760 = vst.msk [vmem:[#allocation2 + $0x14c] sm:$0xf] %vm621_vm10, %v1723_v61  ;;  %v3500_v31 = vld [vmem:[#allocation2 + $0x150] sm:$0xf] }
 0x183   : > { %2952 = vmatmul.bf16.gmra.mxu1 %v5022_v18 }
 0x185   : > { %v2744_v29 = vpop.f32.mrf.mxu3 }
 0x186   : > { %v5805_v6 = vadd.f32 %v2744_v29, %v2691_v39  ;;  %v5816_v29 = vor.u32 %v3854_v24, %v3500_v31 }
 0x187   : > { %v2670_v21 = vpop.f32.mrf.mxu0  ;;  %v2724_v23 = vpop.f32.mrf.mxu1 }
 0x188   : > { %v2671_v0 = vadd.f32 %v2670_v21, %v5418_v37  ;;  %v3494_v36 = vld [vmem:[#allocation2 + $0x15c] sm:$0xf0]  ;;  %6073 = vst [vmem:[#allocation15_spill] sm:$0xff] %v5816_v29 }
 0x189   : > { %v3851_v40 = vld [vmem:[#allocation2 + $0x14c] sm:$0xf] }
 0x18a   : > { %v5811_v18 = vadd.f32 %v2724_v23, %v2671_v0  ;;  %2795 = vmatmul.bf16.gmra.mxu2 %v5808_v5  ;;  %v5814_v39 = vor.u32 %v3851_v40, %v3494_v36  ;;  %v2651_v40 = vadd.f32 %v5533_v51, %v5418_v37 }
 0x18c   : > { %6072 = vst [vmem:[#allocation14_spill] sm:$0xff] %v5814_v39 }
 0x18d   : > { %v2756_v50 = vpop.f32.mrf.mxu2 }
 0x18e   : > { %v2757_v61 = vadd.f32 %v2756_v50, %v5509_v38 }
 0x18f   : > { %v2864_v28 = vpop.f32.mrf.mxu0 }
 0x190   : > { %v5818_v15 = vpop.f32.mrf.mxu1 }
 0x192   : > { %2849 = vmatmul.bf16.gmra.mxu3 %v5814_v39  ;;  %3798 = vmatmul.msk.bf16.gmra.mxu0 %vm2611_vm5, %v5816_v29 }
 0x193   : > { %2957 = vmatmul.bf16.gmra.mxu1 %v5087_v43  ;;  %v2705_v43 = vadd.f32 %v5521_v12, %v2651_v40 }
 0x195   : > { %v2758_v21 = vpop.f32.mrf.mxu2  ;;  %v2810_v23 = vpop.f32.mrf.mxu3 }
 0x196   : > { %v2811_v0 = vadd.f32 %v2810_v23, %v2757_v61  ;;  %v2759_v38 = vadd.f32 %v2758_v21, %v2705_v43  ;;  %v2656_v21 = vadd.f32 %v5614_v13, %v5418_v37 }
 0x197   : > { %v2866_v36 = vpop.f32.mrf.mxu0 }
 0x198   : > { %v2865_v31 = vadd.f32 %v2864_v28, %v2811_v0  ;;  %v5833_v24 = vpop.f32.mrf.mxu1 }
 0x19a   : > { %3179 = vst [vmem:[%s5831_s26] sm:$0xff] %v2865_v31  ;;  %2971 = vmatmul.bf16.vlgmr.msra.gmra.mxu2 %v4708_v14 }
 0x19d   : > { %v2761_v50 = vpop.f32.mrf.mxu2  ;;  %v2812_v51 = vpop.f32.mrf.mxu3 }
 0x19e   : > { %v2813_v61 = vadd.f32 %v2812_v51, %v2759_v38  ;;  %v2762_v12 = vadd.f32 %v2761_v50, %v5594_v17  ;;  %v2661_v51 = vadd.f32 %v5702_v46, %v5418_v37 }
 0x19f   : > { %v2869_v23 = vpop.f32.mrf.mxu0 }
 0x1a0   : > { %v2867_v29 = vadd.f32 %v2866_v36, %v2813_v61  ;;  %v5838_v39 = vpop.f32.mrf.mxu1 }
 0x1a2   : > { %3181 = vst [vmem:[%s5831_s26 + $0x10] sm:$0xff] %v2867_v29  ;;  %3025 = vmatmul.bf16.vlgmr.msra.gmra.mxu3 %v5247_v3  ;;  %3079 = vmatmul.bf16.vlgmr.msra.gmra.mxu0 %v5286_v55  ;;  %v2710_v3 = vadd.f32 %v5617_v52, %v2656_v21 }
 0x1a3   : > { %3799 = vmatmul.msk.bf16.vlgmr.msra.gmra.mxu1 %vm2611_vm5, %v5270_v25 }
 0x1a5   : > { %v2763_v14 = vpop.f32.mrf.mxu2  ;;  %v2815_v28 = vpop.f32.mrf.mxu3 }
 0x1a6   : > { %v2816_v40 = vadd.f32 %v2815_v28, %v2762_v12  ;;  %v2764_v55 = vadd.f32 %v2763_v14, %v2710_v3 }
 0x1a7   : > { %v2871_v0 = vpop.f32.mrf.mxu0 }
 0x1a8   : > { %v2870_v36 = vadd.f32 %v2869_v23, %v2816_v40  ;;  %v5848_v31 = vpop.f32.mrf.mxu1 }
 0x1aa   : > { %3183 = vst [vmem:[%s5831_s26 + $0x20] sm:$0xff] %v2870_v36  ;;  %2976 = vmatmul.bf16.gmra.mxu2 %v4812_v34 }
 0x1ad   : > { %v2766_v25 = vpop.f32.mrf.mxu2  ;;  %v2817_v29 = vpop.f32.mrf.mxu3 }
 0x1ae   : > { %v2818_v17 = vadd.f32 %v2817_v29, %v2764_v55  ;;  %v2767_v13 = vadd.f32 %v2766_v25, %v5669_v57  ;;  %v2666_v55 = vadd.f32 %v5776_v60, %v5418_v37 }
 0x1af   : > { %v2874_v43 = vpop.f32.mrf.mxu0 }
 0x1b0   : > { %v2872_v38 = vadd.f32 %v2871_v0, %v2818_v17  ;;  %v5853_v50 = vpop.f32.mrf.mxu1 }
 0x1b2   : > { %3185 = vst [vmem:[%s5831_s26 + $0x30] sm:$0xff] %v2872_v38  ;;  %3030 = vmatmul.bf16.gmra.mxu3 %v5329_v22  ;;  %3084 = vmatmul.bf16.gmra.mxu0 %v5354_v54  ;;  %v2715_v22 = vadd.f32 %v5723_v63, %v2661_v51 }
 0x1b3   : > { %3800 = vmatmul.msk.bf16.gmra.mxu1 %vm2611_vm5, %v5364_v10 }
 0x1b5   : > { %v2768_v34 = vpop.f32.mrf.mxu2  ;;  %v2820_v52 = vpop.f32.mrf.mxu3 }
 0x1b6   : > { %v2821_v61 = vadd.f32 %v2820_v52, %v2767_v13  ;;  %v2769_v54 = vadd.f32 %v2768_v34, %v2715_v22 }
 0x1b7   : > { %v2876_v23 = vpop.f32.mrf.mxu0 }
 0x1b8   : > { %v2875_v12 = vadd.f32 %v2874_v43, %v2821_v61  ;;  %v5863_v14 = vpop.f32.mrf.mxu1 }
 0x1ba   : > { %3187 = vst [vmem:[%s5831_s26 + $0x40] sm:$0xff] %v2875_v12  ;;  %2981 = vmatmul.bf16.gmra.mxu2 %v4976_v2 }
 0x1bd   : > { %v2771_v10 = vpop.f32.mrf.mxu2  ;;  %v2822_v28 = vpop.f32.mrf.mxu3 }
 0x1be   : > { %v2823_v57 = vadd.f32 %v2822_v28, %v2769_v54  ;;  %v2772_v46 = vadd.f32 %v2771_v10, %v5762_v8  ;;  %v2676_v10 = vadd.f32 %v5576_v19, %v5418_v37  ;;  %v6075_v19 = vld [vmem:[#allocation9_spill] sm:$0xff] }
 0x1bf   : > { %v2879_v21 = vpop.f32.mrf.mxu0 }
 0x1c0   : > { %v2877_v40 = vadd.f32 %v2876_v23, %v2823_v57  ;;  %v5868_v0 = vpop.f32.mrf.mxu1 }
 0x1c2   : > { %3189 = vst [vmem:[%s5831_s26 + $0x50] sm:$0xff] %v2877_v40  ;;  %3035 = vmatmul.bf16.gmra.mxu3 %v5400_v30  ;;  %3089 = vmatmul.bf16.gmra.mxu0 %v5437_v47  ;;  %v2720_v30 = vadd.f32 %v5780_v27, %v2666_v55 }
 0x1c3   : > { %3801 = vmatmul.msk.bf16.gmra.mxu1 %vm2611_vm5, %v5439_v41 }
 0x1c5   : > { %v2773_v2 = vpop.f32.mrf.mxu2  ;;  %v2825_v63 = vpop.f32.mrf.mxu3 }
 0x1c6   : > { %v2826_v36 = vadd.f32 %v2825_v63, %v2772_v46  ;;  %v2774_v47 = vadd.f32 %v2773_v2, %v2720_v30 }
 0x1c7   : > { %v2881_v3 = vpop.f32.mrf.mxu0 }
 0x1c8   : > { %v2880_v25 = vadd.f32 %v2879_v21, %v2826_v36  ;;  %v5878_v29 = vpop.f32.mrf.mxu1 }
 0x1ca   : > { %3191 = vst [vmem:[%s5831_s26 + $0x60] sm:$0xff] %v2880_v25  ;;  %2986 = vmatmul.bf16.gmra.mxu2 %v5099_v9 }
 0x1cd   : > { %v2776_v41 = vpop.f32.mrf.mxu2  ;;  %v2827_v17 = vpop.f32.mrf.mxu3 }
 0x1ce   : > { %v2828_v8 = vadd.f32 %v2827_v17, %v2774_v47  ;;  %v2777_v60 = vadd.f32 %v2776_v41, %v5800_v26  ;;  %v2681_v17 = vadd.f32 %v5679_v44, %v5418_v37 }
 0x1cf   : > { %v2884_v43 = vpop.f32.mrf.mxu0 }
 0x1d0   : > { %v2882_v38 = vadd.f32 %v2881_v3, %v2828_v8  ;;  %v5883_v13 = vpop.f32.mrf.mxu1 }
 0x1d2   : > { %3193 = vst [vmem:[%s5831_s26 + $0x70] sm:$0xff] %v2882_v38  ;;  %3040 = vmatmul.bf16.gmra.mxu3 %v5479_v58  ;;  %3094 = vmatmul.bf16.gmra.mxu0 %v5527_v35  ;;  %v6077_v38 = vld [vmem:[#allocation10_spill] sm:$0xff] }
 0x1d3   : > { %3802 = vmatmul.msk.bf16.gmra.mxu1 %vm2611_vm5, %v5530_v42 }
 0x1d5   : > { %v2778_v9 = vpop.f32.mrf.mxu2  ;;  %v2830_v27 = vpop.f32.mrf.mxu3 }
 0x1d6   : > { %v2831_v34 = vadd.f32 %v2830_v27, %v2777_v60  ;;  %v2779_v58 = vadd.f32 %v2778_v9, %v5811_v18  ;;  %v2735_v60 = vadd.f32 %v6077_v38, %v2681_v17  ;;  %v6085_v38 = vld [vmem:[#allocation15_spill] sm:$0xff] }
 0x1d7   : > { %v2886_v52 = vpop.f32.mrf.mxu0 }
 0x1d8   : > { %v2885_v51 = vadd.f32 %v2884_v43, %v2831_v34  ;;  %v5891_v61 = vpop.f32.mrf.mxu1 }
 0x1da   : > { %3195 = vst [vmem:[%s5831_s26 + $0x80] sm:$0xff] %v2885_v51  ;;  %2991 = vmatmul.bf16.gmra.mxu2 %v5185_v53 }
 0x1dd   : > { %v2781_v23 = vpop.f32.mrf.mxu2  ;;  %v2832_v35 = vpop.f32.mrf.mxu3 }
 0x1de   : > { %v2833_v12 = vadd.f32 %v2832_v35, %v2779_v58  ;;  %v2782_v53 = vadd.f32 %v2781_v23, %v5511_v20 }
 0x1df   : > { %v2889_v22 = vpop.f32.mrf.mxu0 }
 0x1e0   : > { %v2887_v42 = vadd.f32 %v2886_v52, %v2833_v12  ;;  %v5896_v26 = vpop.f32.mrf.mxu1  ;;  %v2686_v12 = vadd.f32 %v5747_v48, %v5418_v37  ;;  %v6080_v37 = vld [vmem:[#allocation11_spill] sm:$0xff]  ;;  %v6081_v48 = vld [vmem:[#allocation13_spill] sm:$0xff] }
 0x1e2   : > { %3197 = vst [vmem:[%s5831_s26 + $0x90] sm:$0xff] %v2887_v42  ;;  %3045 = vmatmul.bf16.gmra.mxu3 %v5558_v49  ;;  %3099 = vmatmul.bf16.gmra.mxu0 %v5610_v62  ;;  %v2730_v49 = vadd.f32 %v5607_v59, %v2676_v10  ;;  %v6074_v62 = vld [vmem:[#allocation4_spill] sm:$0xff] }
 0x1e3   : > { %3803 = vmatmul.msk.bf16.gmra.mxu1 %vm2611_vm5, %v5612_v56  ;;  %v6076_v59 = vld [vmem:[#allocation8_spill] sm:$0xff] }
 0x1e5   : > { %v2783_v54 = vpop.f32.mrf.mxu2  ;;  %v2835_v18 = vpop.f32.mrf.mxu3 }
 0x1e6   : > { %v2836_v28 = vadd.f32 %v2835_v18, %v2782_v53  ;;  %v2784_v46 = vadd.f32 %v2783_v54, %v2730_v49 }
 0x1e7   : > { %v2891_v57 = vpop.f32.mrf.mxu0 }
 0x1e8   : > { %v2890_v21 = vadd.f32 %v2889_v22, %v2836_v28  ;;  %v5906_v40 = vpop.f32.mrf.mxu1 }
 0x1ea   : > { %3199 = vst [vmem:[%s5831_s26 + $0xa0] sm:$0xff] %v2890_v21  ;;  %2996 = vmatmul.bf16.gmra.mxu2 %v6074_v62 }
 0x1ed   : > { %v2786_v56 = vpop.f32.mrf.mxu2  ;;  %v2837_v2 = vpop.f32.mrf.mxu3 }
 0x1ee   : > { %v2838_v20 = vadd.f32 %v2837_v2, %v2784_v46  ;;  %v2787_v55 = vadd.f32 %v2786_v56, %v6076_v59 }
 0x1ef   : > { %v2894_v63 = vpop.f32.mrf.mxu0 }
 0x1f0   : > { %v2892_v36 = vadd.f32 %v2891_v57, %v2838_v20  ;;  %v5911_v3 = vpop.f32.mrf.mxu1 }
 0x1f2   : > { %3201 = vst [vmem:[%s5831_s26 + $0xb0] sm:$0xff] %v2892_v36  ;;  %3050 = vmatmul.bf16.gmra.mxu3 %v6075_v19  ;;  %3104 = vmatmul.bf16.gmra.mxu0 %v5685_v7  ;;  %v6078_v7 = vld [vmem:[#allocation5_spill] sm:$0xff]  ;;  %v6083_v36 = vld [vmem:[#allocation7_spill] sm:$0xff] }
 0x1f3   : > { %3804 = vmatmul.msk.bf16.gmra.mxu1 %vm2611_vm5, %v5687_v11 }
 0x1f5   : > { %v2788_v25 = vpop.f32.mrf.mxu2  ;;  %v2840_v30 = vpop.f32.mrf.mxu3 }
 0x1f6   : > { %v2841_v47 = vadd.f32 %v2840_v30, %v2787_v55  ;;  %v2789_v9 = vadd.f32 %v2788_v25, %v2735_v60  ;;  %v4043_v55 = vld [vmem:[%s6035_s2] sm:$0x3] }
 0x1f7   : > { %v2896_v41 = vpop.f32.mrf.mxu0  ;;  %v5957_v25 = vperm.slane %v4043_v55, 1 }
 0x1f8   : > { %v2895_v8 = vadd.f32 %v2894_v63, %v2841_v47  ;;  %v5921_v43 = vpop.f32.mrf.mxu1 }
 0x1fa   : > { %3203 = vst [vmem:[%s5831_s26 + $0xc0] sm:$0xff] %v2895_v8  ;;  %3001 = vmatmul.bf16.gmra.mxu2 %v6078_v7  ;;  %v2919_v8 = vadd.f32 %v5818_v15, %v5957_v25 }
 0x1fd   : > { %v2791_v11 = vpop.f32.mrf.mxu2  ;;  %v2842_v27 = vpop.f32.mrf.mxu3 }
 0x1fe   : > { %v2843_v34 = vadd.f32 %v2842_v27, %v2789_v9  ;;  %v2792_v44 = vadd.f32 %v2791_v11, %v5728_v45 }
 0x1ff   : > { %v2899_v52 = vpop.f32.mrf.mxu0 }
 0x200   : > { %v2897_v51 = vadd.f32 %v2896_v41, %v2843_v34  ;;  %v5926_v58 = vpop.f32.mrf.mxu1 }
 0x202   : > { %3205 = vst [vmem:[%s5831_s26 + $0xd0] sm:$0xff] %v2897_v51  ;;  %3055 = vmatmul.bf16.gmra.mxu3 %v5715_v4  ;;  %3109 = vmatmul.bf16.gmra.mxu0 %v5751_v1  ;;  %v2740_v4 = vadd.f32 %v5774_v33, %v2686_v12  ;;  %v6079_v1 = vld [vmem:[#allocation6_spill] sm:$0xff]  ;;  %v6082_v33 = vld [vmem:[#allocation12_spill] sm:$0xff]  ;;  %v2921_v51 = vadd.f32 %v5833_v24, %v5957_v25 }
 0x203   : > { %3805 = vmatmul.msk.bf16.gmra.mxu1 %vm2611_vm5, %v5753_v32 }
 0x205   : > { %v2793_v23 = vpop.f32.mrf.mxu2  ;;  %v2845_v35 = vpop.f32.mrf.mxu3 }
 0x206   : > { %v2846_v22 = vadd.f32 %v2845_v35, %v2792_v44  ;;  %v2794_v18 = vadd.f32 %v2793_v23, %v2740_v4 }
 0x207   : > { %v2901_v42 = vpop.f32.mrf.mxu0 }
 0x208   : > { %v2900_v53 = vadd.f32 %v2899_v52, %v2846_v22  ;;  %v5936_v54 = vpop.f32.mrf.mxu1 }
 0x20a   : > { %3207 = vst [vmem:[%s5831_s26 + $0xe0] sm:$0xff] %v2900_v53  ;;  %3006 = vmatmul.bf16.gmra.mxu2 %v6079_v1  ;;  %v2924_v53 = vadd.f32 %v5838_v39, %v5957_v25 }
 0x20d   : > { %v2796_v32 = vpop.f32.mrf.mxu2  ;;  %v2847_v10 = vpop.f32.mrf.mxu3 }
 0x20e   : > { %v2848_v45 = vadd.f32 %v2847_v10, %v2794_v18  ;;  %v2797_v49 = vadd.f32 %v2796_v32, %v6082_v33 }
 0x20f   : > { %v2904_v28 = vpop.f32.mrf.mxu0 }
 0x210   : > { %v2902_v57 = vadd.f32 %v2901_v42, %v2848_v45  ;;  %v5941_v21 = vpop.f32.mrf.mxu1 }
 0x212   : > { %3209 = vst [vmem:[%s5831_s26 + $0xf0] sm:$0xff] %v2902_v57  ;;  %3060 = vmatmul.bf16.gmra.mxu3 %v6080_v37  ;;  %3114 = vmatmul.bf16.gmra.mxu0 %v5792_v16  ;;  %v2926_v57 = vadd.f32 %v5848_v31, %v5957_v25 }
 0x213   : > { %3806 = vmatmul.msk.bf16.gmra.mxu1 %vm2611_vm5, %v6081_v48 }
 0x215   : > { %v2798_v62 = vpop.f32.mrf.mxu2  ;;  %v2850_v46 = vpop.f32.mrf.mxu3 }
 0x216   : > { %v2851_v56 = vadd.f32 %v2850_v46, %v2797_v49  ;;  %v2799_v19 = vadd.f32 %v2798_v62, %v5805_v6  ;;  %v6084_v6 = vld [vmem:[#allocation14_spill] sm:$0xff] }
 0x217   : > { %v2906_v2 = vpop.f32.mrf.mxu0 }
 0x218   : > { %v2905_v20 = vadd.f32 %v2904_v28, %v2851_v56  ;;  %v5949_v63 = vpop.f32.mrf.mxu1 }
 0x21a   : > { %3211 = vst [vmem:[%s5831_s26 + $0x100] sm:$0xff] %v2905_v20  ;;  %3011 = vmatmul.bf16.gmra.mxu2 %v6083_v36 }
 0x21d   : > { %v2852_v59 = vpop.f32.mrf.mxu3  ;;  %v2972_v16 = vpop.f32.mrf.mxu2 }
 0x21e   : > { %v2853_v30 = vadd.f32 %v2852_v59, %v2799_v19  ;;  %v2973_v60 = vadd.f32 %v2972_v16, %v2919_v8 }
 0x21f   : > { %v3080_v47 = vpop.f32.mrf.mxu0 }
 0x220   : > { %v2907_v41 = vadd.f32 %v2906_v2, %v2853_v30  ;;  %v3134_v17 = vpop.f32.mrf.mxu1  ;;  %v2929_v2 = vadd.f32 %v5853_v50, %v5957_v25 }
 0x222   : > { %3213 = vst [vmem:[%s5831_s26 + $0x110] sm:$0xff] %v2907_v41  ;;  %3065 = vmatmul.bf16.gmra.mxu3 %v5808_v5  ;;  %3119 = vmatmul.bf16.gmra.mxu0 %v6084_v6 }
 0x223   : > { %3807 = vmatmul.msk.bf16.gmra.mxu1 %vm2611_vm5, %v6085_v38 }
 0x225   : > { %v2974_v7 = vpop.f32.mrf.mxu2  ;;  %v3026_v9 = vpop.f32.mrf.mxu3 }
 0x226   : > { %v3027_v11 = vadd.f32 %v3026_v9, %v2973_v60  ;;  %v2975_v44 = vadd.f32 %v2974_v7, %v2921_v51  ;;  %v2934_v9 = vadd.f32 %v5868_v0, %v5957_v25 }
 0x227   : > { %v3082_v27 = vpop.f32.mrf.mxu0 }
 0x228   : > { %v3081_v34 = vadd.f32 %v3080_v47, %v3027_v11  ;;  %v3136_v52 = vpop.f32.mrf.mxu1  ;;  %v2931_v47 = vadd.f32 %v5863_v14, %v5957_v25 }
 0x22a   : > { %v3135_v15 = vadd.f32 %v3134_v17, %v3081_v34 }
 0x22c   : > { %3180 = vst [vmem:[%s5831_s26 + $0x8] sm:$0xff] %v3135_v15 }
 0x22d   : > { %v2977_v5 = vpop.f32.mrf.mxu2  ;;  %v3028_v23 = vpop.f32.mrf.mxu3 }
 0x22e   : > { %v3029_v35 = vadd.f32 %v3028_v23, %v2975_v44  ;;  %v2978_v1 = vadd.f32 %v2977_v5, %v2924_v53  ;;  %v2936_v5 = vadd.f32 %v5878_v29, %v5957_v25 }
 0x22f   : > { %v3085_v12 = vpop.f32.mrf.mxu0 }
 0x230   : > { %v3083_v22 = vadd.f32 %v3082_v27, %v3029_v35  ;;  %v3139_v42 = vpop.f32.mrf.mxu1 }
 0x232   : > { %v3137_v4 = vadd.f32 %v3136_v52, %v3083_v22 }
 0x234   : > { %3182 = vst [vmem:[%s5831_s26 + $0x18] sm:$0xff] %v3137_v4 }
 0x235   : > { %v2979_v18 = vpop.f32.mrf.mxu2  ;;  %v3031_v32 = vpop.f32.mrf.mxu3 }
 0x236   : > { %v3032_v10 = vadd.f32 %v3031_v32, %v2978_v1  ;;  %v2980_v48 = vadd.f32 %v2979_v18, %v2926_v57  ;;  %v2939_v1 = vadd.f32 %v5883_v13, %v5957_v25 }
 0x237   : > { %v3087_v24 = vpop.f32.mrf.mxu0 }
 0x238   : > { %v3086_v45 = vadd.f32 %v3085_v12, %v3032_v10  ;;  %v3141_v28 = vpop.f32.mrf.mxu1 }
 0x23a   : > { %v3140_v37 = vadd.f32 %v3139_v42, %v3086_v45 }
 0x23c   : > { %3184 = vst [vmem:[%s5831_s26 + $0x28] sm:$0xff] %v3140_v37  ;;  %v2941_v37 = vadd.f32 %v5891_v61, %v5957_v25 }
 0x23d   : > { %v2982_v33 = vpop.f32.mrf.mxu2  ;;  %v3033_v49 = vpop.f32.mrf.mxu3 }
 0x23e   : > { %v3034_v62 = vadd.f32 %v3033_v49, %v2980_v48  ;;  %v2983_v36 = vadd.f32 %v2982_v33, %v2929_v2  ;;  %v2944_v2 = vadd.f32 %v5896_v26, %v5957_v25 }
 0x23f   : > { %v3090_v39 = vpop.f32.mrf.mxu0 }
 0x240   : > { %v3088_v46 = vadd.f32 %v3087_v24, %v3034_v62  ;;  %v3144_v56 = vpop.f32.mrf.mxu1 }
 0x242   : > { %v3142_v20 = vadd.f32 %v3141_v28, %v3088_v46 }
 0x244   : > { %3186 = vst [vmem:[%s5831_s26 + $0x38] sm:$0xff] %v3142_v20 }
 0x245   : > { %v2984_v19 = vpop.f32.mrf.mxu2  ;;  %v3036_v59 = vpop.f32.mrf.mxu3 }
 0x246   : > { %v3037_v16 = vadd.f32 %v3036_v59, %v2983_v36  ;;  %v2985_v17 = vadd.f32 %v2984_v19, %v2931_v47 }
 0x247   : > { %v3092_v31 = vpop.f32.mrf.mxu0 }
 0x248   : > { %v3091_v55 = vadd.f32 %v3090_v39, %v3037_v16  ;;  %v3146_v30 = vpop.f32.mrf.mxu1 }
 0x24a   : > { %v3145_v41 = vadd.f32 %v3144_v56, %v3091_v55 }
 0x24c   : > { %3188 = vst [vmem:[%s5831_s26 + $0x48] sm:$0xff] %v3145_v41 }
 0x24d   : > { %v2987_v8 = vpop.f32.mrf.mxu2  ;;  %v3038_v6 = vpop.f32.mrf.mxu3 }
 0x24e   : > { %v3039_v38 = vadd.f32 %v3038_v6, %v2985_v17  ;;  %v2988_v27 = vadd.f32 %v2987_v8, %v2934_v9 }
 0x24f   : > { %v3095_v50 = vpop.f32.mrf.mxu0 }
 0x250   : > { %v3093_v60 = vadd.f32 %v3092_v31, %v3039_v38  ;;  %v3149_v7 = vpop.f32.mrf.mxu1 }
 0x252   : > { %v3147_v11 = vadd.f32 %v3146_v30, %v3093_v60  ;;  %v2946_v30 = vadd.f32 %v5906_v40, %v5957_v25  ;;  %v2949_v60 = vadd.f32 %v5911_v3, %v5957_v25 }
 0x254   : > { %3190 = vst [vmem:[%s5831_s26 + $0x58] sm:$0xff] %v3147_v11 }
 0x255   : > { %v2989_v34 = vpop.f32.mrf.mxu2  ;;  %v3041_v52 = vpop.f32.mrf.mxu3 }
 0x256   : > { %v3042_v51 = vadd.f32 %v3041_v52, %v2988_v27  ;;  %v2990_v35 = vadd.f32 %v2989_v34, %v2936_v5 }
 0x257   : > { %v3097_v14 = vpop.f32.mrf.mxu0 }
 0x258   : > { %v3096_v15 = vadd.f32 %v3095_v50, %v3042_v51  ;;  %v3151_v44 = vpop.f32.mrf.mxu1 }
 0x25a   : > { %v3150_v23 = vadd.f32 %v3149_v7, %v3096_v15 }
 0x25c   : > { %3192 = vst [vmem:[%s5831_s26 + $0x68] sm:$0xff] %v3150_v23 }
 0x25d   : > { %v2992_v12 = vpop.f32.mrf.mxu2  ;;  %v3043_v22 = vpop.f32.mrf.mxu3 }
 0x25e   : > { %v3044_v42 = vadd.f32 %v3043_v22, %v2990_v35  ;;  %v2993_v32 = vadd.f32 %v2992_v12, %v2939_v1  ;;  %v2954_v22 = vadd.f32 %v5926_v58, %v5957_v25 }
 0x25f   : > { %v3100_v0 = vpop.f32.mrf.mxu0 }
 0x260   : > { %v3098_v53 = vadd.f32 %v3097_v14, %v3044_v42  ;;  %v3154_v4 = vpop.f32.mrf.mxu1  ;;  %v2951_v14 = vadd.f32 %v5921_v43, %v5957_v25 }
 0x262   : > { %v3152_v18 = vadd.f32 %v3151_v44, %v3098_v53 }
 0x264   : > { %3194 = vst [vmem:[%s5831_s26 + $0x78] sm:$0xff] %v3152_v18 }
 0x265   : > { %v2994_v10 = vpop.f32.mrf.mxu2  ;;  %v3046_v24 = vpop.f32.mrf.mxu3 }
 0x266   : > { %v3047_v45 = vadd.f32 %v3046_v24, %v2993_v32  ;;  %v2995_v33 = vadd.f32 %v2994_v10, %v2941_v37  ;;  %v2956_v32 = vadd.f32 %v5936_v54, %v5957_v25 }
 0x267   : > { %v3102_v29 = vpop.f32.mrf.mxu0 }
 0x268   : > { %v3101_v28 = vadd.f32 %v3100_v0, %v3047_v45  ;;  %v3156_v57 = vpop.f32.mrf.mxu1 }
 0x26a   : > { %v3155_v48 = vadd.f32 %v3154_v4, %v3101_v28 }
 0x26c   : > { %3196 = vst [vmem:[%s5831_s26 + $0x88] sm:$0xff] %v3155_v48  ;;  %v2959_v48 = vadd.f32 %v5941_v21, %v5957_v25 }
 0x26d   : > { %v2997_v49 = vpop.f32.mrf.mxu2  ;;  %v3048_v62 = vpop.f32.mrf.mxu3 }
 0x26e   : > { %v3049_v39 = vadd.f32 %v3048_v62, %v2995_v33  ;;  %v2998_v36 = vadd.f32 %v2997_v49, %v2944_v2  ;;  %v2961_v2 = vadd.f32 %v5949_v63, %v5957_v25 }
 0x26f   : > { %v3105_v13 = vpop.f32.mrf.mxu0 }
 0x270   : > { %v3103_v46 = vadd.f32 %v3102_v29, %v3049_v39  ;;  %v3159_v56 = vpop.f32.mrf.mxu1 }
 0x272   : > { %v3157_v20 = vadd.f32 %v3156_v57, %v3103_v46 }
 0x274   : > { %3198 = vst [vmem:[%s5831_s26 + $0x98] sm:$0xff] %v3157_v20 }
 0x275   : > { %v2999_v19 = vpop.f32.mrf.mxu2  ;;  %v3051_v59 = vpop.f32.mrf.mxu3 }
 0x276   : > { %v3052_v16 = vadd.f32 %v3051_v59, %v2998_v36  ;;  %v3000_v41 = vadd.f32 %v2999_v19, %v2946_v30 }
 0x277   : > { %v3107_v61 = vpop.f32.mrf.mxu0 }
 0x278   : > { %v3106_v31 = vadd.f32 %v3105_v13, %v3052_v16  ;;  %v3161_v55 = vpop.f32.mrf.mxu1 }
 0x27a   : > { %v3160_v47 = vadd.f32 %v3159_v56, %v3106_v31 }
 0x27c   : > { %3200 = vst [vmem:[%s5831_s26 + $0xa8] sm:$0xff] %v3160_v47 }
 0x27d   : > { %v3002_v17 = vpop.f32.mrf.mxu2  ;;  %v3053_v8 = vpop.f32.mrf.mxu3 }
 0x27e   : > { %v3054_v6 = vadd.f32 %v3053_v8, %v3000_v41  ;;  %v3003_v9 = vadd.f32 %v3002_v17, %v2949_v60 }
 0x27f   : > { %v3110_v26 = vpop.f32.mrf.mxu0 }
 0x280   : > { %v3108_v38 = vadd.f32 %v3107_v61, %v3054_v6  ;;  %v3164_v50 = vpop.f32.mrf.mxu1 }
 0x282   : > { %v3162_v7 = vadd.f32 %v3161_v55, %v3108_v38 }
 0x284   : > { %3202 = vst [vmem:[%s5831_s26 + $0xb8] sm:$0xff] %v3162_v7 }
 0x285   : > { %v3004_v11 = vpop.f32.mrf.mxu2  ;;  %v3056_v27 = vpop.f32.mrf.mxu3 }
 0x286   : > { %v3057_v34 = vadd.f32 %v3056_v27, %v3003_v9  ;;  %v3005_v44 = vadd.f32 %v3004_v11, %v2951_v14 }
 0x287   : > { %v3112_v40 = vpop.f32.mrf.mxu0 }
 0x288   : > { %v3111_v52 = vadd.f32 %v3110_v26, %v3057_v34  ;;  %v3166_v51 = vpop.f32.mrf.mxu1 }
 0x28a   : > { %v3165_v15 = vadd.f32 %v3164_v50, %v3111_v52 }
 0x28c   : > { %3204 = vst [vmem:[%s5831_s26 + $0xc8] sm:$0xff] %v3165_v15 }
 0x28d   : > { %v3007_v5 = vpop.f32.mrf.mxu2  ;;  %v3058_v23 = vpop.f32.mrf.mxu3 }
 0x28e   : > { %v3059_v35 = vadd.f32 %v3058_v23, %v3005_v44  ;;  %v3008_v53 = vadd.f32 %v3007_v5, %v2954_v22 }
 0x28f   : > { %v3115_v12 = vpop.f32.mrf.mxu0 }
 0x290   : > { %v3113_v3 = vadd.f32 %v3112_v40, %v3059_v35  ;;  %v3169_v0 = vpop.f32.mrf.mxu1 }
 0x292   : > { %v3167_v42 = vadd.f32 %v3166_v51, %v3113_v3 }
 0x294   : > { %3206 = vst [vmem:[%s5831_s26 + $0xd8] sm:$0xff] %v3167_v42 }
 0x295   : > { %v3009_v4 = vpop.f32.mrf.mxu2  ;;  %v3061_v1 = vpop.f32.mrf.mxu3 }
 0x296   : > { %v3062_v43 = vadd.f32 %v3061_v1, %v3008_v53  ;;  %v3010_v45 = vadd.f32 %v3009_v4, %v2956_v32 }
 0x297   : > { %v3117_v24 = vpop.f32.mrf.mxu0 }
 0x298   : > { %v3116_v18 = vadd.f32 %v3115_v12, %v3062_v43  ;;  %v3171_v29 = vpop.f32.mrf.mxu1 }
 0x29a   : > { %v3170_v10 = vadd.f32 %v3169_v0, %v3116_v18 }
 0x29c   : > { %3208 = vst [vmem:[%s5831_s26 + $0xe8] sm:$0xff] %v3170_v10 }
 0x29d   : > { %v3063_v28 = vpop.f32.mrf.mxu3  ;;  %v3012_v58 = vpop.f32.mrf.mxu2 }
 0x29e   : > { %v3064_v57 = vadd.f32 %v3063_v28, %v3010_v45  ;;  %v3013_v49 = vadd.f32 %v3012_v58, %v2959_v48 }
 0x29f   : > { %v3120_v62 = vpop.f32.mrf.mxu0 }
 0x2a0   : > { %v3118_v37 = vadd.f32 %v3117_v24, %v3064_v57  ;;  %v3174_v13 = vpop.f32.mrf.mxu1 }
 0x2a2   : > { %v3172_v33 = vadd.f32 %v3171_v29, %v3118_v37 }
 0x2a4   : > { %3210 = vst [vmem:[%s5831_s26 + $0xf8] sm:$0xff] %v3172_v33 }
 0x2a5   : > { %v3066_v39 = vpop.f32.mrf.mxu3  ;;  %v3014_v56 = vpop.f32.mrf.mxu2 }
 0x2a6   : > { %v3067_v54 = vadd.f32 %v3066_v39, %v3013_v49  ;;  %v3015_v36 = vadd.f32 %v3014_v56, %v2961_v2 }
 0x2a7   : > { %v3122_v16 = vpop.f32.mrf.mxu0 }
 0x2a8   : > { %v3121_v46 = vadd.f32 %v3120_v62, %v3067_v54  ;;  %v3176_v61 = vpop.f32.mrf.mxu1 }
 0x2aa   : > { %v3175_v20 = vadd.f32 %v3174_v13, %v3121_v46 }
 0x2ac   : > { %3212 = vst [vmem:[%s5831_s26 + $0x108] sm:$0xff] %v3175_v20 }
 0x2ad   : > { %v3068_v19 = vpop.f32.mrf.mxu3 }
 0x2ae   : > { %v3069_v59 = vadd.f32 %v3068_v19, %v3015_v36 }
 0x2b0   : > { %v3123_v21 = vadd.f32 %v3122_v16, %v3069_v59 }
 0x2b2   : > { %v3177_v31 = vadd.f32 %v3176_v61, %v3123_v21 }
 0x2b4   : > { %3214 = vst [vmem:[%s5831_s26 + $0x118] sm:$0xff] %v3177_v31 }
 0x2b5 PF: > { %s13_s16 = sadd.s32 1, %s4082_s16   ;;  %s6086_s12 = smov %s4074_s14 }
 0x2b6   : > { %p10_p7 = scmp.ge.s32.totalorder %s13_s16, 6   ;;  %s6087_s13 = smov %s4078_s15 }
 0x2b7   : > { %s6088_s14 = smov %s6091_s17  ;;  %s6089_s15 = smov %s6095_s18 }
 0x2b8   :  { %12 = sbr.rel (!%p10_p7) target bundleno = 3 (0x3), region = 62 }

</bundles_post_ra>
